<compile_context>
chip_gen: v7x
topology: tpu7x:2x2x1
jax: 0.10.0
libtpu: 0.0.40
codegen_flags: <defaults>
</compile_context>

<pallas_src>
import jax
import jax.numpy as jnp
from jax.experimental import pallas as pl
from jax.experimental.pallas import tpu as pltpu

EMBED = 128
HIDDEN = 512
NLAYERS = 3
G3 = 3 * HIDDEN          # i, g, o gate columns (forget gate dropped: c_prev == 0)
WROWS = 2 * HIDDEN       # stacked [W_ih (padded to 512 rows); W_hh]


# ------------------------------ fused kernel --------------------------------


def _fused_multilstm_kernel(tokens_ref,     # (B,)           int32 SMEM (scalar prefetch)
                            emb_ref,        # (V, 128)       f32   HBM (pl.ANY)
                            h_ref,          # (B, 512)       f32   VMEM block (layer l)
                            w_ref,          # (1024, 1536)   bf16  VMEM block (layer l)
                            b_ref,          # (1, 1536)      f32   VMEM block (layer l)
                            wl_ref,         # (512, V)       bf16  VMEM (resident)
                            bl_ref,         # (1, V)         f32   VMEM (resident)
                            logits_ref,     # (B, V)         f32   out (written last step)
                            hout_ref,       # (B, 512)       f32   out block (layer l)
                            x_carry,        # (B, 512)       f32   scratch: input to layer l
                            x_emb,          # (B, 128)       f32   scratch: gathered embeddings
                            emb_sem):       # (B,)           DMA semaphores
    l = pl.program_id(0)
    B = x_carry.shape[0]
    H = HIDDEN

    @pl.when(l == 0)
    def _gather_embedding():
        # Row-gather of the embedded tokens straight from HBM (replaces the
        # separate jnp.take op + its HBM round trip + launch boundary).
        copies = []
        for b in range(B):
            tok = tokens_ref[b]
            cp = pltpu.make_async_copy(emb_ref.at[pl.ds(tok, 1), :],
                                       x_emb.at[pl.ds(b, 1), :],
                                       emb_sem.at[b])
            cp.start()
            copies.append(cp)
        # Zero the layer-0 input while the gathers are in flight (the padded
        # weight rows 128:512 of layer 0 are zero as well, so this is doubly safe).
        x_carry[...] = jnp.zeros_like(x_carry)
        for cp in copies:
            cp.wait()
        x_carry[:, 0:EMBED] = x_emb[...]

    x = x_carry[...].astype(w_ref.dtype)     # (B, 512) input to this layer
    h = h_ref[...].astype(w_ref.dtype)       # (B, 512) hidden state of this layer

    # Two MXU dots accumulated in f32 (no lane-axis concat copy). Gates: i, g, o.
    gates = (jnp.dot(x, w_ref[0:H, :], preferred_element_type=jnp.float32)
             + jnp.dot(h, w_ref[H:2 * H, :], preferred_element_type=jnp.float32)
             + b_ref[...])

    i_g = jax.nn.sigmoid(gates[:, 0 * H:1 * H])
    g_g = jnp.tanh(gates[:, 1 * H:2 * H])
    o_g = jax.nn.sigmoid(gates[:, 2 * H:3 * H])
    # c_prev == 0 in the reference, so c_new = i * g (forget gate is dead).
    h_new = o_g * jnp.tanh(i_g * g_g)

    hout_ref[...] = h_new
    x_carry[...] = h_new                     # becomes the next layer's input

    @pl.when(l == NLAYERS - 1)
    def _linear_head():
        logits_ref[...] = (jnp.dot(h_new.astype(wl_ref.dtype), wl_ref[...],
                                   preferred_element_type=jnp.float32)
                           + bl_ref[...]).astype(logits_ref.dtype)


def _build_pallas_call(B, V):
    grid_spec = pltpu.PrefetchScalarGridSpec(
        num_scalar_prefetch=1,                # tokens -> SMEM
        grid=(NLAYERS,),
        in_specs=[
            pl.BlockSpec(memory_space=pl.ANY),                           # embedding table (HBM)
            pl.BlockSpec((None, B, HIDDEN), lambda l, tok: (l, 0, 0)),   # h (per-layer block)
            pl.BlockSpec((None, WROWS, G3), lambda l, tok: (l, 0, 0)),   # stacked [W_ih; W_hh] (per layer)
            pl.BlockSpec((None, 1, G3), lambda l, tok: (l, 0, 0)),       # stacked biases (per layer)
            pl.BlockSpec((HIDDEN, V), lambda l, tok: (0, 0)),            # linear W (fetched once, resident)
            pl.BlockSpec((1, V), lambda l, tok: (0, 0)),                 # linear b (resident)
        ],
        out_specs=[
            pl.BlockSpec((B, V), lambda l, tok: (0, 0)),                 # logits (written last step)
            pl.BlockSpec((None, B, HIDDEN), lambda l, tok: (l, 0, 0)),   # h_out (per-layer block)
        ],
        scratch_shapes=[
            pltpu.VMEM((B, HIDDEN), jnp.float32),   # x_carry: current layer input
            pltpu.VMEM((B, EMBED), jnp.float32),    # gathered embedding rows
            pltpu.SemaphoreType.DMA((B,)),          # per-row gather semaphores
        ],
    )
    return pl.pallas_call(
        _fused_multilstm_kernel,
        grid_spec=grid_spec,
        out_shape=(
            jax.ShapeDtypeStruct((B, V), jnp.float32),
            jax.ShapeDtypeStruct((NLAYERS, B, HIDDEN), jnp.float32),
        ),
        compiler_params=pltpu.CompilerParams(
            # Layers carry a dependence through the x_carry scratch -> sequential.
            dimension_semantics=("arbitrary",),
            vmem_limit_bytes=32 * 1024 * 1024,      # ~7 MiB actually used (v7x-safe)
        ),
    )


# ------------------------------ model wrapper --------------------------------


def _keep_igo(w4h):
    """Drop the (dead) forget-gate columns from a PyTorch-ordered [i,f,g,o] tensor."""
    H = HIDDEN
    return jnp.concatenate(
        [w4h[..., 0:H], w4h[..., 2 * H:3 * H], w4h[..., 3 * H:4 * H]], axis=-1)


def init_params(key, voc_size):
    """Random init mirroring the PyTorch module's shapes.

    Weights stored bf16, pre-transposed to (in, out); forget-gate columns
    removed; per-layer [W_ih; W_hh] stacked into one (3, 1024, 1536) tensor
    (layer 0's W_ih zero-padded 128 -> 512 rows so all layers share a shape).
    """
    keys = jax.random.split(key, 16)
    k = iter(keys)

    def uni(rng, shape, scale):
        return jax.random.uniform(rng, shape, jnp.float32, -scale, scale)

    s = 1.0 / (HIDDEN ** 0.5)
    params = {"embedding":
              jax.random.normal(next(k), (voc_size, EMBED), jnp.float32) * 0.1}

    w_blocks, b_blocks = [], []
    for din in (EMBED, HIDDEN, HIDDEN):
        w_ih_t = _keep_igo(uni(next(k), (din, 4 * HIDDEN), s))        # (din, 3H)
        w_hh_t = _keep_igo(uni(next(k), (HIDDEN, 4 * HIDDEN), s))     # (H,   3H)
        if din < HIDDEN:   # layer 0: zero-pad so all layers share (1024, 3H)
            w_ih_t = jnp.pad(w_ih_t, ((0, HIDDEN - din), (0, 0)))
        w_blocks.append(jnp.concatenate([w_ih_t, w_hh_t], axis=0))    # (1024, 3H)
        b_ih = _keep_igo(uni(next(k), (1, 4 * HIDDEN), s))
        b_hh = _keep_igo(uni(next(k), (1, 4 * HIDDEN), s))
        b_blocks.append(b_ih + b_hh)                                  # (1, 3H)

    params["w_stack"] = jnp.stack(w_blocks).astype(jnp.bfloat16)      # (3, 1024, 1536)
    params["b_stack"] = jnp.stack(b_blocks)                           # (3, 1, 1536) f32
    params["w_lin"] = uni(next(k), (HIDDEN, voc_size), s).astype(jnp.bfloat16)
    params["b_lin"] = uni(next(k), (1, voc_size), s)
    return params


def init_h(batch_size):
    return jnp.zeros((NLAYERS, batch_size, HIDDEN), jnp.float32)


@jax.jit
def multi_lstm_forward(params, tokens, h):
    B = tokens.shape[0]
    V = params["w_lin"].shape[-1]
    call = _build_pallas_call(B, V)
    logits, h_out = call(tokens, params["embedding"], h,
                         params["w_stack"], params["b_stack"],
                         params["w_lin"], params["b_lin"])
    return logits, h_out


def _reference_forward(params, tokens, h):
    """Pure-JAX f32 oracle with the same zero-cell-state interpretation."""
    H = HIDDEN
    x = jnp.take(params["embedding"], tokens, axis=0)                 # (B, 128)
    xin = jnp.pad(x, ((0, 0), (0, HIDDEN - EMBED)))                   # weight rows 128:512 are zero
    w_stack = params["w_stack"].astype(jnp.float32)
    w_lin = params["w_lin"].astype(jnp.float32)
    h_out = []
    for l in range(NLAYERS):
        gates = xin @ w_stack[l, :H] + h[l] @ w_stack[l, H:] + params["b_stack"][l]
        i_g = jax.nn.sigmoid(gates[:, 0 * H:1 * H])
        g_g = jnp.tanh(gates[:, 1 * H:2 * H])
        o_g = jax.nn.sigmoid(gates[:, 2 * H:3 * H])
        xin = o_g * jnp.tanh(i_g * g_g)
        h_out.append(xin)
    logits = xin @ w_lin + params["b_lin"]
    return logits, jnp.stack(h_out, axis=0)


if __name__ == "__main__":
    voc_size = 256
    batch = 8   # weight-BW bound: per-token cost ~flat in B, so treat 8 as a floor

    key = jax.random.PRNGKey(0)
    k_params, k_tok, k_h = jax.random.split(key, 3)

    params = init_params(k_params, voc_size)
    tokens = jax.random.randint(k_tok, (batch,), 0, voc_size, jnp.int32)
    h = jax.random.normal(k_h, (NLAYERS, batch, HIDDEN), jnp.float32) * 0.1

    logits, h_out = multi_lstm_forward(params, tokens, h)
    jax.block_until_ready((logits, h_out))

    assert logits.shape == (batch, voc_size)
    assert h_out.shape == (NLAYERS, batch, HIDDEN)
    assert bool(jnp.all(jnp.isfinite(logits)))
    assert bool(jnp.all(jnp.isfinite(h_out)))

    ref_logits, ref_h_out = _reference_forward(params, tokens, h)
    assert bool(jnp.allclose(logits, ref_logits, rtol=2e-2, atol=2e-2)), \
        float(jnp.max(jnp.abs(logits - ref_logits)))
    assert bool(jnp.allclose(h_out, ref_h_out, rtol=2e-2, atol=2e-2)), \
        float(jnp.max(jnp.abs(h_out - ref_h_out)))

    print("KERNEL_OK")
</pallas_src>

<mosaic_0001>
module attributes {stable_mosaic.version = 11 : i64} {
  func.func @_fused_multilstm_kernel(%arg0: i32, %arg1: memref<8xi32, #tpu.memory_space<smem>>, %arg2: memref<256x128xf32, #tpu.memory_space<any>>, %arg3: memref<1x8x512xf32, #tpu.memory_space<vmem>>, %arg4: memref<1x1024x1536xbf16, #tpu.memory_space<vmem>>, %arg5: memref<1x1x1536xf32, #tpu.memory_space<vmem>>, %arg6: memref<512x256xbf16, #tpu.memory_space<vmem>>, %arg7: memref<1x256xf32, #tpu.memory_space<vmem>>, %arg8: memref<8x256xf32, #tpu.memory_space<vmem>>, %arg9: memref<1x8x512xf32, #tpu.memory_space<vmem>>, %arg10: memref<8x512xf32, #tpu.memory_space<vmem>>, %arg11: memref<8x128xf32, #tpu.memory_space<vmem>>, %arg12: memref<8x!tpu.dma_semaphore, #tpu.memory_space<semaphore_mem>>) attributes {dimension_semantics = [#tpu.dimension_semantics<arbitrary>], iteration_bounds = array<i64: 3>, scalar_prefetch = 1 : i64, scratch_operands = 3 : i64, tpu.core_type = #tpu.core_type<tc>, window_params = [{}, {transform_indices = @transform_1, window_bounds = array<i64: 1, 8, 512>}, {transform_indices = @transform_2, window_bounds = array<i64: 1, 1024, 1536>}, {transform_indices = @transform_3, window_bounds = array<i64: 1, 1, 1536>}, {pipeline_mode = #tpu.pipeline_mode<synchronous>, transform_indices = @transform_4, window_bounds = array<i64: 512, 256>}, {pipeline_mode = #tpu.pipeline_mode<synchronous>, transform_indices = @transform_5, window_bounds = array<i64: 1, 256>}, {pipeline_mode = #tpu.pipeline_mode<synchronous>, transform_indices = @transform_6, window_bounds = array<i64: 8, 256>}, {transform_indices = @transform_7, window_bounds = array<i64: 1, 8, 512>}]} {
    %c0_i32 = arith.constant 0 : i32
    %0 = arith.cmpi eq, %arg0, %c0_i32 : i32
    %1 = arith.extui %0 : i1 to i32
    %c0_i32_0 = arith.constant 0 : i32
    %2 = arith.cmpi ne, %1, %c0_i32_0 : i32
    scf.if %2 {
      %c0_22 = arith.constant 0 : index
      %43 = memref.load %arg1[%c0_22] : memref<8xi32, #tpu.memory_space<smem>>
      %c0_i32_23 = arith.constant 0 : i32
      %c0_i32_24 = arith.constant 0 : i32
      %44 = tpu.memref_slice %arg2[%43, %c0_i32_24] : memref<256x128xf32, #tpu.memory_space<any>> -> memref<1x128xf32, #tpu.memory_space<any>>
      %c0_i32_25 = arith.constant 0 : i32
      %c0_i32_26 = arith.constant 0 : i32
      %45 = tpu.memref_slice %arg11[%c0_i32_25, %c0_i32_26] : memref<8x128xf32, #tpu.memory_space<vmem>> -> memref<1x128xf32, #tpu.memory_space<vmem>>
      %46 = tpu.memref_slice %arg12[%c0_i32_23] : memref<8x!tpu.dma_semaphore, #tpu.memory_space<semaphore_mem>> -> memref<1x!tpu.dma_semaphore, #tpu.memory_space<semaphore_mem>>
      %47 = tpu.memref_squeeze %46 : memref<1x!tpu.dma_semaphore, #tpu.memory_space<semaphore_mem>> -> memref<!tpu.dma_semaphore, #tpu.memory_space<semaphore_mem>>
      tpu.enqueue_dma source(%44 : memref<1x128xf32, #tpu.memory_space<any>>) target(%45 : memref<1x128xf32, #tpu.memory_space<vmem>>) target_semaphore(%47 : memref<!tpu.dma_semaphore, #tpu.memory_space<semaphore_mem>>)
      %c1 = arith.constant 1 : index
      %48 = memref.load %arg1[%c1] : memref<8xi32, #tpu.memory_space<smem>>
      %c1_i32 = arith.constant 1 : i32
      %c0_i32_27 = arith.constant 0 : i32
      %49 = tpu.memref_slice %arg2[%48, %c0_i32_27] : memref<256x128xf32, #tpu.memory_space<any>> -> memref<1x128xf32, #tpu.memory_space<any>>
      %c1_i32_28 = arith.constant 1 : i32
      %c0_i32_29 = arith.constant 0 : i32
      %50 = tpu.memref_slice %arg11[%c1_i32_28, %c0_i32_29] : memref<8x128xf32, #tpu.memory_space<vmem>> -> memref<1x128xf32, #tpu.memory_space<vmem>>
      %51 = tpu.memref_slice %arg12[%c1_i32] : memref<8x!tpu.dma_semaphore, #tpu.memory_space<semaphore_mem>> -> memref<1x!tpu.dma_semaphore, #tpu.memory_space<semaphore_mem>>
      %52 = tpu.memref_squeeze %51 : memref<1x!tpu.dma_semaphore, #tpu.memory_space<semaphore_mem>> -> memref<!tpu.dma_semaphore, #tpu.memory_space<semaphore_mem>>
      tpu.enqueue_dma source(%49 : memref<1x128xf32, #tpu.memory_space<any>>) target(%50 : memref<1x128xf32, #tpu.memory_space<vmem>>) target_semaphore(%52 : memref<!tpu.dma_semaphore, #tpu.memory_space<semaphore_mem>>)
      %c2 = arith.constant 2 : index
      %53 = memref.load %arg1[%c2] : memref<8xi32, #tpu.memory_space<smem>>
      %c2_i32_30 = arith.constant 2 : i32
      %c0_i32_31 = arith.constant 0 : i32
      %54 = tpu.memref_slice %arg2[%53, %c0_i32_31] : memref<256x128xf32, #tpu.memory_space<any>> -> memref<1x128xf32, #tpu.memory_space<any>>
      %c2_i32_32 = arith.constant 2 : i32
      %c0_i32_33 = arith.constant 0 : i32
      %55 = tpu.memref_slice %arg11[%c2_i32_32, %c0_i32_33] : memref<8x128xf32, #tpu.memory_space<vmem>> -> memref<1x128xf32, #tpu.memory_space<vmem>>
      %56 = tpu.memref_slice %arg12[%c2_i32_30] : memref<8x!tpu.dma_semaphore, #tpu.memory_space<semaphore_mem>> -> memref<1x!tpu.dma_semaphore, #tpu.memory_space<semaphore_mem>>
      %57 = tpu.memref_squeeze %56 : memref<1x!tpu.dma_semaphore, #tpu.memory_space<semaphore_mem>> -> memref<!tpu.dma_semaphore, #tpu.memory_space<semaphore_mem>>
      tpu.enqueue_dma source(%54 : memref<1x128xf32, #tpu.memory_space<any>>) target(%55 : memref<1x128xf32, #tpu.memory_space<vmem>>) target_semaphore(%57 : memref<!tpu.dma_semaphore, #tpu.memory_space<semaphore_mem>>)
      %c3 = arith.constant 3 : index
      %58 = memref.load %arg1[%c3] : memref<8xi32, #tpu.memory_space<smem>>
      %c3_i32 = arith.constant 3 : i32
      %c0_i32_34 = arith.constant 0 : i32
      %59 = tpu.memref_slice %arg2[%58, %c0_i32_34] : memref<256x128xf32, #tpu.memory_space<any>> -> memref<1x128xf32, #tpu.memory_space<any>>
      %c3_i32_35 = arith.constant 3 : i32
      %c0_i32_36 = arith.constant 0 : i32
      %60 = tpu.memref_slice %arg11[%c3_i32_35, %c0_i32_36] : memref<8x128xf32, #tpu.memory_space<vmem>> -> memref<1x128xf32, #tpu.memory_space<vmem>>
      %61 = tpu.memref_slice %arg12[%c3_i32] : memref<8x!tpu.dma_semaphore, #tpu.memory_space<semaphore_mem>> -> memref<1x!tpu.dma_semaphore, #tpu.memory_space<semaphore_mem>>
      %62 = tpu.memref_squeeze %61 : memref<1x!tpu.dma_semaphore, #tpu.memory_space<semaphore_mem>> -> memref<!tpu.dma_semaphore, #tpu.memory_space<semaphore_mem>>
      tpu.enqueue_dma source(%59 : memref<1x128xf32, #tpu.memory_space<any>>) target(%60 : memref<1x128xf32, #tpu.memory_space<vmem>>) target_semaphore(%62 : memref<!tpu.dma_semaphore, #tpu.memory_space<semaphore_mem>>)
      %c4 = arith.constant 4 : index
      %63 = memref.load %arg1[%c4] : memref<8xi32, #tpu.memory_space<smem>>
      %c4_i32 = arith.constant 4 : i32
      %c0_i32_37 = arith.constant 0 : i32
      %64 = tpu.memref_slice %arg2[%63, %c0_i32_37] : memref<256x128xf32, #tpu.memory_space<any>> -> memref<1x128xf32, #tpu.memory_space<any>>
      %c4_i32_38 = arith.constant 4 : i32
      %c0_i32_39 = arith.constant 0 : i32
      %65 = tpu.memref_slice %arg11[%c4_i32_38, %c0_i32_39] : memref<8x128xf32, #tpu.memory_space<vmem>> -> memref<1x128xf32, #tpu.memory_space<vmem>>
      %66 = tpu.memref_slice %arg12[%c4_i32] : memref<8x!tpu.dma_semaphore, #tpu.memory_space<semaphore_mem>> -> memref<1x!tpu.dma_semaphore, #tpu.memory_space<semaphore_mem>>
      %67 = tpu.memref_squeeze %66 : memref<1x!tpu.dma_semaphore, #tpu.memory_space<semaphore_mem>> -> memref<!tpu.dma_semaphore, #tpu.memory_space<semaphore_mem>>
      tpu.enqueue_dma source(%64 : memref<1x128xf32, #tpu.memory_space<any>>) target(%65 : memref<1x128xf32, #tpu.memory_space<vmem>>) target_semaphore(%67 : memref<!tpu.dma_semaphore, #tpu.memory_space<semaphore_mem>>)
      %c5 = arith.constant 5 : index
      %68 = memref.load %arg1[%c5] : memref<8xi32, #tpu.memory_space<smem>>
      %c5_i32 = arith.constant 5 : i32
      %c0_i32_40 = arith.constant 0 : i32
      %69 = tpu.memref_slice %arg2[%68, %c0_i32_40] : memref<256x128xf32, #tpu.memory_space<any>> -> memref<1x128xf32, #tpu.memory_space<any>>
      %c5_i32_41 = arith.constant 5 : i32
      %c0_i32_42 = arith.constant 0 : i32
      %70 = tpu.memref_slice %arg11[%c5_i32_41, %c0_i32_42] : memref<8x128xf32, #tpu.memory_space<vmem>> -> memref<1x128xf32, #tpu.memory_space<vmem>>
      %71 = tpu.memref_slice %arg12[%c5_i32] : memref<8x!tpu.dma_semaphore, #tpu.memory_space<semaphore_mem>> -> memref<1x!tpu.dma_semaphore, #tpu.memory_space<semaphore_mem>>
      %72 = tpu.memref_squeeze %71 : memref<1x!tpu.dma_semaphore, #tpu.memory_space<semaphore_mem>> -> memref<!tpu.dma_semaphore, #tpu.memory_space<semaphore_mem>>
      tpu.enqueue_dma source(%69 : memref<1x128xf32, #tpu.memory_space<any>>) target(%70 : memref<1x128xf32, #tpu.memory_space<vmem>>) target_semaphore(%72 : memref<!tpu.dma_semaphore, #tpu.memory_space<semaphore_mem>>)
      %c6 = arith.constant 6 : index
      %73 = memref.load %arg1[%c6] : memref<8xi32, #tpu.memory_space<smem>>
      %c6_i32 = arith.constant 6 : i32
      %c0_i32_43 = arith.constant 0 : i32
      %74 = tpu.memref_slice %arg2[%73, %c0_i32_43] : memref<256x128xf32, #tpu.memory_space<any>> -> memref<1x128xf32, #tpu.memory_space<any>>
      %c6_i32_44 = arith.constant 6 : i32
      %c0_i32_45 = arith.constant 0 : i32
      %75 = tpu.memref_slice %arg11[%c6_i32_44, %c0_i32_45] : memref<8x128xf32, #tpu.memory_space<vmem>> -> memref<1x128xf32, #tpu.memory_space<vmem>>
      %76 = tpu.memref_slice %arg12[%c6_i32] : memref<8x!tpu.dma_semaphore, #tpu.memory_space<semaphore_mem>> -> memref<1x!tpu.dma_semaphore, #tpu.memory_space<semaphore_mem>>
      %77 = tpu.memref_squeeze %76 : memref<1x!tpu.dma_semaphore, #tpu.memory_space<semaphore_mem>> -> memref<!tpu.dma_semaphore, #tpu.memory_space<semaphore_mem>>
      tpu.enqueue_dma source(%74 : memref<1x128xf32, #tpu.memory_space<any>>) target(%75 : memref<1x128xf32, #tpu.memory_space<vmem>>) target_semaphore(%77 : memref<!tpu.dma_semaphore, #tpu.memory_space<semaphore_mem>>)
      %c7 = arith.constant 7 : index
      %78 = memref.load %arg1[%c7] : memref<8xi32, #tpu.memory_space<smem>>
      %c7_i32 = arith.constant 7 : i32
      %c0_i32_46 = arith.constant 0 : i32
      %79 = tpu.memref_slice %arg2[%78, %c0_i32_46] : memref<256x128xf32, #tpu.memory_space<any>> -> memref<1x128xf32, #tpu.memory_space<any>>
      %c7_i32_47 = arith.constant 7 : i32
      %c0_i32_48 = arith.constant 0 : i32
      %80 = tpu.memref_slice %arg11[%c7_i32_47, %c0_i32_48] : memref<8x128xf32, #tpu.memory_space<vmem>> -> memref<1x128xf32, #tpu.memory_space<vmem>>
      %81 = tpu.memref_slice %arg12[%c7_i32] : memref<8x!tpu.dma_semaphore, #tpu.memory_space<semaphore_mem>> -> memref<1x!tpu.dma_semaphore, #tpu.memory_space<semaphore_mem>>
      %82 = tpu.memref_squeeze %81 : memref<1x!tpu.dma_semaphore, #tpu.memory_space<semaphore_mem>> -> memref<!tpu.dma_semaphore, #tpu.memory_space<semaphore_mem>>
      tpu.enqueue_dma source(%79 : memref<1x128xf32, #tpu.memory_space<any>>) target(%80 : memref<1x128xf32, #tpu.memory_space<vmem>>) target_semaphore(%82 : memref<!tpu.dma_semaphore, #tpu.memory_space<semaphore_mem>>)
      %cst_49 = arith.constant 0.000000e+00 : f32
      %83 = vector.broadcast %cst_49 : f32 to vector<8x512xf32>
      %c0_50 = arith.constant 0 : index
      %c0_51 = arith.constant 0 : index
      %84 = vector.load %arg10[%c0_50, %c0_51] : memref<8x512xf32, #tpu.memory_space<vmem>>, vector<8x512xf32>
      tpu.vector_store %arg10[%c0_50, %c0_51], %83 {strides = array<i32>} : memref<8x512xf32, #tpu.memory_space<vmem>>, vector<8x512xf32>,
      %c0_i32_52 = arith.constant 0 : i32
      %c0_i32_53 = arith.constant 0 : i32
      %85 = tpu.memref_slice %arg2[%43, %c0_i32_53] : memref<256x128xf32, #tpu.memory_space<any>> -> memref<1x128xf32, #tpu.memory_space<any>>
      %c0_i32_54 = arith.constant 0 : i32
      %c0_i32_55 = arith.constant 0 : i32
      %86 = tpu.memref_slice %arg11[%c0_i32_54, %c0_i32_55] : memref<8x128xf32, #tpu.memory_space<vmem>> -> memref<1x128xf32, #tpu.memory_space<vmem>>
      %87 = tpu.memref_slice %arg12[%c0_i32_52] : memref<8x!tpu.dma_semaphore, #tpu.memory_space<semaphore_mem>> -> memref<1x!tpu.dma_semaphore, #tpu.memory_space<semaphore_mem>>
      %88 = tpu.memref_squeeze %87 : memref<1x!tpu.dma_semaphore, #tpu.memory_space<semaphore_mem>> -> memref<!tpu.dma_semaphore, #tpu.memory_space<semaphore_mem>>
      tpu.wait_dma2 semaphore(%88 : memref<!tpu.dma_semaphore, #tpu.memory_space<semaphore_mem>>) src(%85 : memref<1x128xf32, #tpu.memory_space<any>>) dst(%86 : memref<1x128xf32, #tpu.memory_space<vmem>>)
      %c1_i32_56 = arith.constant 1 : i32
      %c0_i32_57 = arith.constant 0 : i32
      %89 = tpu.memref_slice %arg2[%48, %c0_i32_57] : memref<256x128xf32, #tpu.memory_space<any>> -> memref<1x128xf32, #tpu.memory_space<any>>
      %c1_i32_58 = arith.constant 1 : i32
      %c0_i32_59 = arith.constant 0 : i32
      %90 = tpu.memref_slice %arg11[%c1_i32_58, %c0_i32_59] : memref<8x128xf32, #tpu.memory_space<vmem>> -> memref<1x128xf32, #tpu.memory_space<vmem>>
      %91 = tpu.memref_slice %arg12[%c1_i32_56] : memref<8x!tpu.dma_semaphore, #tpu.memory_space<semaphore_mem>> -> memref<1x!tpu.dma_semaphore, #tpu.memory_space<semaphore_mem>>
      %92 = tpu.memref_squeeze %91 : memref<1x!tpu.dma_semaphore, #tpu.memory_space<semaphore_mem>> -> memref<!tpu.dma_semaphore, #tpu.memory_space<semaphore_mem>>
      tpu.wait_dma2 semaphore(%92 : memref<!tpu.dma_semaphore, #tpu.memory_space<semaphore_mem>>) src(%89 : memref<1x128xf32, #tpu.memory_space<any>>) dst(%90 : memref<1x128xf32, #tpu.memory_space<vmem>>)
      %c2_i32_60 = arith.constant 2 : i32
      %c0_i32_61 = arith.constant 0 : i32
      %93 = tpu.memref_slice %arg2[%53, %c0_i32_61] : memref<256x128xf32, #tpu.memory_space<any>> -> memref<1x128xf32, #tpu.memory_space<any>>
      %c2_i32_62 = arith.constant 2 : i32
      %c0_i32_63 = arith.constant 0 : i32
      %94 = tpu.memref_slice %arg11[%c2_i32_62, %c0_i32_63] : memref<8x128xf32, #tpu.memory_space<vmem>> -> memref<1x128xf32, #tpu.memory_space<vmem>>
      %95 = tpu.memref_slice %arg12[%c2_i32_60] : memref<8x!tpu.dma_semaphore, #tpu.memory_space<semaphore_mem>> -> memref<1x!tpu.dma_semaphore, #tpu.memory_space<semaphore_mem>>
      %96 = tpu.memref_squeeze %95 : memref<1x!tpu.dma_semaphore, #tpu.memory_space<semaphore_mem>> -> memref<!tpu.dma_semaphore, #tpu.memory_space<semaphore_mem>>
      tpu.wait_dma2 semaphore(%96 : memref<!tpu.dma_semaphore, #tpu.memory_space<semaphore_mem>>) src(%93 : memref<1x128xf32, #tpu.memory_space<any>>) dst(%94 : memref<1x128xf32, #tpu.memory_space<vmem>>)
      %c3_i32_64 = arith.constant 3 : i32
      %c0_i32_65 = arith.constant 0 : i32
      %97 = tpu.memref_slice %arg2[%58, %c0_i32_65] : memref<256x128xf32, #tpu.memory_space<any>> -> memref<1x128xf32, #tpu.memory_space<any>>
      %c3_i32_66 = arith.constant 3 : i32
      %c0_i32_67 = arith.constant 0 : i32
      %98 = tpu.memref_slice %arg11[%c3_i32_66, %c0_i32_67] : memref<8x128xf32, #tpu.memory_space<vmem>> -> memref<1x128xf32, #tpu.memory_space<vmem>>
      %99 = tpu.memref_slice %arg12[%c3_i32_64] : memref<8x!tpu.dma_semaphore, #tpu.memory_space<semaphore_mem>> -> memref<1x!tpu.dma_semaphore, #tpu.memory_space<semaphore_mem>>
      %100 = tpu.memref_squeeze %99 : memref<1x!tpu.dma_semaphore, #tpu.memory_space<semaphore_mem>> -> memref<!tpu.dma_semaphore, #tpu.memory_space<semaphore_mem>>
      tpu.wait_dma2 semaphore(%100 : memref<!tpu.dma_semaphore, #tpu.memory_space<semaphore_mem>>) src(%97 : memref<1x128xf32, #tpu.memory_space<any>>) dst(%98 : memref<1x128xf32, #tpu.memory_space<vmem>>)
      %c4_i32_68 = arith.constant 4 : i32
      %c0_i32_69 = arith.constant 0 : i32
      %101 = tpu.memref_slice %arg2[%63, %c0_i32_69] : memref<256x128xf32, #tpu.memory_space<any>> -> memref<1x128xf32, #tpu.memory_space<any>>
      %c4_i32_70 = arith.constant 4 : i32
      %c0_i32_71 = arith.constant 0 : i32
      %102 = tpu.memref_slice %arg11[%c4_i32_70, %c0_i32_71] : memref<8x128xf32, #tpu.memory_space<vmem>> -> memref<1x128xf32, #tpu.memory_space<vmem>>
      %103 = tpu.memref_slice %arg12[%c4_i32_68] : memref<8x!tpu.dma_semaphore, #tpu.memory_space<semaphore_mem>> -> memref<1x!tpu.dma_semaphore, #tpu.memory_space<semaphore_mem>>
      %104 = tpu.memref_squeeze %103 : memref<1x!tpu.dma_semaphore, #tpu.memory_space<semaphore_mem>> -> memref<!tpu.dma_semaphore, #tpu.memory_space<semaphore_mem>>
      tpu.wait_dma2 semaphore(%104 : memref<!tpu.dma_semaphore, #tpu.memory_space<semaphore_mem>>) src(%101 : memref<1x128xf32, #tpu.memory_space<any>>) dst(%102 : memref<1x128xf32, #tpu.memory_space<vmem>>)
      %c5_i32_72 = arith.constant 5 : i32
      %c0_i32_73 = arith.constant 0 : i32
      %105 = tpu.memref_slice %arg2[%68, %c0_i32_73] : memref<256x128xf32, #tpu.memory_space<any>> -> memref<1x128xf32, #tpu.memory_space<any>>
      %c5_i32_74 = arith.constant 5 : i32
      %c0_i32_75 = arith.constant 0 : i32
      %106 = tpu.memref_slice %arg11[%c5_i32_74, %c0_i32_75] : memref<8x128xf32, #tpu.memory_space<vmem>> -> memref<1x128xf32, #tpu.memory_space<vmem>>
      %107 = tpu.memref_slice %arg12[%c5_i32_72] : memref<8x!tpu.dma_semaphore, #tpu.memory_space<semaphore_mem>> -> memref<1x!tpu.dma_semaphore, #tpu.memory_space<semaphore_mem>>
      %108 = tpu.memref_squeeze %107 : memref<1x!tpu.dma_semaphore, #tpu.memory_space<semaphore_mem>> -> memref<!tpu.dma_semaphore, #tpu.memory_space<semaphore_mem>>
      tpu.wait_dma2 semaphore(%108 : memref<!tpu.dma_semaphore, #tpu.memory_space<semaphore_mem>>) src(%105 : memref<1x128xf32, #tpu.memory_space<any>>) dst(%106 : memref<1x128xf32, #tpu.memory_space<vmem>>)
      %c6_i32_76 = arith.constant 6 : i32
      %c0_i32_77 = arith.constant 0 : i32
      %109 = tpu.memref_slice %arg2[%73, %c0_i32_77] : memref<256x128xf32, #tpu.memory_space<any>> -> memref<1x128xf32, #tpu.memory_space<any>>
      %c6_i32_78 = arith.constant 6 : i32
      %c0_i32_79 = arith.constant 0 : i32
      %110 = tpu.memref_slice %arg11[%c6_i32_78, %c0_i32_79] : memref<8x128xf32, #tpu.memory_space<vmem>> -> memref<1x128xf32, #tpu.memory_space<vmem>>
      %111 = tpu.memref_slice %arg12[%c6_i32_76] : memref<8x!tpu.dma_semaphore, #tpu.memory_space<semaphore_mem>> -> memref<1x!tpu.dma_semaphore, #tpu.memory_space<semaphore_mem>>
      %112 = tpu.memref_squeeze %111 : memref<1x!tpu.dma_semaphore, #tpu.memory_space<semaphore_mem>> -> memref<!tpu.dma_semaphore, #tpu.memory_space<semaphore_mem>>
      tpu.wait_dma2 semaphore(%112 : memref<!tpu.dma_semaphore, #tpu.memory_space<semaphore_mem>>) src(%109 : memref<1x128xf32, #tpu.memory_space<any>>) dst(%110 : memref<1x128xf32, #tpu.memory_space<vmem>>)
      %c7_i32_80 = arith.constant 7 : i32
      %c0_i32_81 = arith.constant 0 : i32
      %113 = tpu.memref_slice %arg2[%78, %c0_i32_81] : memref<256x128xf32, #tpu.memory_space<any>> -> memref<1x128xf32, #tpu.memory_space<any>>
      %c7_i32_82 = arith.constant 7 : i32
      %c0_i32_83 = arith.constant 0 : i32
      %114 = tpu.memref_slice %arg11[%c7_i32_82, %c0_i32_83] : memref<8x128xf32, #tpu.memory_space<vmem>> -> memref<1x128xf32, #tpu.memory_space<vmem>>
      %115 = tpu.memref_slice %arg12[%c7_i32_80] : memref<8x!tpu.dma_semaphore, #tpu.memory_space<semaphore_mem>> -> memref<1x!tpu.dma_semaphore, #tpu.memory_space<semaphore_mem>>
      %116 = tpu.memref_squeeze %115 : memref<1x!tpu.dma_semaphore, #tpu.memory_space<semaphore_mem>> -> memref<!tpu.dma_semaphore, #tpu.memory_space<semaphore_mem>>
      tpu.wait_dma2 semaphore(%116 : memref<!tpu.dma_semaphore, #tpu.memory_space<semaphore_mem>>) src(%113 : memref<1x128xf32, #tpu.memory_space<any>>) dst(%114 : memref<1x128xf32, #tpu.memory_space<vmem>>)
      %c0_84 = arith.constant 0 : index
      %c0_85 = arith.constant 0 : index
      %117 = vector.load %arg11[%c0_84, %c0_85] : memref<8x128xf32, #tpu.memory_space<vmem>>, vector<8x128xf32>
      %c0_86 = arith.constant 0 : index
      %c0_87 = arith.constant 0 : index
      %118 = vector.load %arg10[%c0_86, %c0_87] : memref<8x512xf32, #tpu.memory_space<vmem>>, vector<8x128xf32>
      tpu.vector_store %arg10[%c0_86, %c0_87], %117 {strides = array<i32>} : memref<8x512xf32, #tpu.memory_space<vmem>>, vector<8x128xf32>,
    } else {
    }
    %c0 = arith.constant 0 : index
    %c0_1 = arith.constant 0 : index
    %3 = vector.load %arg10[%c0, %c0_1] : memref<8x512xf32, #tpu.memory_space<vmem>>, vector<8x512xf32>
    %4 = arith.truncf %3 : vector<8x512xf32> to vector<8x512xbf16>
    %c0_2 = arith.constant 0 : index
    %c0_3 = arith.constant 0 : index
    %c0_4 = arith.constant 0 : index
    %5 = vector.load %arg3[%c0_2, %c0_3, %c0_4] : memref<1x8x512xf32, #tpu.memory_space<vmem>>, vector<1x8x512xf32>
    %6 = vector.shape_cast %5 : vector<1x8x512xf32> to vector<8x512xf32>
    %7 = arith.truncf %6 : vector<8x512xf32> to vector<8x512xbf16>
    %c0_5 = arith.constant 0 : index
    %c0_6 = arith.constant 0 : index
    %c0_7 = arith.constant 0 : index
    %8 = vector.load %arg4[%c0_5, %c0_6, %c0_7] : memref<1x1024x1536xbf16, #tpu.memory_space<vmem>>, vector<1x512x1536xbf16>
    %9 = vector.shape_cast %8 : vector<1x512x1536xbf16> to vector<512x1536xbf16>
    %cst = arith.constant dense<0.000000e+00> : vector<8x1536xf32>
    %10 = tpu.matmul %4, %9, %cst {dimension_numbers = #tpu.dot_dimension_numbers<[1], [0], [0], [1], [0, 0, 1, 1], [], []>} : vector<8x512xbf16>, vector<512x1536xbf16>, vector<8x1536xf32> -> vector<8x1536xf32>
    %c0_8 = arith.constant 0 : index
    %c512 = arith.constant 512 : index
    %c0_9 = arith.constant 0 : index
    %11 = vector.load %arg4[%c0_8, %c512, %c0_9] : memref<1x1024x1536xbf16, #tpu.memory_space<vmem>>, vector<1x512x1536xbf16>
    %12 = vector.shape_cast %11 : vector<1x512x1536xbf16> to vector<512x1536xbf16>
    %cst_10 = arith.constant dense<0.000000e+00> : vector<8x1536xf32>
    %13 = tpu.matmul %7, %12, %cst_10 {dimension_numbers = #tpu.dot_dimension_numbers<[1], [0], [0], [1], [0, 0, 1, 1], [], []>} : vector<8x512xbf16>, vector<512x1536xbf16>, vector<8x1536xf32> -> vector<8x1536xf32>
    %14 = arith.addf %10, %13 : vector<8x1536xf32>
    %c0_11 = arith.constant 0 : index
    %c0_12 = arith.constant 0 : index
    %c0_13 = arith.constant 0 : index
    %15 = vector.load %arg5[%c0_11, %c0_12, %c0_13] : memref<1x1x1536xf32, #tpu.memory_space<vmem>>, vector<1x1x1536xf32>
    %16 = vector.shape_cast %15 : vector<1x1x1536xf32> to vector<1x1536xf32>
    %17 = vector.broadcast %16 : vector<1x1536xf32> to vector<8x1536xf32>
    %18 = arith.addf %14, %17 : vector<8x1536xf32>
    %19 = vector.extract_strided_slice %18 {offsets = [0, 0], sizes = [8, 512], strides = [1, 1]} : vector<8x1536xf32> to vector<8x512xf32>
    %20 = arith.negf %19 : vector<8x512xf32>
    %21 = math.exp %20 : vector<8x512xf32>
    %cst_14 = arith.constant 1.000000e+00 : f32
    %22 = vector.broadcast %cst_14 : f32 to vector<8x512xf32>
    %23 = arith.addf %22, %21 : vector<8x512xf32>
    %24 = arith.divf %22, %23 : vector<8x512xf32>
    %25 = vector.extract_strided_slice %18 {offsets = [0, 512], sizes = [8, 512], strides = [1, 1]} : vector<8x1536xf32> to vector<8x512xf32>
    %26 = math.tanh %25 : vector<8x512xf32>
    %27 = vector.extract_strided_slice %18 {offsets = [0, 1024], sizes = [8, 512], strides = [1, 1]} : vector<8x1536xf32> to vector<8x512xf32>
    %28 = arith.negf %27 : vector<8x512xf32>
    %29 = math.exp %28 : vector<8x512xf32>
    %cst_15 = arith.constant 1.000000e+00 : f32
    %30 = vector.broadcast %cst_15 : f32 to vector<8x512xf32>
    %31 = arith.addf %30, %29 : vector<8x512xf32>
    %32 = arith.divf %30, %31 : vector<8x512xf32>
    %33 = arith.mulf %24, %26 : vector<8x512xf32>
    %34 = math.tanh %33 : vector<8x512xf32>
    %35 = arith.mulf %32, %34 : vector<8x512xf32>
    %c0_16 = arith.constant 0 : index
    %c0_17 = arith.constant 0 : index
    %c0_18 = arith.constant 0 : index
    %36 = vector.load %arg9[%c0_16, %c0_17, %c0_18] : memref<1x8x512xf32, #tpu.memory_space<vmem>>, vector<1x8x512xf32>
    %37 = vector.shape_cast %36 : vector<1x8x512xf32> to vector<8x512xf32>
    %38 = vector.shape_cast %35 : vector<8x512xf32> to vector<1x8x512xf32>
    tpu.vector_store %arg9[%c0_16, %c0_17, %c0_18], %38 {strides = array<i32>} : memref<1x8x512xf32, #tpu.memory_space<vmem>>, vector<1x8x512xf32>,
    %c0_19 = arith.constant 0 : index
    %c0_20 = arith.constant 0 : index
    %39 = vector.load %arg10[%c0_19, %c0_20] : memref<8x512xf32, #tpu.memory_space<vmem>>, vector<8x512xf32>
    tpu.vector_store %arg10[%c0_19, %c0_20], %35 {strides = array<i32>} : memref<8x512xf32, #tpu.memory_space<vmem>>, vector<8x512xf32>,
    %c2_i32 = arith.constant 2 : i32
    %40 = arith.cmpi eq, %arg0, %c2_i32 : i32
    %41 = arith.extui %40 : i1 to i32
    %c0_i32_21 = arith.constant 0 : i32
    %42 = arith.cmpi ne, %41, %c0_i32_21 : i32
    scf.if %42 {
      %43 = arith.truncf %35 : vector<8x512xf32> to vector<8x512xbf16>
      %c0_22 = arith.constant 0 : index
      %c0_23 = arith.constant 0 : index
      %44 = vector.load %arg6[%c0_22, %c0_23] : memref<512x256xbf16, #tpu.memory_space<vmem>>, vector<512x256xbf16>
      %cst_24 = arith.constant dense<0.000000e+00> : vector<8x256xf32>
      %45 = tpu.matmul %43, %44, %cst_24 {dimension_numbers = #tpu.dot_dimension_numbers<[1], [0], [0], [1], [0, 0, 1, 1], [], []>} : vector<8x512xbf16>, vector<512x256xbf16>, vector<8x256xf32> -> vector<8x256xf32>
      %c0_25 = arith.constant 0 : index
      %c0_26 = arith.constant 0 : index
      %46 = vector.load %arg7[%c0_25, %c0_26] : memref<1x256xf32, #tpu.memory_space<vmem>>, vector<1x256xf32>
      %47 = vector.broadcast %46 : vector<1x256xf32> to vector<8x256xf32>
      %48 = arith.addf %45, %47 : vector<8x256xf32>
      %c0_27 = arith.constant 0 : index
      %c0_28 = arith.constant 0 : index
      %49 = vector.load %arg8[%c0_27, %c0_28] : memref<8x256xf32, #tpu.memory_space<vmem>>, vector<8x256xf32>
      tpu.vector_store %arg8[%c0_27, %c0_28], %48 {strides = array<i32>} : memref<8x256xf32, #tpu.memory_space<vmem>>, vector<8x256xf32>,
    } else {
    }
    return
  }
  func.func @transform_1(%arg0: i32, %arg1: memref<8xi32, #tpu.memory_space<smem>>) -> (i32, i32, i32) {
    %c0_i32 = arith.constant 0 : i32
    %c0_i32_0 = arith.constant 0 : i32
    %c0_i32_1 = arith.constant 0 : i32
    return %arg0, %c0_i32, %c0_i32_0 : i32, i32, i32
  }
  func.func @transform_2(%arg0: i32, %arg1: memref<8xi32, #tpu.memory_space<smem>>) -> (i32, i32, i32) {
    %c0_i32 = arith.constant 0 : i32
    %c0_i32_0 = arith.constant 0 : i32
    %c0_i32_1 = arith.constant 0 : i32
    return %arg0, %c0_i32, %c0_i32_0 : i32, i32, i32
  }
  func.func @transform_3(%arg0: i32, %arg1: memref<8xi32, #tpu.memory_space<smem>>) -> (i32, i32, i32) {
    %c0_i32 = arith.constant 0 : i32
    %c0_i32_0 = arith.constant 0 : i32
    %c0_i32_1 = arith.constant 0 : i32
    return %arg0, %c0_i32, %c0_i32_0 : i32, i32, i32
  }
  func.func @transform_4(%arg0: i32, %arg1: memref<8xi32, #tpu.memory_space<smem>>) -> (i32, i32) {
    %c0_i32 = arith.constant 0 : i32
    %c0_i32_0 = arith.constant 0 : i32
    %c0_i32_1 = arith.constant 0 : i32
    return %c0_i32, %c0_i32_0 : i32, i32
  }
  func.func @transform_5(%arg0: i32, %arg1: memref<8xi32, #tpu.memory_space<smem>>) -> (i32, i32) {
    %c0_i32 = arith.constant 0 : i32
    %c0_i32_0 = arith.constant 0 : i32
    %c0_i32_1 = arith.constant 0 : i32
    return %c0_i32, %c0_i32_0 : i32, i32
  }
  func.func @transform_6(%arg0: i32, %arg1: memref<8xi32, #tpu.memory_space<smem>>) -> (i32, i32) {
    %c0_i32 = arith.constant 0 : i32
    %c0_i32_0 = arith.constant 0 : i32
    %c0_i32_1 = arith.constant 0 : i32
    return %c0_i32, %c0_i32_0 : i32, i32
  }
  func.func @transform_7(%arg0: i32, %arg1: memref<8xi32, #tpu.memory_space<smem>>) -> (i32, i32, i32) {
    %c0_i32 = arith.constant 0 : i32
    %c0_i32_0 = arith.constant 0 : i32
    %c0_i32_1 = arith.constant 0 : i32
    return %arg0, %c0_i32, %c0_i32_0 : i32, i32, i32
  }
}

</mosaic_0001>

<bundles_post_ra>
// kernel: multi_lstm_forward.1
= control target key start
LH: loop header
LB: loop body
LE: loop exit
PB: predicated region body
PF: predicated region fallthrough
CT: control target
= control target key end

     0   :  { %s11251_s0 = inlined_call_operand.hbm [shape: s32[8], index: 0, kind: input, shape index: {}]   ;;  %s11252_s1 = inlined_call_operand.hbm [shape: f32[256,128], index: 1, kind: input, shape index: {}]   ;;  %s11253_s2 = inlined_call_operand.hbm [shape: f32[3,8,512], index: 2, kind: input, shape index: {}]   ;;  %s11254_s3 = inlined_call_operand.hbm [shape: bf16[3,1024,1536], index: 3, kind: input, shape index: {}]   ;;  %s11255_s4 = inlined_call_operand.hbm [shape: f32[3,1,1536], index: 4, kind: input, shape index: {}]   ;;  %s11256_s5 = inlined_call_operand.hbm [shape: bf16[512,256], index: 5, kind: input, shape index: {}]   ;;  %s11257_s6 = inlined_call_operand.hbm [shape: f32[1,256], index: 6, kind: input, shape index: {}]   ;;  %s11258_s7 = inlined_call_operand.hbm [shape: f32[8,256], index: 7, kind: output, shape index: {0}]   ;;  %s11259_s8 = inlined_call_operand.hbm [shape: f32[3,8,512], index: 8, kind: output, shape index: {1}]  }
   0x1   :  { %11277 = sst [smem:[#allocation56_spill]] %s11253_s2  ;;  %s9307_s29 = scalar_lea.hbm %s11251_s0, 16 }
   0x2   :  { %11278 = sst [smem:[#allocation57_spill]] %s11254_s3  ;;  %p9308_p0 = scmp.ne.s32.totalorder %s11251_s0, %s9307_s29 }
   0x3   :  { %11279 = sst [smem:[#allocation58_spill]] %s11255_s4  ;;  %p9311_p1 = scmp.lt.u32.totalorder %s9307_s29, %s11251_s0 }
   0x4   :  { %11280 = sst [smem:[#allocation59_spill]] %s11256_s5 }
   0x5   :  { %11281 = sst [smem:[#allocation60_spill]] %s11257_s6  ;;  %p9313_p2 = pnand %p9311_p1, %p9308_p0 }
   0x7   :  { %9316 = shalt.err (!%p9313_p2)  }
   0x8   :  { %s9779_s12 = smov [#allocation6]  }
   0x9   :  { %15 = dma.hbm_to_smem %s11251_s0, 16, %s9779_s12, [#allocation5] }
   0xa   :  { %9725 = dma.done.wait [#allocation5], 16 }
   0xb   :  { %9726 = vsyncadd [#allocation5], 4294967280 }
   0xc   :  { %17 = sfence }
   0xd   :  { %18 = vsyncpa [#allocation8], 0 }
   0xe   :  { %20 = vsyncpa [#allocation8 + $0x1], 0 }
   0xf   :  { %21 = vsyncpa [#allocation11], 0 }
  0x10   :  { %23 = vsyncpa [#allocation11 + $0x1], 0 }
  0x11   :  { %24 = vsyncpa [#allocation14], 0 }
  0x12   :  { %25 = vsyncpa [#allocation9], 0 }
  0x13   :  { %26 = vsyncpa [#allocation18], 0 }
  0x14   :  { %28 = vsyncpa [#allocation18 + $0x1], 0  ;;  %s9857_s15 = smov 0   ;;  %s9859_s16 = smov 0  }
  0x15   :  { %s9861_s17 = smov 0   ;;  %s9863_s18 = smov 0  }
  0x16 LB: > { %11282 = sst [smem:[#allocation51_spill]] %s9765_s15  ;;  %s9878_s0 = sadd.s32 4294967295, %s9777_s18   ;;  %s9777_s18 = sphi %s9863_s18, %s11322_s18   ;;  %s9773_s17 = sphi %s9861_s17, %s11324_s17   ;;  %s9769_s16 = sphi %s9859_s16, %s11326_s16   ;;  %s9765_s15 = sphi %s9857_s15, %s11325_s15  }
  0x17   : > { %11283 = sst [smem:[#allocation52_spill]] %s9773_s17  ;;  %s7014_s19 = sadd.s32 4294967294, %s9777_s18  }
  0x18   : > { %s9882_s20 = sadd.s32 1, %s9777_s18   ;;  %s41_s21 = sadd.s32 1, %s9773_s17 }
  0x19   : > { %11284 = sst [smem:[#allocation53_spill]] %s9882_s20  ;;  %s38_s22 = ssub.s32 %s9777_s18, %s9882_s20 }
  0x1a   : > { %p48_p3 = scmp.ne.s32.totalorder %s9773_s17, %s9769_s16  ;;  %p39_p4 = scmp.eq.s32.totalorder %s38_s22, 0 }
  0x1b   : > { %p49_p5 = scmp.eq.s32.totalorder %s9777_s18, 0  ;;  %p54_p6 = scmp.ne.s32.totalorder %s9769_s16, %s9765_s15 }
  0x1c   : > { %p11261_p7 = scmp.eq.s32.totalorder %s9878_s0, 0  ;;  %p11260_p10 = scmp.eq.s32.totalorder %s9878_s0, 2 }
  0x1d   : > { %s9894_s23 = scalar_select %p39_p4, %s9773_s17, %s41_s21  }
  0x1e   : > { %p9896_p8 = por %p49_p5, %p48_p3  ;;  %p9902_p9 = por %p11261_p7, %p54_p6 }
  0x1f   : > { %11285 = sst [smem:[#allocation54_spill]] %s9894_s23  ;;  %p199_p11 = scmp.eq.s32.totalorder %s7014_s19, 2 }
  0x20   : > { %s11286_s24 = scalar_select %p9896_p8, 1, 0 }
  0x21   : > { %s11287_s25 = scalar_select %p9902_p9, 1, 0 }
  0x22   : > { %p7015_p12 = scmp.ge.s32.totalorder %s9777_s18, 1  ;;  %p206_p13 = scmp.lt.s32.totalorder %s9777_s18, 4 }
  0x23   : > { %p9911_p0 = por %p11260_p10, %p48_p3  ;;  %p9915_p1 = por %p199_p11, %p54_p6 }
  0x24   : > { %p9919_p2 = pnand %p7015_p12, %p206_p13  ;;  %s9780_s29 = smov [#allocation13]  }
  0x25   : > { %s11288_s26 = scalar_select %p9911_p0, 1, 0 }
  0x26   : > { %s11289_s27 = scalar_select %p9915_p1, 1, 0 }
  0x27   : > { %s11291_s28 = scalar_select %p9919_p2, 1, 0 }
  0x28   : > { %11290 = sst [smem:[#allocation55_spill]] %s11289_s27  ;;  %p7933_p5 = pneg %p9919_p2 }
  0x29   : > { %s218_s30 = sshll.u32 %s9780_s29, 4  ;;  %s9934_s10 = sand.u32 1, %s9773_s17   ;;  %s219_s30 = int_to_ptr.vmem [resolvable:$true] %s218_s30 }
  0x2a   : > { %p9928_p3 = pnand %p7933_p5, %p11261_p7  ;;  %s262_s11 = sand.u32 1, %s9777_s18  }
  0x2b   : > { %s11293_s5 = sld [smem:[#allocation59_spill]] }
  0x2c   : > { %s11292_s9 = scalar_select %p9928_p3, 1, 0 }
  0x2d   : > { %p11268_p12 = pneg %p9928_p3 }
  0x31   : > { %s9317_s14 = scalar_lea.hbm %s11293_s5, 8192 }
  0x32   : > { %p9318_p11 = scmp.ne.s32.totalorder %s11293_s5, %s9317_s14  ;;  %p9324_p10 = scmp.lt.u32.totalorder %s9317_s14, %s11293_s5 }
  0x34   : > { %p9320_p13 = pnand %p11268_p12, %p9318_p11 }
  0x36   : > { %p9321_p5 = pneg %p9320_p13 }
  0x38   : > { %p9326_p4 = pnand %p9324_p10, %p9321_p5 }
  0x3a   : > { %9329 = shalt.err (!%p9326_p4)
}
  0x3b   : > { %s9330_s23 = scalar_lea.vmem %s219_s30, 8192  ;;  %p9338_p0 = scmp.lt.s32.totalorder %s219_s30, %s219_s30 }
  0x3c   : > { %p9331_p7 = scmp.ne.s32.totalorder %s219_s30, %s9330_s23  ;;  %p9339_p9 = scmp.lt.s32.totalorder %s9330_s23, %s9330_s23 }
  0x3e   : > { %p9333_p6 = pnand %p9331_p7, %p11268_p12  ;;  %p9340_p2 = por %p9339_p9, %p9338_p0 }
  0x40   : > { %p9334_p1 = pneg %p9333_p6 }
  0x42   : > { %p9341_p8 = pnand %p9340_p2, %p9334_p1 }
  0x44   : > { %9344 = shalt.err (!%p9341_p8)
}
  0x45   : > { %s9781_s12 = smov 128   ;;  %s9782_s13 = smov 8  }
  0x46   : > { %7936 = dma.hbm_to_vmem [thread:$0]  (!%p9928_p3), %s11293_s5, 8192, %s219_s30, [#allocation14], %s9781_s12, %s9781_s12, %s9782_s13  }
  0x47   : > { %p11294_p10 = scmp.ne.s32.totalorder %s11286_s24, 0  ;;  %p11295_p7 = scmp.lt.s32.totalorder %s9777_s18, 3 }
  0x48   : > { %s7907_s23 = smul.u32 6144, %s9934_s10  ;;  %s11297_s3 = sld [smem:[#allocation57_spill]] }
  0x49   : > { %p9963_p4 = pnand %p11295_p7, %p11294_p10  ;;  %s7908_s22 = smul.u32 98304, %s9777_s18 }
  0x4a   : > { %s266_s14 = scalar_lea.vmem [#allocation10], %s7907_s23  ;;  %s9976_s24 = scalar_lea.sflag [#allocation11], %s262_s11 }
  0x4b   : > { %s11296_s21 = scalar_select %p9963_p4, 1, 0 }
  0x4c   : > { %s273_s30 = sshll.u32 %s266_s14, 4  ;;  %p9982_p9 = pneg %p9963_p4  ;;  %s9974_s30 = int_to_ptr.vmem [resolvable:$true] %s273_s30 }
  0x4e   : > { %s9972_s20 = scalar_lea.hbm %s11297_s3, %s7908_s22  ;;  %s9350_s23 = scalar_lea.hbm %s11297_s3, 294912 }
  0x4f   : > { %s9345_s12 = scalar_lea.hbm %s9972_s20, 98304  ;;  %p9351_p2 = scmp.lt.u32.totalorder %s9972_s20, %s11297_s3 }
  0x50   : > { %p9346_p8 = scmp.ne.s32.totalorder %s9972_s20, %s9345_s12  ;;  %p9352_p6 = scmp.lt.u32.totalorder %s9350_s23, %s9345_s12 }
  0x51   : > { %s11298_s13 = scalar_select %p9982_p9, 1, 0 }
  0x52   : > { %p9348_p0 = pnand %p9982_p9, %p9346_p8  ;;  %p9353_p11 = por %p9352_p6, %p9351_p2 }
  0x53   : > { %p9354_p13 = scmp.lt.u32.totalorder %s9345_s12, %s9972_s20 }
  0x54   : > { %p9349_p1 = pneg %p9348_p0 }
  0x55   : > { %p9355_p5 = por %p9354_p13, %p9353_p11 }
  0x57   : > { %p9356_p10 = pnand %p9355_p5, %p9349_p1 }
  0x59   : > { %9359 = shalt.err (!%p9356_p10)
}
  0x5a   : > { %s9360_s11 = scalar_lea.vmem %s9974_s30, 98304  ;;  %s9783_s14 = smov [#allocation10]  }
  0x5b   : > { %p9361_p7 = scmp.ne.s32.totalorder %s9974_s30, %s9360_s11  ;;  %s9365_s17 = sshll.u32 %s9783_s14, 4  ;;  %s9366_s17 = int_to_ptr.vmem [resolvable:$false] %s9365_s17 }
  0x5c   : > { %s9367_s19 = scalar_lea.vmem %s9366_s17, 196608  ;;  %p9368_p12 = scmp.lt.s32.totalorder %s9974_s30, %s9366_s17 }
  0x5d   : > { %p9363_p8 = pnand %p9361_p7, %p9982_p9  ;;  %p9369_p3 = scmp.lt.s32.totalorder %s9367_s19, %s9360_s11 }
  0x5f   : > { %p9364_p0 = pneg %p9363_p8  ;;  %p9370_p2 = por %p9369_p3, %p9368_p12 }
  0x61   : > { %p9371_p6 = pnand %p9370_p2, %p9364_p0 }
  0x63   : > { %9374 = shalt.err (!%p9371_p6)
}
  0x64   : > { %s9784_s12 = smov 768   ;;  %s9785_s23 = smov 48  }
  0x65   : > { %7946 = dma.hbm_to_vmem [thread:$0]  (!%p9963_p4), %s9972_s20, 98304, %s9974_s30, %s9976_s24, %s9784_s12, %s9784_s12, %s9785_s23  }
  0x66   : > { %s9786_s22 = smov [#allocation15]   ;;  %s7019_s14 = sshll.u32 %s9934_s10, 5 }
  0x67   : > { %s232_s29 = sshll.u32 %s9786_s22, 4  ;;  %s11299_s6 = sld [smem:[#allocation60_spill]]  ;;  %s233_s29 = int_to_ptr.vmem [resolvable:$true] %s232_s29 }
  0x68   : > { %p11300_p12 = scmp.ne.s32.totalorder %s11292_s9, 0 }
  0x6a   : > { %p11301_p1 = pneg %p11300_p12 }
  0x6d   : > { %s9375_s11 = scalar_lea.hbm %s11299_s6, 32 }
  0x6e   : > { %p9376_p3 = scmp.ne.s32.totalorder %s11299_s6, %s9375_s11  ;;  %p9382_p5 = scmp.lt.u32.totalorder %s9375_s11, %s11299_s6 }
  0x70   : > { %p9378_p11 = pnand %p9376_p3, %p11301_p1 }
  0x72   : > { %p9379_p13 = pneg %p9378_p11 }
  0x74   : > { %p9384_p10 = pnand %p9382_p5, %p9379_p13 }
  0x76   : > { %9387 = shalt.err (!%p9384_p10)
}
  0x77   : > { %s9388_s20 = scalar_lea.vmem %s233_s29, 32  ;;  %p11302_p8 = pmov %p11301_p1 }
  0x78   : > { %p9389_p7 = scmp.ne.s32.totalorder %s233_s29, %s9388_s20  ;;  %p9396_p6 = scmp.lt.s32.totalorder %s233_s29, %s233_s29 }
  0x79   : > { %p9397_p4 = scmp.lt.s32.totalorder %s9388_s20, %s9388_s20 }
  0x7a   : > { %p9391_p0 = pnand %p9389_p7, %p11302_p8 }
  0x7b   : > { %p9398_p9 = por %p9397_p4, %p9396_p6 }
  0x7c   : > { %p9392_p2 = pneg %p9391_p0 }
  0x7e   : > { %p9399_p1 = pnand %p9398_p9, %p9392_p2 }
  0x80   : > { %9402 = shalt.err (!%p9399_p1)
}
  0x81   : > { %7939 = dma.hbm_to_vmem [thread:$0]  (!%p11300_p12), %s11299_s6, 32, %s233_s29, [#allocation14]  }
  0x82   : > { %s7901_s15 = sshll.u32 %s9777_s18, 9  ;;  %s11303_s2 = sld [smem:[#allocation56_spill]] }
  0x83   : > { %s247_s23 = scalar_lea.vmem [#allocation7], %s7019_s14  ;;  %s7909_s22 = smul.u32 12, %s9934_s10 }
  0x84   : > { %s255_s9 = sshll.u32 %s247_s23, 4  ;;  %s244_s17 = scalar_lea.sflag [#allocation8], %s9934_s10  ;;  %s10033_s9 = int_to_ptr.vmem [resolvable:$true] %s255_s9 }
  0x85   : > { %p11304_p9 = scmp.ne.s32.totalorder %s11298_s13, 0 }
  0x88   : > { %s10031_s12 = scalar_lea.hbm %s11303_s2, %s7901_s15  ;;  %s9408_s20 = scalar_lea.hbm %s11303_s2, 1536 }
  0x89   : > { %s9403_s11 = scalar_lea.hbm %s10031_s12, 512  ;;  %p9409_p11 = scmp.lt.u32.totalorder %s10031_s12, %s11303_s2 }
  0x8a   : > { %p9404_p4 = scmp.ne.s32.totalorder %s10031_s12, %s9403_s11  ;;  %p9410_p13 = scmp.lt.u32.totalorder %s9408_s20, %s9403_s11 }
  0x8b   : > { %p9412_p10 = scmp.lt.u32.totalorder %s9403_s11, %s10031_s12 }
  0x8c   : > { %p9406_p3 = pnand %p9404_p4, %p11304_p9  ;;  %p9411_p5 = por %p9410_p13, %p9409_p11 }
  0x8e   : > { %p9407_p12 = pneg %p9406_p3  ;;  %p9413_p7 = por %p9412_p10, %p9411_p5 }
  0x90   : > { %p9414_p8 = pnand %p9413_p7, %p9407_p12 }
  0x92   : > { %9417 = shalt.err (!%p9414_p8)
}
  0x93   : > { %s9418_s14 = scalar_lea.vmem %s10033_s9, 512  ;;  %s9787_s15 = smov [#allocation7]  }
  0x94   : > { %p9419_p0 = scmp.ne.s32.totalorder %s10033_s9, %s9418_s14  ;;  %s9423_s27 = sshll.u32 %s9787_s15, 4  ;;  %s9424_s27 = int_to_ptr.vmem [resolvable:$false] %s9423_s27 }
  0x95   : > { %s9425_s30 = scalar_lea.vmem %s9424_s27, 1024  ;;  %p9426_p1 = scmp.lt.s32.totalorder %s10033_s9, %s9424_s27 }
  0x96   : > { %p9421_p2 = pnand %p9419_p0, %p11304_p9  ;;  %p9427_p4 = scmp.lt.s32.totalorder %s9425_s30, %s9418_s14 }
  0x98   : > { %p9422_p6 = pneg %p9421_p2  ;;  %p9428_p3 = por %p9427_p4, %p9426_p1 }
  0x9a   : > { %p9429_p11 = pnand %p9428_p3, %p9422_p6 }
  0x9c   : > { %9432 = shalt.err (!%p9429_p11)
}
  0x9d   : > { %p11305_p12 = scmp.ne.s32.totalorder %s11296_s21, 0  ;;  %s7910_s23 = smul.u32 192, %s9777_s18 }
  0x9e   : > { %s287_s11 = scalar_lea.vmem [#allocation12], %s7909_s22  ;;  %s11306_s4 = sld [smem:[#allocation58_spill]] }
  0x9f   : > { %7943 = dma.hbm_to_vmem [thread:$0]  (!%p11305_p12), %s10031_s12, 512, %s10033_s9, %s244_s17  }
  0xa0   : > { %s295_s29 = sshll.u32 %s287_s11, 4  ;;  %s296_s29 = int_to_ptr.vmem [resolvable:$true] %s295_s29 }
  0xa4   : > { %s293_s3 = scalar_lea.hbm %s11306_s4, %s7910_s23  ;;  %s9438_s27 = scalar_lea.hbm %s11306_s4, 576 }
  0xa5   : > { %s9433_s5 = scalar_lea.hbm %s293_s3, 192  ;;  %p9439_p7 = scmp.lt.u32.totalorder %s293_s3, %s11306_s4 }
  0xa6   : > { %p9434_p13 = scmp.ne.s32.totalorder %s293_s3, %s9433_s5  ;;  %p9440_p8 = scmp.lt.u32.totalorder %s9438_s27, %s9433_s5 }
  0xa7   : > { %p9442_p2 = scmp.lt.u32.totalorder %s9433_s5, %s293_s3 }
  0xa8   : > { %p9436_p5 = pnand %p9434_p13, %p11304_p9  ;;  %p9441_p0 = por %p9440_p8, %p9439_p7 }
  0xaa   : > { %p9437_p10 = pneg %p9436_p5  ;;  %p9443_p6 = por %p9442_p2, %p9441_p0 }
  0xac   : > { %p9444_p1 = pnand %p9443_p6, %p9437_p10 }
  0xae   : > { %9447 = shalt.err (!%p9444_p1)
}
  0xaf   : > { %s9448_s10 = scalar_lea.vmem %s296_s29, 192  ;;  %s9788_s9 = smov [#allocation12]  }
  0xb0   : > { %p9449_p4 = scmp.ne.s32.totalorder %s296_s29, %s9448_s10  ;;  %s9453_s22 = sshll.u32 %s9788_s9, 4  ;;  %s9454_s22 = int_to_ptr.vmem [resolvable:$false] %s9453_s22 }
  0xb1   : > { %s9455_s17 = scalar_lea.vmem %s9454_s22, 384  ;;  %p9456_p13 = scmp.lt.s32.totalorder %s296_s29, %s9454_s22 }
  0xb2   : > { %p9451_p3 = pnand %p9449_p4, %p11304_p9  ;;  %p9457_p5 = scmp.lt.s32.totalorder %s9455_s17, %s9448_s10 }
  0xb4   : > { %p9452_p11 = pneg %p9451_p3  ;;  %p9458_p12 = por %p9457_p5, %p9456_p13 }
  0xb6   : > { %p9459_p7 = pnand %p9458_p12, %p9452_p11 }
  0xb8   : > { %9462 = shalt.err (!%p9459_p7)
}
  0xb9   : > { %p11307_p8 = scmp.ne.s32.totalorder %s11296_s21, 0  ;;  %p11308_p10 = scmp.ne.s32.totalorder %s11291_s28, 0 }
  0xba   : > { %s10080_s13 = sand.u32 (!%p11308_p10), 1, %s9769_s16   ;;  %p11309_p9 = scmp.ne.s32.totalorder (!%p11308_p10), %s11287_s25, 0 }
  0xbb   : > { %7949 = dma.hbm_to_vmem [thread:$0]  (!%p11307_p8), %s293_s3, 192, %s296_s29, %s9976_s24  }
  0xbc   : > { %304 = sbr.rel (%p11308_p10) target bundleno = 1726 (0x6be), region = 40  ;;  %s7025_s23 = sshll.u32 (!%p11308_p10), %s10080_s13, 5 }
  0xbd   : > { %s307_s11 = scalar_lea.sflag (!%p11308_p10), [#allocation8], %s10080_s13  ;;  %s10084_s19 = scalar_lea.vmem (!%p11308_p10), [#allocation7], %s7025_s23 }
  0xc3   : > { %9728 = dma.done.wait (%p11309_p9), %s307_s11, 512  }
  0xc4   : > { %9730 = vsyncadd (%p11309_p9), %s307_s11, 4294966784  ;;  %s315_s28 = sand.u32 1, %s9878_s0   ;;  %s7911_s21 = smul.u32 6144, %s10080_s13 }
  0xc5   : > { %s316_s24 = scalar_lea.sflag [#allocation11], %s315_s28 }
  0xc6   : > { %s10092_s29 = scalar_lea.vmem [#allocation10], %s7911_s21 }
  0xc7   : > { %9732 = dma.done.wait (%p11309_p9), %s316_s24, 98496  }
  0xc8   : > { %9734 = vsyncadd (%p11309_p9), %s316_s24, 4294868800  ;;  %s7912_s20 = smul.u32 12, %s10080_s13  ;;  %p11310_p12 = scmp.eq.s32.totalorder %s9878_s0, 0 }
  0xca   : > { %s10099_s3 = scalar_lea.vmem [#allocation12], %s7912_s20 }
  0xcb   : > { %9736 = dma.done.wait (%p11310_p12), [#allocation14], 8224   ;;  %p11311_p0 = pmov %p11310_p12 }
  0xcc   : > { %s10105_s5 = scalar_lea.vmem [#allocation17], %s7025_s23  ;;  %p11312_p2 = scmp.ne.s32.totalorder %s9878_s0, 0 }
  0xcd   : > { %9738 = vsyncadd (%p11311_p0), [#allocation14], 4294959072  ;;  %s379_s14 = sld [smem:[#allocation6]] (!%p11312_p2)  ;;  %s9789_s15 = smov (!%p11312_p2), [#allocation3]   ;;  %v9790_v0 = vmov (!%p11312_p2), 0.0  }
  0xce   : > { %378 = sbr.rel (%p11312_p2) target bundleno = 399 (0x18f), region = 64  ;;  %s389_s27 = sshll.u32 (!%p11312_p2), %s9789_s15, 4  ;;  %505 = vst [vmem:[#allocation2] sm:$0xff] (!%p11312_p2), %v9790_v0  ;;  %506 = vst [vmem:[#allocation2 + $0x8] sm:$0xff] (!%p11312_p2), %v9790_v0  ;;  %s10111_s27 = int_to_ptr.vmem [resolvable:$true] %s389_s27 }
  0xcf   : > { %s10109_s25 = sld [smem:[#allocation6 + $0x1]] (!%p11312_p2)  ;;  %507 = vst [vmem:[#allocation2 + $0x10] sm:$0xff] (!%p11312_p2), %v9790_v0  ;;  %508 = vst [vmem:[#allocation2 + $0x18] sm:$0xff] (!%p11312_p2), %v9790_v0  ;;  %s9791_s30 = smov (!%p11312_p2), [#allocation3 + $0x1]  }
  0xd0   : > { %s405_s12 = sshll.u32 (!%p11312_p2), %s9791_s30, 4  ;;  %s10113_s10 = sld [smem:[#allocation6 + $0x2]] (!%p11312_p2)  ;;  %s10115_s12 = int_to_ptr.vmem [resolvable:$true] %s405_s12 }
  0xd1   : > { %s9792_s9 = smov (!%p11312_p2), [#allocation3 + $0x2]   ;;  %s10117_s17 = sld [smem:[#allocation6 + $0x3]] (!%p11312_p2) }
  0xd2   : > { %s421_s22 = sshll.u32 (!%p11312_p2), %s9792_s9, 4  ;;  %s10128_s2 = scalar_lea.hbm (!%p11312_p2), %s11252_s1, 4096  ;;  %s10119_s22 = int_to_ptr.vmem [resolvable:$true] %s421_s22 }
  0xd3   : > { %s7030_s23 = sshll.u32 (!%p11312_p2), %s379_s14, 4 }
  0xd4   : > { %s381_s21 = scalar_lea.hbm (!%p11312_p2), %s11252_s1, %s7030_s23 }
  0xd5   : > { %s7032_s24 = sshll.u32 %s10109_s25, 4  ;;  %s9463_s20 = scalar_lea.hbm %s381_s21, 16 }
  0xd6   : > { %p9464_p6 = scmp.ne.s32.totalorder %s381_s21, %s9463_s20  ;;  %p9466_p1 = scmp.lt.u32.totalorder %s381_s21, %s11252_s1 }
  0xd7   : > { %p9467_p4 = scmp.lt.u32.totalorder %s10128_s2, %s9463_s20  ;;  %p9469_p11 = scmp.lt.u32.totalorder %s9463_s20, %s381_s21 }
  0xd9   : > { %p9468_p3 = por %p9467_p4, %p9466_p1 }
  0xdb   : > { %p9470_p13 = por %p9469_p11, %p9468_p3 }
  0xdd   : > { %p9471_p5 = pnand %p9470_p13, %p9464_p6 }
  0xdf   : > { %9474 = shalt.err (!%p9471_p5)  }
  0xe0   : > { %s9475_s14 = scalar_lea.vmem %s10111_s27, 16  ;;  %s10137_s25 = scalar_lea.vmem %s10111_s27, 128 }
  0xe1   : > { %p9476_p7 = scmp.ne.s32.totalorder %s10111_s27, %s9475_s14  ;;  %p9480_p8 = scmp.lt.s32.totalorder %s10111_s27, %s10111_s27 }
  0xe2   : > { %p9481_p10 = scmp.lt.s32.totalorder %s10137_s25, %s9475_s14 }
  0xe4   : > { %p9482_p9 = por %p9481_p10, %p9480_p8 }
  0xe6   : > { %p9483_p12 = pnand %p9482_p9, %p9476_p7 }
  0xe8   : > { %9486 = shalt.err (!%p9483_p12)  }
  0xe9   : > { %392 = dma.hbm_to_vmem [thread:$0]  %s381_s21, 16, %s10111_s27, [#allocation4] }
  0xea   : > { %s395_s9 = scalar_lea.hbm %s11252_s1, %s7032_s24  ;;  %s7034_s23 = sshll.u32 %s10113_s10, 4 }
  0xeb   : > { %s9487_s11 = scalar_lea.hbm %s395_s9, 16  ;;  %p9490_p2 = scmp.lt.u32.totalorder %s395_s9, %s11252_s1 }
  0xec   : > { %p9488_p0 = scmp.ne.s32.totalorder %s395_s9, %s9487_s11  ;;  %p9491_p6 = scmp.lt.u32.totalorder %s10128_s2, %s9487_s11 }
  0xed   : > { %p9493_p4 = scmp.lt.u32.totalorder %s9487_s11, %s395_s9 }
  0xee   : > { %p9492_p1 = por %p9491_p6, %p9490_p2 }
  0xf0   : > { %p9494_p3 = por %p9493_p4, %p9492_p1 }
  0xf2   : > { %p9495_p11 = pnand %p9494_p3, %p9488_p0 }
  0xf4   : > { %9498 = shalt.err (!%p9495_p11)  }
  0xf5   : > { %s9499_s21 = scalar_lea.vmem %s10115_s12, 16  ;;  %p9504_p5 = scmp.lt.s32.totalorder %s10115_s12, %s10111_s27 }
  0xf6   : > { %p9500_p13 = scmp.ne.s32.totalorder %s10115_s12, %s9499_s21  ;;  %p9505_p7 = scmp.lt.s32.totalorder %s10137_s25, %s9499_s21 }
  0xf8   : > { %p9506_p8 = por %p9505_p7, %p9504_p5 }
  0xfa   : > { %p9507_p10 = pnand %p9506_p8, %p9500_p13 }
  0xfc   : > { %9510 = shalt.err (!%p9507_p10)  }
  0xfd   : > { %408 = dma.hbm_to_vmem [thread:$0]  %s395_s9, 16, %s10115_s12, [#allocation4 + $0x1] }
  0xfe   : > { %s411_s15 = scalar_lea.hbm %s11252_s1, %s7034_s23  ;;  %s7036_s30 = sshll.u32 %s10117_s17, 4 }
  0xff   : > { %s9511_s14 = scalar_lea.hbm %s411_s15, 16  ;;  %p9514_p12 = scmp.lt.u32.totalorder %s411_s15, %s11252_s1 }
 0x100   : > { %p9512_p9 = scmp.ne.s32.totalorder %s411_s15, %s9511_s14  ;;  %p9515_p0 = scmp.lt.u32.totalorder %s10128_s2, %s9511_s14 }
 0x101   : > { %p9517_p6 = scmp.lt.u32.totalorder %s9511_s14, %s411_s15 }
 0x102   : > { %p9516_p2 = por %p9515_p0, %p9514_p12 }
 0x104   : > { %p9518_p1 = por %p9517_p6, %p9516_p2 }
 0x106   : > { %p9519_p4 = pnand %p9518_p1, %p9512_p9 }
 0x108   : > { %9522 = shalt.err (!%p9519_p4)  }
 0x109   : > { %s9523_s12 = scalar_lea.vmem %s10119_s22, 16  ;;  %p9528_p11 = scmp.lt.s32.totalorder %s10119_s22, %s10111_s27 }
 0x10a   : > { %p9524_p3 = scmp.ne.s32.totalorder %s10119_s22, %s9523_s12  ;;  %p9529_p13 = scmp.lt.s32.totalorder %s10137_s25, %s9523_s12 }
 0x10c   : > { %p9530_p5 = por %p9529_p13, %p9528_p11 }
 0x10e   : > { %p9531_p7 = pnand %p9530_p5, %p9524_p3 }
 0x110   : > { %9534 = shalt.err (!%p9531_p7)  }
 0x111   : > { %424 = dma.hbm_to_vmem [thread:$0]  %s411_s15, 16, %s10119_s22, [#allocation4 + $0x2] }
 0x112   : > { %s427_s23 = scalar_lea.hbm %s11252_s1, %s7036_s30  ;;  %s9793_s11 = smov [#allocation3 + $0x3]  }
 0x113   : > { %s437_s28 = sshll.u32 %s9793_s11, 4  ;;  %s10174_s20 = sld [smem:[#allocation6 + $0x4]]  ;;  %s438_s28 = int_to_ptr.vmem [resolvable:$true] %s437_s28 }
 0x114   : > { %s9535_s21 = scalar_lea.hbm %s427_s23, 16  ;;  %p9538_p10 = scmp.lt.u32.totalorder %s427_s23, %s11252_s1 }
 0x115   : > { %p9536_p8 = scmp.ne.s32.totalorder %s427_s23, %s9535_s21  ;;  %p9539_p9 = scmp.lt.u32.totalorder %s10128_s2, %s9535_s21 }
 0x116   : > { %p9541_p0 = scmp.lt.u32.totalorder %s9535_s21, %s427_s23 }
 0x117   : > { %p9540_p12 = por %p9539_p9, %p9538_p10 }
 0x119   : > { %p9542_p2 = por %p9541_p0, %p9540_p12 }
 0x11b   : > { %p9543_p6 = pnand %p9542_p2, %p9536_p8 }
 0x11d   : > { %9546 = shalt.err (!%p9543_p6)  }
 0x11e   : > { %s9547_s22 = scalar_lea.vmem %s438_s28, 16  ;;  %p9552_p4 = scmp.lt.s32.totalorder %s438_s28, %s10111_s27 }
 0x11f   : > { %p9548_p1 = scmp.ne.s32.totalorder %s438_s28, %s9547_s22  ;;  %p9553_p3 = scmp.lt.s32.totalorder %s10137_s25, %s9547_s22 }
 0x121   : > { %p9554_p11 = por %p9553_p3, %p9552_p4 }
 0x123   : > { %p9555_p13 = pnand %p9554_p11, %p9548_p1 }
 0x125   : > { %9558 = shalt.err (!%p9555_p13)  }
 0x126   : > { %440 = dma.hbm_to_vmem [thread:$0]  %s427_s23, 16, %s438_s28, [#allocation4 + $0x3] }
 0x127   : > { %s9794_s15 = smov [#allocation3 + $0x4]   ;;  %s10182_s14 = sld [smem:[#allocation6 + $0x5]] }
 0x128   : > { %s453_s30 = sshll.u32 %s9794_s15, 4  ;;  %s9795_s4 = smov [#allocation3 + $0x5]   ;;  %s454_s30 = int_to_ptr.vmem [resolvable:$true] %s453_s30 }
 0x129   : > { %s469_s6 = sshll.u32 %s9795_s4, 4  ;;  %s10184_s12 = sld [smem:[#allocation6 + $0x6]]  ;;  %s10187_s6 = int_to_ptr.vmem [resolvable:$true] %s469_s6 }
 0x12a   : > { %s7038_s17 = sshll.u32 %s10174_s20, 4 }
 0x12b   : > { %s443_s21 = scalar_lea.hbm %s11252_s1, %s7038_s17 }
 0x12c   : > { %s9559_s10 = scalar_lea.hbm %s443_s21, 16  ;;  %p9562_p7 = scmp.lt.u32.totalorder %s443_s21, %s11252_s1 }
 0x12d   : > { %p9560_p5 = scmp.ne.s32.totalorder %s443_s21, %s9559_s10  ;;  %p9563_p8 = scmp.lt.u32.totalorder %s10128_s2, %s9559_s10 }
 0x12e   : > { %p9565_p9 = scmp.lt.u32.totalorder %s9559_s10, %s443_s21 }
 0x12f   : > { %p9564_p10 = por %p9563_p8, %p9562_p7 }
 0x131   : > { %p9566_p12 = por %p9565_p9, %p9564_p10 }
 0x133   : > { %p9567_p0 = pnand %p9566_p12, %p9560_p5 }
 0x135   : > { %9570 = shalt.err (!%p9567_p0)  }
 0x136   : > { %s9571_s24 = scalar_lea.vmem %s454_s30, 16  ;;  %p9576_p6 = scmp.lt.s32.totalorder %s454_s30, %s10111_s27 }
 0x137   : > { %p9572_p2 = scmp.ne.s32.totalorder %s454_s30, %s9571_s24  ;;  %p9577_p1 = scmp.lt.s32.totalorder %s10137_s25, %s9571_s24 }
 0x139   : > { %p9578_p4 = por %p9577_p1, %p9576_p6 }
 0x13b   : > { %p9579_p3 = pnand %p9578_p4, %p9572_p2 }
 0x13d   : > { %9582 = shalt.err (!%p9579_p3)  }
 0x13e   : > { %456 = dma.hbm_to_vmem [thread:$0]  %s443_s21, 16, %s454_s30, [#allocation4 + $0x4] }
 0x13f   : > { %s7040_s20 = sshll.u32 %s10182_s14, 4  ;;  %s9796_s22 = smov [#allocation3 + $0x6]  }
 0x140   : > { %s485_s15 = sshll.u32 %s9796_s22, 4  ;;  %s459_s9 = scalar_lea.hbm %s11252_s1, %s7040_s20  ;;  %s10202_s15 = int_to_ptr.vmem [resolvable:$true] %s485_s15 }
 0x141   : > { %s9583_s11 = scalar_lea.hbm %s459_s9, 16  ;;  %p9586_p13 = scmp.lt.u32.totalorder %s459_s9, %s11252_s1 }
 0x142   : > { %p9584_p11 = scmp.ne.s32.totalorder %s459_s9, %s9583_s11  ;;  %p9587_p5 = scmp.lt.u32.totalorder %s10128_s2, %s9583_s11 }
 0x143   : > { %p9589_p8 = scmp.lt.u32.totalorder %s9583_s11, %s459_s9 }
 0x144   : > { %p9588_p7 = por %p9587_p5, %p9586_p13 }
 0x146   : > { %p9590_p10 = por %p9589_p8, %p9588_p7 }
 0x148   : > { %p9591_p9 = pnand %p9590_p10, %p9584_p11 }
 0x14a   : > { %9594 = shalt.err (!%p9591_p9)  }
 0x14b   : > { %s9595_s30 = scalar_lea.vmem %s10187_s6, 16  ;;  %p9600_p0 = scmp.lt.s32.totalorder %s10187_s6, %s10111_s27 }
 0x14c   : > { %p9596_p12 = scmp.ne.s32.totalorder %s10187_s6, %s9595_s30  ;;  %p9601_p2 = scmp.lt.s32.totalorder %s10137_s25, %s9595_s30 }
 0x14e   : > { %p9602_p6 = por %p9601_p2, %p9600_p0 }
 0x150   : > { %p9603_p1 = pnand %p9602_p6, %p9596_p12 }
 0x152   : > { %9606 = shalt.err (!%p9603_p1)  }
 0x153   : > { %472 = dma.hbm_to_vmem [thread:$0]  %s459_s9, 16, %s10187_s6, [#allocation4 + $0x5] }
 0x154   : > { %s7042_s14 = sshll.u32 %s10184_s12, 4  ;;  %s7043_s21 = sld [smem:[#allocation6 + $0x7]] }
 0x155   : > { %s475_s20 = scalar_lea.hbm %s11252_s1, %s7042_s14 }
 0x156   : > { %s9607_s22 = scalar_lea.hbm %s475_s20, 16  ;;  %p9610_p3 = scmp.lt.u32.totalorder %s475_s20, %s11252_s1 }
 0x157   : > { %p9608_p4 = scmp.ne.s32.totalorder %s475_s20, %s9607_s22  ;;  %p9611_p11 = scmp.lt.u32.totalorder %s10128_s2, %s9607_s22 }
 0x158   : > { %p9613_p5 = scmp.lt.u32.totalorder %s9607_s22, %s475_s20 }
 0x159   : > { %p9612_p13 = por %p9611_p11, %p9610_p3 }
 0x15b   : > { %p9614_p7 = por %p9613_p5, %p9612_p13 }
 0x15d   : > { %p9615_p8 = pnand %p9614_p7, %p9608_p4 }
 0x15f   : > { %9618 = shalt.err (!%p9615_p8)  }
 0x160   : > { %s9619_s6 = scalar_lea.vmem %s10202_s15, 16  ;;  %p9624_p9 = scmp.lt.s32.totalorder %s10202_s15, %s10111_s27 }
 0x161   : > { %p9620_p10 = scmp.ne.s32.totalorder %s10202_s15, %s9619_s6  ;;  %p9625_p12 = scmp.lt.s32.totalorder %s10137_s25, %s9619_s6 }
 0x163   : > { %p9626_p0 = por %p9625_p12, %p9624_p9 }
 0x165   : > { %p9627_p2 = pnand %p9626_p0, %p9620_p10 }
 0x167   : > { %9630 = shalt.err (!%p9627_p2)  }
 0x168   : > { %488 = dma.hbm_to_vmem [thread:$0]  %s475_s20, 16, %s10202_s15, [#allocation4 + $0x6] }
 0x169   : > { %s9797_s12 = smov [#allocation3 + $0x7]   ;;  %s7044_s11 = sshll.u32 %s7043_s21, 4 }
 0x16a   : > { %s501_s9 = sshll.u32 %s9797_s12, 4  ;;  %s491_s30 = scalar_lea.hbm %s11252_s1, %s7044_s11  ;;  %s502_s9 = int_to_ptr.vmem [resolvable:$true] %s501_s9 }
 0x16b   : > { %s9631_s14 = scalar_lea.hbm %s491_s30, 16  ;;  %p9634_p1 = scmp.lt.u32.totalorder %s491_s30, %s11252_s1 }
 0x16c   : > { %p9632_p6 = scmp.ne.s32.totalorder %s491_s30, %s9631_s14  ;;  %p9635_p4 = scmp.lt.u32.totalorder %s10128_s2, %s9631_s14 }
 0x16d   : > { %p9637_p11 = scmp.lt.u32.totalorder %s9631_s14, %s491_s30 }
 0x16e   : > { %p9636_p3 = por %p9635_p4, %p9634_p1 }
 0x170   : > { %p9638_p13 = por %p9637_p11, %p9636_p3 }
 0x172   : > { %p9639_p5 = pnand %p9638_p13, %p9632_p6 }
 0x174   : > { %9642 = shalt.err (!%p9639_p5)  }
 0x175   : > { %s9643_s15 = scalar_lea.vmem %s502_s9, 16  ;;  %p9648_p8 = scmp.lt.s32.totalorder %s502_s9, %s10111_s27 }
 0x176   : > { %p9644_p7 = scmp.ne.s32.totalorder %s502_s9, %s9643_s15  ;;  %p9649_p10 = scmp.lt.s32.totalorder %s10137_s25, %s9643_s15 }
 0x178   : > { %p9650_p9 = por %p9649_p10, %p9648_p8 }
 0x17a   : > { %p9651_p12 = pnand %p9650_p9, %p9644_p7 }
 0x17c   : > { %9654 = shalt.err (!%p9651_p12)  }
 0x17d   : > { %504 = dma.hbm_to_vmem [thread:$0]  %s491_s30, 16, %s502_s9, [#allocation4 + $0x7] }
 0x17e   : > { %9739 = dma.done.wait [#allocation4], 16 }
 0x17f   : > { %9740 = vsyncadd [#allocation4], 4294967280 }
 0x180   : > { %9741 = dma.done.wait [#allocation4 + $0x1], 16 }
 0x181   : > { %9742 = vsyncadd [#allocation4 + $0x1], 4294967280 }
 0x182   : > { %9743 = dma.done.wait [#allocation4 + $0x2], 16 }
 0x183   : > { %9744 = vsyncadd [#allocation4 + $0x2], 4294967280 }
 0x184   : > { %9745 = dma.done.wait [#allocation4 + $0x3], 16 }
 0x185   : > { %9746 = vsyncadd [#allocation4 + $0x3], 4294967280 }
 0x186   : > { %9747 = dma.done.wait [#allocation4 + $0x4], 16 }
 0x187   : > { %9748 = vsyncadd [#allocation4 + $0x4], 4294967280 }
 0x188   : > { %9749 = dma.done.wait [#allocation4 + $0x5], 16 }
 0x189   : > { %9750 = vsyncadd [#allocation4 + $0x5], 4294967280 }
 0x18a   : > { %9751 = dma.done.wait [#allocation4 + $0x6], 16 }
 0x18b   : > { %9752 = vsyncadd [#allocation4 + $0x6], 4294967280 }
 0x18c   : > { %9753 = dma.done.wait [#allocation4 + $0x7], 16 }
 0x18d   : > { %9754 = vsyncadd [#allocation4 + $0x7], 4294967280  ;;  %v526_v1 = vld [vmem:[#allocation3] sm:$0xff] }
 0x18e   : > { %527 = vst [vmem:[#allocation2] sm:$0xff] %v526_v1 }
 0x18f PF: > { %v8011_v2 = vld [vmem:[%s10092_s29 + $0xc04] ss:$48 sps:$4 sm:$0xff]   ;;  %v8015_v4 = vld [vmem:[%s10092_s29 + $0xc00] ss:$48 sps:$4 sm:$0xff]   ;;  %v537_v48 = vld [vmem:[%s10084_s19 + $0x8] sm:$0xff]  ;;  %p7821_p0 = scmp.ne.s32.totalorder %s9878_s0, 2 }
 0x190   : > { %v8013_v3 = vld [vmem:[%s10092_s29 + $0x1204] ss:$48 sps:$4 sm:$0xff]   ;;  %3232 = vmatprep.subr.bf16.mxu0 %v8011_v2  ;;  %v8016_v5 = vld [vmem:[%s10092_s29 + $0x1200] ss:$48 sps:$4 sm:$0xff]   ;;  %v10286_v51 = vpack.c.bf16 %v537_v48, %v537_v48  ;;  %v539_v52 = vld [vmem:[%s10084_s19 + $0x18] sm:$0xff] }
 0x191   : > { %3273 = vmatprep.subr.bf16.mxu1 %v8013_v3  ;;  %v8017_v6 = vld [vmem:[%s10092_s29 + $0xc64] ss:$48 sps:$4 sm:$0xff]   ;;  %3233 = vmatpush1.bf16.msra.mxu0 %v8015_v4  ;;  %v8021_v8 = vld [vmem:[%s10092_s29 + $0xc60] ss:$48 sps:$4 sm:$0xff]   ;;  %v10290_v54 = vpack.c.bf16 %v539_v52, %v539_v52  ;;  %v8161_v48 = vld [vmem:[%s10092_s29 + $0xf68] ss:$48 sps:$4 sm:$0xff]  }
 0x192   : > { %3274 = vmatpush1.bf16.msra.mxu1 %v8016_v5  ;;  %v8019_v7 = vld [vmem:[%s10092_s29 + $0x1264] ss:$48 sps:$4 sm:$0xff]   ;;  %3234 = vmatprep.subr.bf16.mxu0 %v8017_v6  ;;  %v8022_v9 = vld [vmem:[%s10092_s29 + $0x1260] ss:$48 sps:$4 sm:$0xff]   ;;  %v8172_v52 = vld [vmem:[%s10092_s29 + $0x15cc] ss:$48 sps:$4 sm:$0xff]  }
 0x193   : > { %3275 = vmatprep.subr.bf16.mxu1 %v8019_v7  ;;  %v8023_v10 = vld [vmem:[%s10092_s29 + $0xcc4] ss:$48 sps:$4 sm:$0xff]   ;;  %v8027_v12 = vld [vmem:[%s10092_s29 + $0xcc0] ss:$48 sps:$4 sm:$0xff]   ;;  %3264 = vmatprep.mubr.bf16.mxu0 %v10286_v51 }
 0x194   : > { %v8025_v11 = vld [vmem:[%s10092_s29 + $0x12c4] ss:$48 sps:$4 sm:$0xff]   ;;  %v8028_v13 = vld [vmem:[%s10092_s29 + $0x12c0] ss:$48 sps:$4 sm:$0xff]   ;;  %3305 = vmatprep.mubr.bf16.mxu1 %v10290_v54 }
 0x195   : > { %3235 = vmatpush1.bf16.msra.mxu0 %v8021_v8  ;;  %v8029_v14 = vld [vmem:[%s10092_s29 + $0xd24] ss:$48 sps:$4 sm:$0xff]   ;;  %v8033_v16 = vld [vmem:[%s10092_s29 + $0xd20] ss:$48 sps:$4 sm:$0xff]   ;;  %v8109_v8 = vld [vmem:[%s10092_s29 + $0xc0c] ss:$48 sps:$4 sm:$0xff]  }
 0x196   : > { %3276 = vmatpush1.bf16.msra.mxu1 %v8022_v9  ;;  %3236 = vmatprep.subr.bf16.mxu0 %v8023_v10  ;;  %v8031_v15 = vld [vmem:[%s10092_s29 + $0x1324] ss:$48 sps:$4 sm:$0xff]   ;;  %v8034_v17 = vld [vmem:[%s10092_s29 + $0x1320] ss:$48 sps:$4 sm:$0xff]   ;;  %v8112_v9 = vld [vmem:[%s10092_s29 + $0x120c] ss:$48 sps:$4 sm:$0xff]  }
 0x197   : > { %3277 = vmatprep.subr.bf16.mxu1 %v8025_v11  ;;  %v8035_v18 = vld [vmem:[%s10092_s29 + $0xd84] ss:$48 sps:$4 sm:$0xff]   ;;  %v8039_v20 = vld [vmem:[%s10092_s29 + $0xd80] ss:$48 sps:$4 sm:$0xff]  }
 0x198   : > { %v8037_v19 = vld [vmem:[%s10092_s29 + $0x1384] ss:$48 sps:$4 sm:$0xff]   ;;  %v8040_v21 = vld [vmem:[%s10092_s29 + $0x1380] ss:$48 sps:$4 sm:$0xff]  }
 0x199   : > { %3237 = vmatpush1.bf16.msra.mxu0 %v8027_v12  ;;  %v8041_v22 = vld [vmem:[%s10092_s29 + $0xde4] ss:$48 sps:$4 sm:$0xff]   ;;  %v8045_v24 = vld [vmem:[%s10092_s29 + $0xde0] ss:$48 sps:$4 sm:$0xff]   ;;  %v8107_v12 = vld [vmem:[%s10092_s29 + $0xc08] ss:$48 sps:$4 sm:$0xff]  }
 0x19a   : > { %3278 = vmatpush1.bf16.msra.mxu1 %v8028_v13  ;;  %3238 = vmatprep.subr.bf16.mxu0 %v8029_v14  ;;  %v8043_v23 = vld [vmem:[%s10092_s29 + $0x13e4] ss:$48 sps:$4 sm:$0xff]   ;;  %v8046_v25 = vld [vmem:[%s10092_s29 + $0x13e0] ss:$48 sps:$4 sm:$0xff]   ;;  %v8110_v13 = vld [vmem:[%s10092_s29 + $0x1208] ss:$48 sps:$4 sm:$0xff]  }
 0x19b   : > { %3279 = vmatprep.subr.bf16.mxu1 %v8031_v15  ;;  %v8047_v26 = vld [vmem:[%s10092_s29 + $0xe44] ss:$48 sps:$4 sm:$0xff]   ;;  %v8051_v28 = vld [vmem:[%s10092_s29 + $0xe40] ss:$48 sps:$4 sm:$0xff]   ;;  %v8115_v14 = vld [vmem:[%s10092_s29 + $0xc6c] ss:$48 sps:$4 sm:$0xff]  }
 0x19c   : > { %v8049_v27 = vld [vmem:[%s10092_s29 + $0x1444] ss:$48 sps:$4 sm:$0xff]   ;;  %v8052_v29 = vld [vmem:[%s10092_s29 + $0x1440] ss:$48 sps:$4 sm:$0xff]   ;;  %v8118_v15 = vld [vmem:[%s10092_s29 + $0x126c] ss:$48 sps:$4 sm:$0xff]  }
 0x19d   : > { %3239 = vmatpush1.bf16.msra.mxu0 %v8033_v16  ;;  %v8053_v30 = vld [vmem:[%s10092_s29 + $0xea4] ss:$48 sps:$4 sm:$0xff]   ;;  %v8057_v32 = vld [vmem:[%s10092_s29 + $0xea0] ss:$48 sps:$4 sm:$0xff]   ;;  %v8113_v16 = vld [vmem:[%s10092_s29 + $0xc68] ss:$48 sps:$4 sm:$0xff]  }
 0x19e   : > { %3280 = vmatpush1.bf16.msra.mxu1 %v8034_v17  ;;  %3240 = vmatprep.subr.bf16.mxu0 %v8035_v18  ;;  %v8055_v31 = vld [vmem:[%s10092_s29 + $0x14a4] ss:$48 sps:$4 sm:$0xff]   ;;  %v8058_v33 = vld [vmem:[%s10092_s29 + $0x14a0] ss:$48 sps:$4 sm:$0xff]   ;;  %v8116_v17 = vld [vmem:[%s10092_s29 + $0x1268] ss:$48 sps:$4 sm:$0xff]  }
 0x19f   : > { %3281 = vmatprep.subr.bf16.mxu1 %v8037_v19  ;;  %v8059_v34 = vld [vmem:[%s10092_s29 + $0xf04] ss:$48 sps:$4 sm:$0xff]   ;;  %v8063_v36 = vld [vmem:[%s10092_s29 + $0xf00] ss:$48 sps:$4 sm:$0xff]   ;;  %v8121_v18 = vld [vmem:[%s10092_s29 + $0xccc] ss:$48 sps:$4 sm:$0xff]  }
 0x1a0   : > { %v8061_v35 = vld [vmem:[%s10092_s29 + $0x1504] ss:$48 sps:$4 sm:$0xff]   ;;  %v8064_v37 = vld [vmem:[%s10092_s29 + $0x1500] ss:$48 sps:$4 sm:$0xff]   ;;  %v8124_v19 = vld [vmem:[%s10092_s29 + $0x12cc] ss:$48 sps:$4 sm:$0xff]  }
 0x1a1   : > { %3241 = vmatpush1.bf16.msra.mxu0 %v8039_v20  ;;  %v8065_v38 = vld [vmem:[%s10092_s29 + $0xf64] ss:$48 sps:$4 sm:$0xff]   ;;  %v8069_v40 = vld [vmem:[%s10092_s29 + $0xf60] ss:$48 sps:$4 sm:$0xff]   ;;  %v8119_v20 = vld [vmem:[%s10092_s29 + $0xcc8] ss:$48 sps:$4 sm:$0xff]  }
 0x1a2   : > { %3282 = vmatpush1.bf16.msra.mxu1 %v8040_v21  ;;  %3242 = vmatprep.subr.bf16.mxu0 %v8041_v22  ;;  %v8067_v39 = vld [vmem:[%s10092_s29 + $0x1564] ss:$48 sps:$4 sm:$0xff]   ;;  %v8070_v41 = vld [vmem:[%s10092_s29 + $0x1560] ss:$48 sps:$4 sm:$0xff]   ;;  %v8122_v21 = vld [vmem:[%s10092_s29 + $0x12c8] ss:$48 sps:$4 sm:$0xff]  }
 0x1a3   : > { %3283 = vmatprep.subr.bf16.mxu1 %v8043_v23  ;;  %v8071_v42 = vld [vmem:[%s10092_s29 + $0xfc4] ss:$48 sps:$4 sm:$0xff]   ;;  %v8075_v44 = vld [vmem:[%s10092_s29 + $0xfc0] ss:$48 sps:$4 sm:$0xff]   ;;  %v8127_v22 = vld [vmem:[%s10092_s29 + $0xd2c] ss:$48 sps:$4 sm:$0xff]  }
 0x1a4   : > { %v8073_v43 = vld [vmem:[%s10092_s29 + $0x15c4] ss:$48 sps:$4 sm:$0xff]   ;;  %v8076_v45 = vld [vmem:[%s10092_s29 + $0x15c0] ss:$48 sps:$4 sm:$0xff]   ;;  %v8130_v23 = vld [vmem:[%s10092_s29 + $0x132c] ss:$48 sps:$4 sm:$0xff]  }
 0x1a5   : > { %3243 = vmatpush1.bf16.msra.mxu0 %v8045_v24  ;;  %v8077_v46 = vld [vmem:[%s10092_s29 + $0x1024] ss:$48 sps:$4 sm:$0xff]   ;;  %v8081_v49 = vld [vmem:[%s10092_s29 + $0x1020] ss:$48 sps:$4 sm:$0xff]   ;;  %v8125_v24 = vld [vmem:[%s10092_s29 + $0xd28] ss:$48 sps:$4 sm:$0xff]  }
 0x1a6   : > { %3284 = vmatpush1.bf16.msra.mxu1 %v8046_v25  ;;  %3244 = vmatprep.subr.bf16.mxu0 %v8047_v26  ;;  %v8079_v47 = vld [vmem:[%s10092_s29 + $0x1624] ss:$48 sps:$4 sm:$0xff]   ;;  %v8082_v50 = vld [vmem:[%s10092_s29 + $0x1620] ss:$48 sps:$4 sm:$0xff]   ;;  %v8128_v25 = vld [vmem:[%s10092_s29 + $0x1328] ss:$48 sps:$4 sm:$0xff]  }
 0x1a7   : > { %3285 = vmatprep.subr.bf16.mxu1 %v8049_v27  ;;  %v8083_v53 = vld [vmem:[%s10092_s29 + $0x1084] ss:$48 sps:$4 sm:$0xff]   ;;  %v8087_v56 = vld [vmem:[%s10092_s29 + $0x1080] ss:$48 sps:$4 sm:$0xff]   ;;  %v8133_v26 = vld [vmem:[%s10092_s29 + $0xd8c] ss:$48 sps:$4 sm:$0xff]  }
 0x1a8   : > { %v8085_v55 = vld [vmem:[%s10092_s29 + $0x1684] ss:$48 sps:$4 sm:$0xff]   ;;  %v8088_v57 = vld [vmem:[%s10092_s29 + $0x1680] ss:$48 sps:$4 sm:$0xff]   ;;  %v8136_v27 = vld [vmem:[%s10092_s29 + $0x138c] ss:$48 sps:$4 sm:$0xff]  }
 0x1a9   : > { %3245 = vmatpush1.bf16.msra.mxu0 %v8051_v28  ;;  %v8089_v58 = vld [vmem:[%s10092_s29 + $0x10e4] ss:$48 sps:$4 sm:$0xff]   ;;  %v8093_v60 = vld [vmem:[%s10092_s29 + $0x10e0] ss:$48 sps:$4 sm:$0xff]   ;;  %v8131_v28 = vld [vmem:[%s10092_s29 + $0xd88] ss:$48 sps:$4 sm:$0xff]  }
 0x1aa   : > { %3286 = vmatpush1.bf16.msra.mxu1 %v8052_v29  ;;  %3246 = vmatprep.subr.bf16.mxu0 %v8053_v30  ;;  %v8091_v59 = vld [vmem:[%s10092_s29 + $0x16e4] ss:$48 sps:$4 sm:$0xff]   ;;  %v8094_v61 = vld [vmem:[%s10092_s29 + $0x16e0] ss:$48 sps:$4 sm:$0xff]   ;;  %v8134_v29 = vld [vmem:[%s10092_s29 + $0x1388] ss:$48 sps:$4 sm:$0xff]  }
 0x1ab   : > { %3287 = vmatprep.subr.bf16.mxu1 %v8055_v31  ;;  %v8095_v62 = vld [vmem:[%s10092_s29 + $0x1144] ss:$48 sps:$4 sm:$0xff]   ;;  %v8099_v0 = vld [vmem:[%s10092_s29 + $0x1140] ss:$48 sps:$4 sm:$0xff]   ;;  %v8139_v30 = vld [vmem:[%s10092_s29 + $0xdec] ss:$48 sps:$4 sm:$0xff]  }
 0x1ac   : > { %v8097_v63 = vld [vmem:[%s10092_s29 + $0x1744] ss:$48 sps:$4 sm:$0xff]   ;;  %v8100_v1 = vld [vmem:[%s10092_s29 + $0x1740] ss:$48 sps:$4 sm:$0xff]   ;;  %v8142_v31 = vld [vmem:[%s10092_s29 + $0x13ec] ss:$48 sps:$4 sm:$0xff]  }
 0x1ad   : > { %3247 = vmatpush1.bf16.msra.mxu0 %v8057_v32  ;;  %v8101_v2 = vld [vmem:[%s10092_s29 + $0x11a4] ss:$48 sps:$4 sm:$0xff]   ;;  %v8105_v4 = vld [vmem:[%s10092_s29 + $0x11a0] ss:$48 sps:$4 sm:$0xff]   ;;  %v8137_v32 = vld [vmem:[%s10092_s29 + $0xde8] ss:$48 sps:$4 sm:$0xff]  }
 0x1ae   : > { %3288 = vmatpush1.bf16.msra.mxu1 %v8058_v33  ;;  %3248 = vmatprep.subr.bf16.mxu0 %v8059_v34  ;;  %v8103_v3 = vld [vmem:[%s10092_s29 + $0x17a4] ss:$48 sps:$4 sm:$0xff]   ;;  %v8106_v5 = vld [vmem:[%s10092_s29 + $0x17a0] ss:$48 sps:$4 sm:$0xff]   ;;  %v8140_v33 = vld [vmem:[%s10092_s29 + $0x13e8] ss:$48 sps:$4 sm:$0xff]  }
 0x1af   : > { %3289 = vmatprep.subr.bf16.mxu1 %v8061_v35  ;;  %v536_v6 = vld [vmem:[%s10084_s19] sm:$0xff]  ;;  %v538_v7 = vld [vmem:[%s10084_s19 + $0x10] sm:$0xff]  ;;  %v8145_v34 = vld [vmem:[%s10092_s29 + $0xe4c] ss:$48 sps:$4 sm:$0xff]  }
 0x1b0   : > { %v10313_v10 = vpack.c.bf16 %v536_v6, %v536_v6  ;;  %v10315_v11 = vpack.c.bf16 %v538_v7, %v538_v7  ;;  %v8148_v35 = vld [vmem:[%s10092_s29 + $0x144c] ss:$48 sps:$4 sm:$0xff]   ;;  %v8191_v6 = vld [vmem:[%s10092_s29 + $0x1148] ss:$48 sps:$4 sm:$0xff]  }
 0x1b1   : > { %3249 = vmatpush1.bf16.msra.mxu0 %v8063_v36  ;;  %v8143_v36 = vld [vmem:[%s10092_s29 + $0xe48] ss:$48 sps:$4 sm:$0xff]  }
 0x1b2   : > { %3290 = vmatpush1.bf16.msra.mxu1 %v8064_v37  ;;  %3250 = vmatprep.subr.bf16.mxu0 %v8065_v38  ;;  %v8146_v37 = vld [vmem:[%s10092_s29 + $0x1448] ss:$48 sps:$4 sm:$0xff]   ;;  %v8151_v38 = vld [vmem:[%s10092_s29 + $0xeac] ss:$48 sps:$4 sm:$0xff]  }
 0x1b3   : > { %3291 = vmatprep.subr.bf16.mxu1 %v8067_v39  ;;  %v8154_v39 = vld [vmem:[%s10092_s29 + $0x14ac] ss:$48 sps:$4 sm:$0xff]   ;;  %v8194_v7 = vld [vmem:[%s10092_s29 + $0x1748] ss:$48 sps:$4 sm:$0xff]  }
 0x1b5   : > { %3251 = vmatpush1.bf16.msra.mxu0 %v8069_v40  ;;  %v8149_v40 = vld [vmem:[%s10092_s29 + $0xea8] ss:$48 sps:$4 sm:$0xff]  }
 0x1b6   : > { %3292 = vmatpush1.bf16.msra.mxu1 %v8070_v41  ;;  %3252 = vmatprep.subr.bf16.mxu0 %v8071_v42  ;;  %v8152_v41 = vld [vmem:[%s10092_s29 + $0x14a8] ss:$48 sps:$4 sm:$0xff]   ;;  %v8157_v42 = vld [vmem:[%s10092_s29 + $0xf0c] ss:$48 sps:$4 sm:$0xff]  }
 0x1b7   : > { %3293 = vmatprep.subr.bf16.mxu1 %v8073_v43  ;;  %v8160_v43 = vld [vmem:[%s10092_s29 + $0x150c] ss:$48 sps:$4 sm:$0xff]  }
 0x1b9   : > { %3253 = vmatpush1.bf16.msra.mxu0 %v8075_v44  ;;  %v8155_v44 = vld [vmem:[%s10092_s29 + $0xf08] ss:$48 sps:$4 sm:$0xff]  }
 0x1ba   : > { %3294 = vmatpush1.bf16.msra.mxu1 %v8076_v45  ;;  %3254 = vmatprep.subr.bf16.mxu0 %v8077_v46  ;;  %v8158_v45 = vld [vmem:[%s10092_s29 + $0x1508] ss:$48 sps:$4 sm:$0xff]   ;;  %v8163_v46 = vld [vmem:[%s10092_s29 + $0xf6c] ss:$48 sps:$4 sm:$0xff]  }
 0x1bb   : > { %3295 = vmatprep.subr.bf16.mxu1 %v8079_v47  ;;  %v8166_v47 = vld [vmem:[%s10092_s29 + $0x156c] ss:$48 sps:$4 sm:$0xff]  }
 0x1bd   : > { %3255 = vmatpush1.bf16.msra.mxu0 %v8081_v49  ;;  %v8164_v49 = vld [vmem:[%s10092_s29 + $0x1568] ss:$48 sps:$4 sm:$0xff]  }
 0x1be   : > { %3296 = vmatpush1.bf16.msra.mxu1 %v8082_v50  ;;  %3256 = vmatprep.subr.bf16.mxu0 %v8083_v53  ;;  %v8169_v50 = vld [vmem:[%s10092_s29 + $0xfcc] ss:$48 sps:$4 sm:$0xff]   ;;  %v8167_v53 = vld [vmem:[%s10092_s29 + $0xfc8] ss:$48 sps:$4 sm:$0xff]  }
 0x1bf   : > { %3297 = vmatprep.subr.bf16.mxu1 %v8085_v55  ;;  %v8170_v55 = vld [vmem:[%s10092_s29 + $0x15c8] ss:$48 sps:$4 sm:$0xff]  }
 0x1c1   : > { %3257 = vmatpush1.bf16.msra.mxu0 %v8087_v56  ;;  %v8175_v56 = vld [vmem:[%s10092_s29 + $0x102c] ss:$48 sps:$4 sm:$0xff]  }
 0x1c2   : > { %3298 = vmatpush1.bf16.msra.mxu1 %v8088_v57  ;;  %3258 = vmatprep.subr.bf16.mxu0 %v8089_v58  ;;  %v8178_v57 = vld [vmem:[%s10092_s29 + $0x162c] ss:$48 sps:$4 sm:$0xff]   ;;  %v8173_v58 = vld [vmem:[%s10092_s29 + $0x1028] ss:$48 sps:$4 sm:$0xff]  }
 0x1c3   : > { %3299 = vmatprep.subr.bf16.mxu1 %v8091_v59  ;;  %v8176_v59 = vld [vmem:[%s10092_s29 + $0x1628] ss:$48 sps:$4 sm:$0xff]  }
 0x1c5   : > { %3259 = vmatpush1.bf16.msra.mxu0 %v8093_v60  ;;  %v8181_v60 = vld [vmem:[%s10092_s29 + $0x108c] ss:$48 sps:$4 sm:$0xff]  }
 0x1c6   : > { %3300 = vmatpush1.bf16.msra.mxu1 %v8094_v61  ;;  %3260 = vmatprep.subr.bf16.mxu0 %v8095_v62  ;;  %v8184_v61 = vld [vmem:[%s10092_s29 + $0x168c] ss:$48 sps:$4 sm:$0xff]   ;;  %v8179_v62 = vld [vmem:[%s10092_s29 + $0x1088] ss:$48 sps:$4 sm:$0xff]  }
 0x1c7   : > { %3301 = vmatprep.subr.bf16.mxu1 %v8097_v63  ;;  %v8182_v63 = vld [vmem:[%s10092_s29 + $0x1688] ss:$48 sps:$4 sm:$0xff]  }
 0x1c9   : > { %3261 = vmatpush1.bf16.msra.mxu0 %v8099_v0  ;;  %v8187_v0 = vld [vmem:[%s10092_s29 + $0x10ec] ss:$48 sps:$4 sm:$0xff]  }
 0x1ca   : > { %3302 = vmatpush1.bf16.msra.mxu1 %v8100_v1  ;;  %3262 = vmatprep.subr.bf16.mxu0 %v8101_v2  ;;  %v8190_v1 = vld [vmem:[%s10092_s29 + $0x16ec] ss:$48 sps:$4 sm:$0xff]   ;;  %v8185_v2 = vld [vmem:[%s10092_s29 + $0x10e8] ss:$48 sps:$4 sm:$0xff]  }
 0x1cb   : > { %3303 = vmatprep.subr.bf16.mxu1 %v8103_v3  ;;  %v8188_v3 = vld [vmem:[%s10092_s29 + $0x16e8] ss:$48 sps:$4 sm:$0xff]  }
 0x1cd   : > { %3263 = vmatpush1.bf16.msra.mxu0 %v8105_v4  ;;  %v8193_v4 = vld [vmem:[%s10092_s29 + $0x114c] ss:$48 sps:$4 sm:$0xff]  }
 0x1ce   : > { %3304 = vmatpush1.bf16.msra.mxu1 %v8106_v5  ;;  %3314 = vmatprep.subr.bf16.mxu0 %v8109_v8  ;;  %v8196_v5 = vld [vmem:[%s10092_s29 + $0x174c] ss:$48 sps:$4 sm:$0xff]  }
 0x1cf   : > { %3355 = vmatprep.subr.bf16.mxu1 %v8112_v9  ;;  %v8199_v8 = vld [vmem:[%s10092_s29 + $0x11ac] ss:$48 sps:$4 sm:$0xff]  }
 0x1d0   : > { %3265 = vmatmul.mubr.bf16.vlgmr.msra.gmra.mrb[0].mxu0 %v10313_v10  ;;  %v8202_v9 = vld [vmem:[%s10092_s29 + $0x17ac] ss:$48 sps:$4 sm:$0xff]  }
 0x1d1   : > { %3306 = vmatmul.mubr.bf16.vlgmr.msra.gmra.mrb[0].mxu1 %v10315_v11  ;;  %3315 = vmatpush1.bf16.msra.mxu0 %v8107_v12  ;;  %v8197_v12 = vld [vmem:[%s10092_s29 + $0x11a8] ss:$48 sps:$4 sm:$0xff]  }
 0x1d2   : > { %3356 = vmatpush1.bf16.msra.mxu1 %v8110_v13  ;;  %3316 = vmatprep.subr.bf16.mxu0 %v8115_v14  ;;  %v8200_v13 = vld [vmem:[%s10092_s29 + $0x17a8] ss:$48 sps:$4 sm:$0xff]   ;;  %v8205_v14 = vld [vmem:[%s10092_s29 + $0xc14] ss:$48 sps:$4 sm:$0xff]  }
 0x1d3   : > { %3357 = vmatprep.subr.bf16.mxu1 %v8118_v15  ;;  %3346 = vmatprep.mubr.bf16.mxu0 %v10286_v51  ;;  %v8208_v15 = vld [vmem:[%s10092_s29 + $0x1214] ss:$48 sps:$4 sm:$0xff]  }
 0x1d4   : > { %3387 = vmatprep.mubr.bf16.mxu1 %v10290_v54 }
 0x1d5   : > { %3317 = vmatpush1.bf16.msra.mxu0 %v8113_v16  ;;  %v8203_v16 = vld [vmem:[%s10092_s29 + $0xc10] ss:$48 sps:$4 sm:$0xff]  }
 0x1d6   : > { %3358 = vmatpush1.bf16.msra.mxu1 %v8116_v17  ;;  %3318 = vmatprep.subr.bf16.mxu0 %v8121_v18  ;;  %v8206_v17 = vld [vmem:[%s10092_s29 + $0x1210] ss:$48 sps:$4 sm:$0xff]   ;;  %v8211_v18 = vld [vmem:[%s10092_s29 + $0xc74] ss:$48 sps:$4 sm:$0xff]  }
 0x1d7   : > { %3359 = vmatprep.subr.bf16.mxu1 %v8124_v19  ;;  %v8214_v19 = vld [vmem:[%s10092_s29 + $0x1274] ss:$48 sps:$4 sm:$0xff]  }
 0x1d9   : > { %3319 = vmatpush1.bf16.msra.mxu0 %v8119_v20  ;;  %v8209_v20 = vld [vmem:[%s10092_s29 + $0xc70] ss:$48 sps:$4 sm:$0xff]  }
 0x1da   : > { %3360 = vmatpush1.bf16.msra.mxu1 %v8122_v21  ;;  %3320 = vmatprep.subr.bf16.mxu0 %v8127_v22  ;;  %v8212_v21 = vld [vmem:[%s10092_s29 + $0x1270] ss:$48 sps:$4 sm:$0xff]   ;;  %v8217_v22 = vld [vmem:[%s10092_s29 + $0xcd4] ss:$48 sps:$4 sm:$0xff]  }
 0x1db   : > { %3361 = vmatprep.subr.bf16.mxu1 %v8130_v23  ;;  %v8220_v23 = vld [vmem:[%s10092_s29 + $0x12d4] ss:$48 sps:$4 sm:$0xff]  }
 0x1dd   : > { %3321 = vmatpush1.bf16.msra.mxu0 %v8125_v24  ;;  %v8215_v24 = vld [vmem:[%s10092_s29 + $0xcd0] ss:$48 sps:$4 sm:$0xff]  }
 0x1de   : > { %3362 = vmatpush1.bf16.msra.mxu1 %v8128_v25  ;;  %3322 = vmatprep.subr.bf16.mxu0 %v8133_v26  ;;  %v8218_v25 = vld [vmem:[%s10092_s29 + $0x12d0] ss:$48 sps:$4 sm:$0xff]   ;;  %v8223_v26 = vld [vmem:[%s10092_s29 + $0xd34] ss:$48 sps:$4 sm:$0xff]  }
 0x1df   : > { %3363 = vmatprep.subr.bf16.mxu1 %v8136_v27  ;;  %v8226_v27 = vld [vmem:[%s10092_s29 + $0x1334] ss:$48 sps:$4 sm:$0xff]  }
 0x1e1   : > { %3323 = vmatpush1.bf16.msra.mxu0 %v8131_v28  ;;  %v8221_v28 = vld [vmem:[%s10092_s29 + $0xd30] ss:$48 sps:$4 sm:$0xff]  }
 0x1e2   : > { %3364 = vmatpush1.bf16.msra.mxu1 %v8134_v29  ;;  %3324 = vmatprep.subr.bf16.mxu0 %v8139_v30  ;;  %v8224_v29 = vld [vmem:[%s10092_s29 + $0x1330] ss:$48 sps:$4 sm:$0xff]   ;;  %v8229_v30 = vld [vmem:[%s10092_s29 + $0xd94] ss:$48 sps:$4 sm:$0xff]  }
 0x1e3   : > { %3365 = vmatprep.subr.bf16.mxu1 %v8142_v31  ;;  %v8232_v31 = vld [vmem:[%s10092_s29 + $0x1394] ss:$48 sps:$4 sm:$0xff]  }
 0x1e5   : > { %3325 = vmatpush1.bf16.msra.mxu0 %v8137_v32  ;;  %v8227_v32 = vld [vmem:[%s10092_s29 + $0xd90] ss:$48 sps:$4 sm:$0xff]  }
 0x1e6   : > { %3366 = vmatpush1.bf16.msra.mxu1 %v8140_v33  ;;  %3326 = vmatprep.subr.bf16.mxu0 %v8145_v34  ;;  %v8230_v33 = vld [vmem:[%s10092_s29 + $0x1390] ss:$48 sps:$4 sm:$0xff]   ;;  %v8235_v34 = vld [vmem:[%s10092_s29 + $0xdf4] ss:$48 sps:$4 sm:$0xff]  }
 0x1e7   : > { %3367 = vmatprep.subr.bf16.mxu1 %v8148_v35  ;;  %v8238_v35 = vld [vmem:[%s10092_s29 + $0x13f4] ss:$48 sps:$4 sm:$0xff]  }
 0x1e9   : > { %3327 = vmatpush1.bf16.msra.mxu0 %v8143_v36  ;;  %v8233_v36 = vld [vmem:[%s10092_s29 + $0xdf0] ss:$48 sps:$4 sm:$0xff]  }
 0x1ea   : > { %3368 = vmatpush1.bf16.msra.mxu1 %v8146_v37  ;;  %3328 = vmatprep.subr.bf16.mxu0 %v8151_v38  ;;  %v8236_v37 = vld [vmem:[%s10092_s29 + $0x13f0] ss:$48 sps:$4 sm:$0xff]   ;;  %v8241_v38 = vld [vmem:[%s10092_s29 + $0xe54] ss:$48 sps:$4 sm:$0xff]  }
 0x1eb   : > { %3369 = vmatprep.subr.bf16.mxu1 %v8154_v39  ;;  %v8244_v39 = vld [vmem:[%s10092_s29 + $0x1454] ss:$48 sps:$4 sm:$0xff]  }
 0x1ed   : > { %3329 = vmatpush1.bf16.msra.mxu0 %v8149_v40  ;;  %v8239_v40 = vld [vmem:[%s10092_s29 + $0xe50] ss:$48 sps:$4 sm:$0xff]  }
 0x1ee   : > { %3370 = vmatpush1.bf16.msra.mxu1 %v8152_v41  ;;  %3330 = vmatprep.subr.bf16.mxu0 %v8157_v42  ;;  %v8242_v41 = vld [vmem:[%s10092_s29 + $0x1450] ss:$48 sps:$4 sm:$0xff]   ;;  %v8247_v42 = vld [vmem:[%s10092_s29 + $0xeb4] ss:$48 sps:$4 sm:$0xff]  }
 0x1ef   : > { %3371 = vmatprep.subr.bf16.mxu1 %v8160_v43  ;;  %v8250_v43 = vld [vmem:[%s10092_s29 + $0x14b4] ss:$48 sps:$4 sm:$0xff]  }
 0x1f1   : > { %3331 = vmatpush1.bf16.msra.mxu0 %v8155_v44  ;;  %v8245_v44 = vld [vmem:[%s10092_s29 + $0xeb0] ss:$48 sps:$4 sm:$0xff]  }
 0x1f2   : > { %3372 = vmatpush1.bf16.msra.mxu1 %v8158_v45  ;;  %3332 = vmatprep.subr.bf16.mxu0 %v8163_v46  ;;  %v8248_v45 = vld [vmem:[%s10092_s29 + $0x14b0] ss:$48 sps:$4 sm:$0xff]   ;;  %v8253_v46 = vld [vmem:[%s10092_s29 + $0xf14] ss:$48 sps:$4 sm:$0xff]  }
 0x1f3   : > { %3373 = vmatprep.subr.bf16.mxu1 %v8166_v47  ;;  %v8256_v47 = vld [vmem:[%s10092_s29 + $0x1514] ss:$48 sps:$4 sm:$0xff]  }
 0x1f5   : > { %3333 = vmatpush1.bf16.msra.mxu0 %v8161_v48  ;;  %v8251_v48 = vld [vmem:[%s10092_s29 + $0xf10] ss:$48 sps:$4 sm:$0xff]  }
 0x1f6   : > { %3374 = vmatpush1.bf16.msra.mxu1 %v8164_v49  ;;  %3334 = vmatprep.subr.bf16.mxu0 %v8169_v50  ;;  %v8254_v49 = vld [vmem:[%s10092_s29 + $0x1510] ss:$48 sps:$4 sm:$0xff]   ;;  %v8259_v50 = vld [vmem:[%s10092_s29 + $0xf74] ss:$48 sps:$4 sm:$0xff]  }
 0x1f7   : > { %3375 = vmatprep.subr.bf16.mxu1 %v8172_v52  ;;  %v8262_v52 = vld [vmem:[%s10092_s29 + $0x1574] ss:$48 sps:$4 sm:$0xff]  }
 0x1f9   : > { %3335 = vmatpush1.bf16.msra.mxu0 %v8167_v53  ;;  %v8257_v53 = vld [vmem:[%s10092_s29 + $0xf70] ss:$48 sps:$4 sm:$0xff]  }
 0x1fa   : > { %3376 = vmatpush1.bf16.msra.mxu1 %v8170_v55  ;;  %3336 = vmatprep.subr.bf16.mxu0 %v8175_v56  ;;  %v8260_v55 = vld [vmem:[%s10092_s29 + $0x1570] ss:$48 sps:$4 sm:$0xff]   ;;  %v8265_v56 = vld [vmem:[%s10092_s29 + $0xfd4] ss:$48 sps:$4 sm:$0xff]  }
 0x1fb   : > { %3377 = vmatprep.subr.bf16.mxu1 %v8178_v57  ;;  %v8268_v57 = vld [vmem:[%s10092_s29 + $0x15d4] ss:$48 sps:$4 sm:$0xff]  }
 0x1fd   : > { %3337 = vmatpush1.bf16.msra.mxu0 %v8173_v58  ;;  %v8263_v58 = vld [vmem:[%s10092_s29 + $0xfd0] ss:$48 sps:$4 sm:$0xff]  }
 0x1fe   : > { %3378 = vmatpush1.bf16.msra.mxu1 %v8176_v59  ;;  %3338 = vmatprep.subr.bf16.mxu0 %v8181_v60  ;;  %v8266_v59 = vld [vmem:[%s10092_s29 + $0x15d0] ss:$48 sps:$4 sm:$0xff]   ;;  %v8271_v60 = vld [vmem:[%s10092_s29 + $0x1034] ss:$48 sps:$4 sm:$0xff]  }
 0x1ff   : > { %3379 = vmatprep.subr.bf16.mxu1 %v8184_v61  ;;  %v8274_v61 = vld [vmem:[%s10092_s29 + $0x1634] ss:$48 sps:$4 sm:$0xff]  }
 0x201   : > { %3339 = vmatpush1.bf16.msra.mxu0 %v8179_v62  ;;  %v8269_v62 = vld [vmem:[%s10092_s29 + $0x1030] ss:$48 sps:$4 sm:$0xff]  }
 0x202   : > { %3380 = vmatpush1.bf16.msra.mxu1 %v8182_v63  ;;  %3340 = vmatprep.subr.bf16.mxu0 %v8187_v0  ;;  %v8272_v63 = vld [vmem:[%s10092_s29 + $0x1630] ss:$48 sps:$4 sm:$0xff]   ;;  %v8277_v0 = vld [vmem:[%s10092_s29 + $0x1094] ss:$48 sps:$4 sm:$0xff]  }
 0x203   : > { %3381 = vmatprep.subr.bf16.mxu1 %v8190_v1  ;;  %v8280_v1 = vld [vmem:[%s10092_s29 + $0x1694] ss:$48 sps:$4 sm:$0xff]  }
 0x205   : > { %3341 = vmatpush1.bf16.msra.mxu0 %v8185_v2  ;;  %v8275_v2 = vld [vmem:[%s10092_s29 + $0x1090] ss:$48 sps:$4 sm:$0xff]  }
 0x206   : > { %3382 = vmatpush1.bf16.msra.mxu1 %v8188_v3  ;;  %3342 = vmatprep.subr.bf16.mxu0 %v8193_v4  ;;  %v8278_v3 = vld [vmem:[%s10092_s29 + $0x1690] ss:$48 sps:$4 sm:$0xff]   ;;  %v8283_v4 = vld [vmem:[%s10092_s29 + $0x10f4] ss:$48 sps:$4 sm:$0xff]  }
 0x207   : > { %3383 = vmatprep.subr.bf16.mxu1 %v8196_v5  ;;  %v8286_v5 = vld [vmem:[%s10092_s29 + $0x16f4] ss:$48 sps:$4 sm:$0xff]  }
 0x209   : > { %3343 = vmatpush1.bf16.msra.mxu0 %v8191_v6  ;;  %v8281_v6 = vld [vmem:[%s10092_s29 + $0x10f0] ss:$48 sps:$4 sm:$0xff]  }
 0x20a   : > { %3384 = vmatpush1.bf16.msra.mxu1 %v8194_v7  ;;  %3344 = vmatprep.subr.bf16.mxu0 %v8199_v8  ;;  %v8284_v7 = vld [vmem:[%s10092_s29 + $0x16f0] ss:$48 sps:$4 sm:$0xff]   ;;  %v8289_v8 = vld [vmem:[%s10092_s29 + $0x1154] ss:$48 sps:$4 sm:$0xff]  }
 0x20b   : > { %3385 = vmatprep.subr.bf16.mxu1 %v8202_v9  ;;  %v8292_v9 = vld [vmem:[%s10092_s29 + $0x1754] ss:$48 sps:$4 sm:$0xff]  }
 0x20d   : > { %3345 = vmatpush1.bf16.msra.mxu0 %v8197_v12  ;;  %v8287_v12 = vld [vmem:[%s10092_s29 + $0x1150] ss:$48 sps:$4 sm:$0xff]  }
 0x20e   : > { %3386 = vmatpush1.bf16.msra.mxu1 %v8200_v13  ;;  %3396 = vmatprep.subr.bf16.mxu0 %v8205_v14  ;;  %v8290_v13 = vld [vmem:[%s10092_s29 + $0x1750] ss:$48 sps:$4 sm:$0xff]   ;;  %v8295_v14 = vld [vmem:[%s10092_s29 + $0x11b4] ss:$48 sps:$4 sm:$0xff]  }
 0x20f   : > { %3437 = vmatprep.subr.bf16.mxu1 %v8208_v15  ;;  %v8298_v15 = vld [vmem:[%s10092_s29 + $0x17b4] ss:$48 sps:$4 sm:$0xff]  }
 0x210   : > { %3347 = vmatmul.mubr.bf16.vlgmr.msra.gmra.mrb[4].mxu0 %v10313_v10 }
 0x211   : > { %3388 = vmatmul.mubr.bf16.vlgmr.msra.gmra.mrb[4].mxu1 %v10315_v11  ;;  %3397 = vmatpush1.bf16.msra.mxu0 %v8203_v16  ;;  %v8293_v16 = vld [vmem:[%s10092_s29 + $0x11b0] ss:$48 sps:$4 sm:$0xff]  }
 0x212   : > { %3438 = vmatpush1.bf16.msra.mxu1 %v8206_v17  ;;  %3398 = vmatprep.subr.bf16.mxu0 %v8211_v18  ;;  %v8296_v17 = vld [vmem:[%s10092_s29 + $0x17b0] ss:$48 sps:$4 sm:$0xff]   ;;  %v8301_v18 = vld [vmem:[%s10092_s29 + $0xc1c] ss:$48 sps:$4 sm:$0xff]  }
 0x213   : > { %3439 = vmatprep.subr.bf16.mxu1 %v8214_v19  ;;  %3428 = vmatprep.mubr.bf16.mxu0 %v10286_v51  ;;  %v8304_v19 = vld [vmem:[%s10092_s29 + $0x121c] ss:$48 sps:$4 sm:$0xff]  }
 0x214   : > { %3469 = vmatprep.mubr.bf16.mxu1 %v10290_v54 }
 0x215   : > { %3399 = vmatpush1.bf16.msra.mxu0 %v8209_v20  ;;  %v8299_v20 = vld [vmem:[%s10092_s29 + $0xc18] ss:$48 sps:$4 sm:$0xff]  }
 0x216   : > { %3440 = vmatpush1.bf16.msra.mxu1 %v8212_v21  ;;  %3400 = vmatprep.subr.bf16.mxu0 %v8217_v22  ;;  %v8302_v21 = vld [vmem:[%s10092_s29 + $0x1218] ss:$48 sps:$4 sm:$0xff]   ;;  %v8307_v22 = vld [vmem:[%s10092_s29 + $0xc7c] ss:$48 sps:$4 sm:$0xff]  }
 0x217   : > { %3441 = vmatprep.subr.bf16.mxu1 %v8220_v23  ;;  %v8310_v23 = vld [vmem:[%s10092_s29 + $0x127c] ss:$48 sps:$4 sm:$0xff]  }
 0x219   : > { %3401 = vmatpush1.bf16.msra.mxu0 %v8215_v24  ;;  %v8305_v24 = vld [vmem:[%s10092_s29 + $0xc78] ss:$48 sps:$4 sm:$0xff]  }
 0x21a   : > { %3442 = vmatpush1.bf16.msra.mxu1 %v8218_v25  ;;  %3402 = vmatprep.subr.bf16.mxu0 %v8223_v26  ;;  %v8308_v25 = vld [vmem:[%s10092_s29 + $0x1278] ss:$48 sps:$4 sm:$0xff]   ;;  %v8313_v26 = vld [vmem:[%s10092_s29 + $0xcdc] ss:$48 sps:$4 sm:$0xff]  }
 0x21b   : > { %3443 = vmatprep.subr.bf16.mxu1 %v8226_v27  ;;  %v8316_v27 = vld [vmem:[%s10092_s29 + $0x12dc] ss:$48 sps:$4 sm:$0xff]  }
 0x21d   : > { %3403 = vmatpush1.bf16.msra.mxu0 %v8221_v28  ;;  %v8311_v28 = vld [vmem:[%s10092_s29 + $0xcd8] ss:$48 sps:$4 sm:$0xff]  }
 0x21e   : > { %3444 = vmatpush1.bf16.msra.mxu1 %v8224_v29  ;;  %3404 = vmatprep.subr.bf16.mxu0 %v8229_v30  ;;  %v8314_v29 = vld [vmem:[%s10092_s29 + $0x12d8] ss:$48 sps:$4 sm:$0xff]   ;;  %v8319_v30 = vld [vmem:[%s10092_s29 + $0xd3c] ss:$48 sps:$4 sm:$0xff]  }
 0x21f   : > { %3445 = vmatprep.subr.bf16.mxu1 %v8232_v31  ;;  %v8322_v31 = vld [vmem:[%s10092_s29 + $0x133c] ss:$48 sps:$4 sm:$0xff]  }
 0x221   : > { %3405 = vmatpush1.bf16.msra.mxu0 %v8227_v32  ;;  %v8317_v32 = vld [vmem:[%s10092_s29 + $0xd38] ss:$48 sps:$4 sm:$0xff]  }
 0x222   : > { %3446 = vmatpush1.bf16.msra.mxu1 %v8230_v33  ;;  %3406 = vmatprep.subr.bf16.mxu0 %v8235_v34  ;;  %v8320_v33 = vld [vmem:[%s10092_s29 + $0x1338] ss:$48 sps:$4 sm:$0xff]   ;;  %v8325_v34 = vld [vmem:[%s10092_s29 + $0xd9c] ss:$48 sps:$4 sm:$0xff]  }
 0x223   : > { %3447 = vmatprep.subr.bf16.mxu1 %v8238_v35  ;;  %v8328_v35 = vld [vmem:[%s10092_s29 + $0x139c] ss:$48 sps:$4 sm:$0xff]  }
 0x225   : > { %3407 = vmatpush1.bf16.msra.mxu0 %v8233_v36  ;;  %v8323_v36 = vld [vmem:[%s10092_s29 + $0xd98] ss:$48 sps:$4 sm:$0xff]  }
 0x226   : > { %3448 = vmatpush1.bf16.msra.mxu1 %v8236_v37  ;;  %3408 = vmatprep.subr.bf16.mxu0 %v8241_v38  ;;  %v8326_v37 = vld [vmem:[%s10092_s29 + $0x1398] ss:$48 sps:$4 sm:$0xff]   ;;  %v8331_v38 = vld [vmem:[%s10092_s29 + $0xdfc] ss:$48 sps:$4 sm:$0xff]  }
 0x227   : > { %3449 = vmatprep.subr.bf16.mxu1 %v8244_v39  ;;  %v8334_v39 = vld [vmem:[%s10092_s29 + $0x13fc] ss:$48 sps:$4 sm:$0xff]  }
 0x229   : > { %3409 = vmatpush1.bf16.msra.mxu0 %v8239_v40  ;;  %v8329_v40 = vld [vmem:[%s10092_s29 + $0xdf8] ss:$48 sps:$4 sm:$0xff]  }
 0x22a   : > { %3450 = vmatpush1.bf16.msra.mxu1 %v8242_v41  ;;  %3410 = vmatprep.subr.bf16.mxu0 %v8247_v42  ;;  %v8332_v41 = vld [vmem:[%s10092_s29 + $0x13f8] ss:$48 sps:$4 sm:$0xff]   ;;  %v8337_v42 = vld [vmem:[%s10092_s29 + $0xe5c] ss:$48 sps:$4 sm:$0xff]  }
 0x22b   : > { %3451 = vmatprep.subr.bf16.mxu1 %v8250_v43  ;;  %v8340_v43 = vld [vmem:[%s10092_s29 + $0x145c] ss:$48 sps:$4 sm:$0xff]  }
 0x22d   : > { %3411 = vmatpush1.bf16.msra.mxu0 %v8245_v44  ;;  %v8335_v44 = vld [vmem:[%s10092_s29 + $0xe58] ss:$48 sps:$4 sm:$0xff]  }
 0x22e   : > { %3452 = vmatpush1.bf16.msra.mxu1 %v8248_v45  ;;  %3412 = vmatprep.subr.bf16.mxu0 %v8253_v46  ;;  %v8338_v45 = vld [vmem:[%s10092_s29 + $0x1458] ss:$48 sps:$4 sm:$0xff]   ;;  %v8343_v46 = vld [vmem:[%s10092_s29 + $0xebc] ss:$48 sps:$4 sm:$0xff]  }
 0x22f   : > { %3453 = vmatprep.subr.bf16.mxu1 %v8256_v47  ;;  %v8346_v47 = vld [vmem:[%s10092_s29 + $0x14bc] ss:$48 sps:$4 sm:$0xff]  }
 0x231   : > { %3413 = vmatpush1.bf16.msra.mxu0 %v8251_v48  ;;  %v8341_v48 = vld [vmem:[%s10092_s29 + $0xeb8] ss:$48 sps:$4 sm:$0xff]  }
 0x232   : > { %3454 = vmatpush1.bf16.msra.mxu1 %v8254_v49  ;;  %3414 = vmatprep.subr.bf16.mxu0 %v8259_v50  ;;  %v8344_v49 = vld [vmem:[%s10092_s29 + $0x14b8] ss:$48 sps:$4 sm:$0xff]   ;;  %v8349_v50 = vld [vmem:[%s10092_s29 + $0xf1c] ss:$48 sps:$4 sm:$0xff]  }
 0x233   : > { %3455 = vmatprep.subr.bf16.mxu1 %v8262_v52  ;;  %v8352_v52 = vld [vmem:[%s10092_s29 + $0x151c] ss:$48 sps:$4 sm:$0xff]  }
 0x235   : > { %3415 = vmatpush1.bf16.msra.mxu0 %v8257_v53  ;;  %v8347_v53 = vld [vmem:[%s10092_s29 + $0xf18] ss:$48 sps:$4 sm:$0xff]  }
 0x236   : > { %3456 = vmatpush1.bf16.msra.mxu1 %v8260_v55  ;;  %3416 = vmatprep.subr.bf16.mxu0 %v8265_v56  ;;  %v8350_v55 = vld [vmem:[%s10092_s29 + $0x1518] ss:$48 sps:$4 sm:$0xff]   ;;  %v8355_v56 = vld [vmem:[%s10092_s29 + $0xf7c] ss:$48 sps:$4 sm:$0xff]  }
 0x237   : > { %3457 = vmatprep.subr.bf16.mxu1 %v8268_v57  ;;  %v8358_v57 = vld [vmem:[%s10092_s29 + $0x157c] ss:$48 sps:$4 sm:$0xff]  }
 0x239   : > { %3417 = vmatpush1.bf16.msra.mxu0 %v8263_v58  ;;  %v8353_v58 = vld [vmem:[%s10092_s29 + $0xf78] ss:$48 sps:$4 sm:$0xff]  }
 0x23a   : > { %3458 = vmatpush1.bf16.msra.mxu1 %v8266_v59  ;;  %3418 = vmatprep.subr.bf16.mxu0 %v8271_v60  ;;  %v8356_v59 = vld [vmem:[%s10092_s29 + $0x1578] ss:$48 sps:$4 sm:$0xff]   ;;  %v8361_v60 = vld [vmem:[%s10092_s29 + $0xfdc] ss:$48 sps:$4 sm:$0xff]  }
 0x23b   : > { %3459 = vmatprep.subr.bf16.mxu1 %v8274_v61  ;;  %v8364_v61 = vld [vmem:[%s10092_s29 + $0x15dc] ss:$48 sps:$4 sm:$0xff]  }
 0x23d   : > { %3419 = vmatpush1.bf16.msra.mxu0 %v8269_v62  ;;  %v8359_v62 = vld [vmem:[%s10092_s29 + $0xfd8] ss:$48 sps:$4 sm:$0xff]  }
 0x23e   : > { %3460 = vmatpush1.bf16.msra.mxu1 %v8272_v63  ;;  %3420 = vmatprep.subr.bf16.mxu0 %v8277_v0  ;;  %v8362_v63 = vld [vmem:[%s10092_s29 + $0x15d8] ss:$48 sps:$4 sm:$0xff]   ;;  %v8367_v0 = vld [vmem:[%s10092_s29 + $0x103c] ss:$48 sps:$4 sm:$0xff]  }
 0x23f   : > { %3461 = vmatprep.subr.bf16.mxu1 %v8280_v1  ;;  %v8370_v1 = vld [vmem:[%s10092_s29 + $0x163c] ss:$48 sps:$4 sm:$0xff]  }
 0x241   : > { %3421 = vmatpush1.bf16.msra.mxu0 %v8275_v2  ;;  %v8365_v2 = vld [vmem:[%s10092_s29 + $0x1038] ss:$48 sps:$4 sm:$0xff]  }
 0x242   : > { %3462 = vmatpush1.bf16.msra.mxu1 %v8278_v3  ;;  %3422 = vmatprep.subr.bf16.mxu0 %v8283_v4  ;;  %v8368_v3 = vld [vmem:[%s10092_s29 + $0x1638] ss:$48 sps:$4 sm:$0xff]   ;;  %v8373_v4 = vld [vmem:[%s10092_s29 + $0x109c] ss:$48 sps:$4 sm:$0xff]  }
 0x243   : > { %3463 = vmatprep.subr.bf16.mxu1 %v8286_v5  ;;  %v8376_v5 = vld [vmem:[%s10092_s29 + $0x169c] ss:$48 sps:$4 sm:$0xff]  }
 0x245   : > { %3423 = vmatpush1.bf16.msra.mxu0 %v8281_v6  ;;  %v8371_v6 = vld [vmem:[%s10092_s29 + $0x1098] ss:$48 sps:$4 sm:$0xff]  }
 0x246   : > { %3464 = vmatpush1.bf16.msra.mxu1 %v8284_v7  ;;  %3424 = vmatprep.subr.bf16.mxu0 %v8289_v8  ;;  %v8374_v7 = vld [vmem:[%s10092_s29 + $0x1698] ss:$48 sps:$4 sm:$0xff]   ;;  %v8379_v8 = vld [vmem:[%s10092_s29 + $0x10fc] ss:$48 sps:$4 sm:$0xff]  }
 0x247   : > { %3465 = vmatprep.subr.bf16.mxu1 %v8292_v9  ;;  %v8382_v9 = vld [vmem:[%s10092_s29 + $0x16fc] ss:$48 sps:$4 sm:$0xff]  }
 0x249   : > { %3425 = vmatpush1.bf16.msra.mxu0 %v8287_v12  ;;  %v8377_v12 = vld [vmem:[%s10092_s29 + $0x10f8] ss:$48 sps:$4 sm:$0xff]  }
 0x24a   : > { %3466 = vmatpush1.bf16.msra.mxu1 %v8290_v13  ;;  %3426 = vmatprep.subr.bf16.mxu0 %v8295_v14  ;;  %v8380_v13 = vld [vmem:[%s10092_s29 + $0x16f8] ss:$48 sps:$4 sm:$0xff]   ;;  %v8385_v14 = vld [vmem:[%s10092_s29 + $0x115c] ss:$48 sps:$4 sm:$0xff]  }
 0x24b   : > { %3467 = vmatprep.subr.bf16.mxu1 %v8298_v15  ;;  %v8388_v15 = vld [vmem:[%s10092_s29 + $0x175c] ss:$48 sps:$4 sm:$0xff]  }
 0x24d   : > { %3427 = vmatpush1.bf16.msra.mxu0 %v8293_v16  ;;  %v8383_v16 = vld [vmem:[%s10092_s29 + $0x1158] ss:$48 sps:$4 sm:$0xff]  }
 0x24e   : > { %3468 = vmatpush1.bf16.msra.mxu1 %v8296_v17  ;;  %3478 = vmatprep.subr.bf16.mxu0 %v8301_v18  ;;  %v8386_v17 = vld [vmem:[%s10092_s29 + $0x1758] ss:$48 sps:$4 sm:$0xff]   ;;  %v8391_v18 = vld [vmem:[%s10092_s29 + $0x11bc] ss:$48 sps:$4 sm:$0xff]  }
 0x24f   : > { %3519 = vmatprep.subr.bf16.mxu1 %v8304_v19  ;;  %v8394_v19 = vld [vmem:[%s10092_s29 + $0x17bc] ss:$48 sps:$4 sm:$0xff]  }
 0x250   : > { %3429 = vmatmul.mubr.bf16.vlgmr.msra.gmra.mrb[8].mxu0 %v10313_v10 }
 0x251   : > { %3470 = vmatmul.mubr.bf16.vlgmr.msra.gmra.mrb[8].mxu1 %v10315_v11  ;;  %3479 = vmatpush1.bf16.msra.mxu0 %v8299_v20  ;;  %v8389_v20 = vld [vmem:[%s10092_s29 + $0x11b8] ss:$48 sps:$4 sm:$0xff]  }
 0x252   : > { %3520 = vmatpush1.bf16.msra.mxu1 %v8302_v21  ;;  %3480 = vmatprep.subr.bf16.mxu0 %v8307_v22  ;;  %v8392_v21 = vld [vmem:[%s10092_s29 + $0x17b8] ss:$48 sps:$4 sm:$0xff]   ;;  %v8397_v22 = vld [vmem:[%s10092_s29 + $0xc24] ss:$48 sps:$4 sm:$0xff]  }
 0x253   : > { %3521 = vmatprep.subr.bf16.mxu1 %v8310_v23  ;;  %3510 = vmatprep.mubr.bf16.mxu0 %v10286_v51  ;;  %v8400_v23 = vld [vmem:[%s10092_s29 + $0x1224] ss:$48 sps:$4 sm:$0xff]  }
 0x254   : > { %3551 = vmatprep.mubr.bf16.mxu1 %v10290_v54 }
 0x255   : > { %3481 = vmatpush1.bf16.msra.mxu0 %v8305_v24  ;;  %v8395_v24 = vld [vmem:[%s10092_s29 + $0xc20] ss:$48 sps:$4 sm:$0xff]  }
 0x256   : > { %3522 = vmatpush1.bf16.msra.mxu1 %v8308_v25  ;;  %3482 = vmatprep.subr.bf16.mxu0 %v8313_v26  ;;  %v8398_v25 = vld [vmem:[%s10092_s29 + $0x1220] ss:$48 sps:$4 sm:$0xff]   ;;  %v8403_v26 = vld [vmem:[%s10092_s29 + $0xc84] ss:$48 sps:$4 sm:$0xff]  }
 0x257   : > { %3523 = vmatprep.subr.bf16.mxu1 %v8316_v27  ;;  %v8406_v27 = vld [vmem:[%s10092_s29 + $0x1284] ss:$48 sps:$4 sm:$0xff]  }
 0x259   : > { %3483 = vmatpush1.bf16.msra.mxu0 %v8311_v28  ;;  %v8401_v28 = vld [vmem:[%s10092_s29 + $0xc80] ss:$48 sps:$4 sm:$0xff]  }
 0x25a   : > { %3524 = vmatpush1.bf16.msra.mxu1 %v8314_v29  ;;  %3484 = vmatprep.subr.bf16.mxu0 %v8319_v30  ;;  %v8404_v29 = vld [vmem:[%s10092_s29 + $0x1280] ss:$48 sps:$4 sm:$0xff]   ;;  %v8409_v30 = vld [vmem:[%s10092_s29 + $0xce4] ss:$48 sps:$4 sm:$0xff]  }
 0x25b   : > { %3525 = vmatprep.subr.bf16.mxu1 %v8322_v31  ;;  %v8412_v31 = vld [vmem:[%s10092_s29 + $0x12e4] ss:$48 sps:$4 sm:$0xff]  }
 0x25d   : > { %3485 = vmatpush1.bf16.msra.mxu0 %v8317_v32  ;;  %v8407_v32 = vld [vmem:[%s10092_s29 + $0xce0] ss:$48 sps:$4 sm:$0xff]  }
 0x25e   : > { %3526 = vmatpush1.bf16.msra.mxu1 %v8320_v33  ;;  %3486 = vmatprep.subr.bf16.mxu0 %v8325_v34  ;;  %v8410_v33 = vld [vmem:[%s10092_s29 + $0x12e0] ss:$48 sps:$4 sm:$0xff]   ;;  %v8415_v34 = vld [vmem:[%s10092_s29 + $0xd44] ss:$48 sps:$4 sm:$0xff]  }
 0x25f   : > { %3527 = vmatprep.subr.bf16.mxu1 %v8328_v35  ;;  %v8418_v35 = vld [vmem:[%s10092_s29 + $0x1344] ss:$48 sps:$4 sm:$0xff]  }
 0x261   : > { %3487 = vmatpush1.bf16.msra.mxu0 %v8323_v36  ;;  %v8413_v36 = vld [vmem:[%s10092_s29 + $0xd40] ss:$48 sps:$4 sm:$0xff]  }
 0x262   : > { %3528 = vmatpush1.bf16.msra.mxu1 %v8326_v37  ;;  %3488 = vmatprep.subr.bf16.mxu0 %v8331_v38  ;;  %v8416_v37 = vld [vmem:[%s10092_s29 + $0x1340] ss:$48 sps:$4 sm:$0xff]   ;;  %v8421_v38 = vld [vmem:[%s10092_s29 + $0xda4] ss:$48 sps:$4 sm:$0xff]  }
 0x263   : > { %3529 = vmatprep.subr.bf16.mxu1 %v8334_v39  ;;  %v8424_v39 = vld [vmem:[%s10092_s29 + $0x13a4] ss:$48 sps:$4 sm:$0xff]  }
 0x265   : > { %3489 = vmatpush1.bf16.msra.mxu0 %v8329_v40  ;;  %v8419_v40 = vld [vmem:[%s10092_s29 + $0xda0] ss:$48 sps:$4 sm:$0xff]  }
 0x266   : > { %3530 = vmatpush1.bf16.msra.mxu1 %v8332_v41  ;;  %3490 = vmatprep.subr.bf16.mxu0 %v8337_v42  ;;  %v8422_v41 = vld [vmem:[%s10092_s29 + $0x13a0] ss:$48 sps:$4 sm:$0xff]   ;;  %v8427_v42 = vld [vmem:[%s10092_s29 + $0xe04] ss:$48 sps:$4 sm:$0xff]  }
 0x267   : > { %3531 = vmatprep.subr.bf16.mxu1 %v8340_v43  ;;  %v8430_v43 = vld [vmem:[%s10092_s29 + $0x1404] ss:$48 sps:$4 sm:$0xff]  }
 0x269   : > { %3491 = vmatpush1.bf16.msra.mxu0 %v8335_v44  ;;  %v8425_v44 = vld [vmem:[%s10092_s29 + $0xe00] ss:$48 sps:$4 sm:$0xff]  }
 0x26a   : > { %3532 = vmatpush1.bf16.msra.mxu1 %v8338_v45  ;;  %3492 = vmatprep.subr.bf16.mxu0 %v8343_v46  ;;  %v8428_v45 = vld [vmem:[%s10092_s29 + $0x1400] ss:$48 sps:$4 sm:$0xff]   ;;  %v8433_v46 = vld [vmem:[%s10092_s29 + $0xe64] ss:$48 sps:$4 sm:$0xff]  }
 0x26b   : > { %3533 = vmatprep.subr.bf16.mxu1 %v8346_v47  ;;  %v8436_v47 = vld [vmem:[%s10092_s29 + $0x1464] ss:$48 sps:$4 sm:$0xff]  }
 0x26d   : > { %3493 = vmatpush1.bf16.msra.mxu0 %v8341_v48 }
 0x26e   : > { %3534 = vmatpush1.bf16.msra.mxu1 %v8344_v49  ;;  %3494 = vmatprep.subr.bf16.mxu0 %v8349_v50  ;;  %v8431_v50 = vld [vmem:[%s10092_s29 + $0xe60] ss:$48 sps:$4 sm:$0xff]  }
 0x26f   : > { %3535 = vmatprep.subr.bf16.mxu1 %v8352_v52  ;;  %v8434_v52 = vld [vmem:[%s10092_s29 + $0x1460] ss:$48 sps:$4 sm:$0xff]  }
 0x271   : > { %3495 = vmatpush1.bf16.msra.mxu0 %v8347_v53 }
 0x272   : > { %3536 = vmatpush1.bf16.msra.mxu1 %v8350_v55  ;;  %3496 = vmatprep.subr.bf16.mxu0 %v8355_v56 }
 0x273   : > { %3537 = vmatprep.subr.bf16.mxu1 %v8358_v57 }
 0x275   : > { %3497 = vmatpush1.bf16.msra.mxu0 %v8353_v58 }
 0x276   : > { %3538 = vmatpush1.bf16.msra.mxu1 %v8356_v59  ;;  %3498 = vmatprep.subr.bf16.mxu0 %v8361_v60 }
 0x277   : > { %3539 = vmatprep.subr.bf16.mxu1 %v8364_v61 }
 0x279   : > { %3499 = vmatpush1.bf16.msra.mxu0 %v8359_v62  ;;  %v8439_v62 = vld [vmem:[%s10092_s29 + $0xec4] ss:$48 sps:$4 sm:$0xff]  }
 0x27a   : > { %3540 = vmatpush1.bf16.msra.mxu1 %v8362_v63  ;;  %3500 = vmatprep.subr.bf16.mxu0 %v8367_v0  ;;  %v8442_v63 = vld [vmem:[%s10092_s29 + $0x14c4] ss:$48 sps:$4 sm:$0xff]   ;;  %v8437_v0 = vld [vmem:[%s10092_s29 + $0xec0] ss:$48 sps:$4 sm:$0xff]  }
 0x27b   : > { %3541 = vmatprep.subr.bf16.mxu1 %v8370_v1  ;;  %v8440_v1 = vld [vmem:[%s10092_s29 + $0x14c0] ss:$48 sps:$4 sm:$0xff]  }
 0x27d   : > { %3501 = vmatpush1.bf16.msra.mxu0 %v8365_v2  ;;  %v8445_v2 = vld [vmem:[%s10092_s29 + $0xf24] ss:$48 sps:$4 sm:$0xff]  }
 0x27e   : > { %3542 = vmatpush1.bf16.msra.mxu1 %v8368_v3  ;;  %3502 = vmatprep.subr.bf16.mxu0 %v8373_v4  ;;  %v8448_v3 = vld [vmem:[%s10092_s29 + $0x1524] ss:$48 sps:$4 sm:$0xff]   ;;  %v8443_v4 = vld [vmem:[%s10092_s29 + $0xf20] ss:$48 sps:$4 sm:$0xff]  }
 0x27f   : > { %3543 = vmatprep.subr.bf16.mxu1 %v8376_v5  ;;  %v8446_v5 = vld [vmem:[%s10092_s29 + $0x1520] ss:$48 sps:$4 sm:$0xff]  }
 0x281   : > { %3503 = vmatpush1.bf16.msra.mxu0 %v8371_v6  ;;  %v8451_v6 = vld [vmem:[%s10092_s29 + $0xf84] ss:$48 sps:$4 sm:$0xff]  }
 0x282   : > { %3544 = vmatpush1.bf16.msra.mxu1 %v8374_v7  ;;  %3504 = vmatprep.subr.bf16.mxu0 %v8379_v8  ;;  %v8454_v7 = vld [vmem:[%s10092_s29 + $0x1584] ss:$48 sps:$4 sm:$0xff]   ;;  %v8449_v8 = vld [vmem:[%s10092_s29 + $0xf80] ss:$48 sps:$4 sm:$0xff]  }
 0x283   : > { %3545 = vmatprep.subr.bf16.mxu1 %v8382_v9  ;;  %v8452_v9 = vld [vmem:[%s10092_s29 + $0x1580] ss:$48 sps:$4 sm:$0xff]  }
 0x285   : > { %3505 = vmatpush1.bf16.msra.mxu0 %v8377_v12  ;;  %v8457_v12 = vld [vmem:[%s10092_s29 + $0xfe4] ss:$48 sps:$4 sm:$0xff]  }
 0x286   : > { %3546 = vmatpush1.bf16.msra.mxu1 %v8380_v13  ;;  %3506 = vmatprep.subr.bf16.mxu0 %v8385_v14  ;;  %v8460_v13 = vld [vmem:[%s10092_s29 + $0x15e4] ss:$48 sps:$4 sm:$0xff]   ;;  %v8455_v14 = vld [vmem:[%s10092_s29 + $0xfe0] ss:$48 sps:$4 sm:$0xff]  }
 0x287   : > { %3547 = vmatprep.subr.bf16.mxu1 %v8388_v15  ;;  %v8458_v15 = vld [vmem:[%s10092_s29 + $0x15e0] ss:$48 sps:$4 sm:$0xff]  }
 0x289   : > { %3507 = vmatpush1.bf16.msra.mxu0 %v8383_v16  ;;  %v8463_v16 = vld [vmem:[%s10092_s29 + $0x1044] ss:$48 sps:$4 sm:$0xff]  }
 0x28a   : > { %3548 = vmatpush1.bf16.msra.mxu1 %v8386_v17  ;;  %3508 = vmatprep.subr.bf16.mxu0 %v8391_v18  ;;  %v8466_v17 = vld [vmem:[%s10092_s29 + $0x1644] ss:$48 sps:$4 sm:$0xff]   ;;  %v8461_v18 = vld [vmem:[%s10092_s29 + $0x1040] ss:$48 sps:$4 sm:$0xff]  }
 0x28b   : > { %3549 = vmatprep.subr.bf16.mxu1 %v8394_v19  ;;  %v8464_v19 = vld [vmem:[%s10092_s29 + $0x1640] ss:$48 sps:$4 sm:$0xff]  }
 0x28d   : > { %3509 = vmatpush1.bf16.msra.mxu0 %v8389_v20  ;;  %v8469_v20 = vld [vmem:[%s10092_s29 + $0x10a4] ss:$48 sps:$4 sm:$0xff]  }
 0x28e   : > { %3550 = vmatpush1.bf16.msra.mxu1 %v8392_v21  ;;  %3560 = vmatprep.subr.bf16.mxu0 %v8397_v22  ;;  %v8472_v21 = vld [vmem:[%s10092_s29 + $0x16a4] ss:$48 sps:$4 sm:$0xff]   ;;  %v8467_v22 = vld [vmem:[%s10092_s29 + $0x10a0] ss:$48 sps:$4 sm:$0xff]  }
 0x28f   : > { %3601 = vmatprep.subr.bf16.mxu1 %v8400_v23  ;;  %v8470_v23 = vld [vmem:[%s10092_s29 + $0x16a0] ss:$48 sps:$4 sm:$0xff]  }
 0x290   : > { %3511 = vmatmul.mubr.bf16.vlgmr.msra.gmra.mrb[12].mxu0 %v10313_v10 }
 0x291   : > { %3552 = vmatmul.mubr.bf16.vlgmr.msra.gmra.mrb[12].mxu1 %v10315_v11  ;;  %3561 = vmatpush1.bf16.msra.mxu0 %v8395_v24  ;;  %v8475_v24 = vld [vmem:[%s10092_s29 + $0x1104] ss:$48 sps:$4 sm:$0xff]  }
 0x292   : > { %3602 = vmatpush1.bf16.msra.mxu1 %v8398_v25  ;;  %3562 = vmatprep.subr.bf16.mxu0 %v8403_v26  ;;  %v8478_v25 = vld [vmem:[%s10092_s29 + $0x1704] ss:$48 sps:$4 sm:$0xff]   ;;  %v8473_v26 = vld [vmem:[%s10092_s29 + $0x1100] ss:$48 sps:$4 sm:$0xff]  }
 0x293   : > { %3603 = vmatprep.subr.bf16.mxu1 %v8406_v27  ;;  %3592 = vmatprep.mubr.bf16.mxu0 %v10286_v51  ;;  %v8476_v27 = vld [vmem:[%s10092_s29 + $0x1700] ss:$48 sps:$4 sm:$0xff]  }
 0x294   : > { %3633 = vmatprep.mubr.bf16.mxu1 %v10290_v54 }
 0x295   : > { %3563 = vmatpush1.bf16.msra.mxu0 %v8401_v28  ;;  %v8481_v28 = vld [vmem:[%s10092_s29 + $0x1164] ss:$48 sps:$4 sm:$0xff]  }
 0x296   : > { %3604 = vmatpush1.bf16.msra.mxu1 %v8404_v29  ;;  %3564 = vmatprep.subr.bf16.mxu0 %v8409_v30  ;;  %v8484_v29 = vld [vmem:[%s10092_s29 + $0x1764] ss:$48 sps:$4 sm:$0xff]   ;;  %v8479_v30 = vld [vmem:[%s10092_s29 + $0x1160] ss:$48 sps:$4 sm:$0xff]  }
 0x297   : > { %3605 = vmatprep.subr.bf16.mxu1 %v8412_v31  ;;  %v8482_v31 = vld [vmem:[%s10092_s29 + $0x1760] ss:$48 sps:$4 sm:$0xff]  }
 0x299   : > { %3565 = vmatpush1.bf16.msra.mxu0 %v8407_v32  ;;  %v8487_v32 = vld [vmem:[%s10092_s29 + $0x11c4] ss:$48 sps:$4 sm:$0xff]  }
 0x29a   : > { %3606 = vmatpush1.bf16.msra.mxu1 %v8410_v33  ;;  %3566 = vmatprep.subr.bf16.mxu0 %v8415_v34  ;;  %v8490_v33 = vld [vmem:[%s10092_s29 + $0x17c4] ss:$48 sps:$4 sm:$0xff]   ;;  %v8485_v34 = vld [vmem:[%s10092_s29 + $0x11c0] ss:$48 sps:$4 sm:$0xff]  }
 0x29b   : > { %3607 = vmatprep.subr.bf16.mxu1 %v8418_v35  ;;  %v8488_v35 = vld [vmem:[%s10092_s29 + $0x17c0] ss:$48 sps:$4 sm:$0xff]  }
 0x29d   : > { %3567 = vmatpush1.bf16.msra.mxu0 %v8413_v36  ;;  %v8493_v36 = vld [vmem:[%s10092_s29 + $0xc2c] ss:$48 sps:$4 sm:$0xff]  }
 0x29e   : > { %3608 = vmatpush1.bf16.msra.mxu1 %v8416_v37  ;;  %3568 = vmatprep.subr.bf16.mxu0 %v8421_v38  ;;  %v8496_v37 = vld [vmem:[%s10092_s29 + $0x122c] ss:$48 sps:$4 sm:$0xff]   ;;  %v8491_v38 = vld [vmem:[%s10092_s29 + $0xc28] ss:$48 sps:$4 sm:$0xff]  }
 0x29f   : > { %3609 = vmatprep.subr.bf16.mxu1 %v8424_v39  ;;  %v8494_v39 = vld [vmem:[%s10092_s29 + $0x1228] ss:$48 sps:$4 sm:$0xff]  }
 0x2a1   : > { %3569 = vmatpush1.bf16.msra.mxu0 %v8419_v40  ;;  %v8499_v40 = vld [vmem:[%s10092_s29 + $0xc8c] ss:$48 sps:$4 sm:$0xff]  }
 0x2a2   : > { %3610 = vmatpush1.bf16.msra.mxu1 %v8422_v41  ;;  %3570 = vmatprep.subr.bf16.mxu0 %v8427_v42  ;;  %v8502_v41 = vld [vmem:[%s10092_s29 + $0x128c] ss:$48 sps:$4 sm:$0xff]   ;;  %v8497_v42 = vld [vmem:[%s10092_s29 + $0xc88] ss:$48 sps:$4 sm:$0xff]  }
 0x2a3   : > { %3611 = vmatprep.subr.bf16.mxu1 %v8430_v43  ;;  %v3266_v48 = vpop.f32.mrb[0].mxu0  ;;  %v8500_v43 = vld [vmem:[%s10092_s29 + $0x1288] ss:$48 sps:$4 sm:$0xff]  }
 0x2a4   : > { %v3307_v49 = vpop.f32.mrb[0].mxu1  ;;  %v3268_v55 = vpop.f32.mrb[1].mxu0 }
 0x2a5   : > { %v10551_v53 = vadd.f32 %v3307_v49, %v3266_v48  ;;  %v3309_v56 = vpop.f32.mrb[1].mxu1  ;;  %v3270_v58 = vpop.f32.mrb[2].mxu0  ;;  %3571 = vmatpush1.bf16.msra.mxu0 %v8425_v44  ;;  %v8505_v44 = vld [vmem:[%s10092_s29 + $0xcec] ss:$48 sps:$4 sm:$0xff]  }
 0x2a6   : > { %v10553_v57 = vadd.f32 %v3309_v56, %v3268_v55  ;;  %v3311_v59 = vpop.f32.mrb[2].mxu1  ;;  %3612 = vmatpush1.bf16.msra.mxu1 %v8428_v45  ;;  %v3271_v60 = vpop.f32.mrb[3].mxu0  ;;  %3572 = vmatprep.subr.bf16.mxu0 %v8433_v46  ;;  %v8508_v45 = vld [vmem:[%s10092_s29 + $0x12ec] ss:$48 sps:$4 sm:$0xff]   ;;  %v8503_v46 = vld [vmem:[%s10092_s29 + $0xce8] ss:$48 sps:$4 sm:$0xff]  }
 0x2a7   : > { %v3312_v61 = vpop.f32.mrb[3].mxu1  ;;  %3613 = vmatprep.subr.bf16.mxu1 %v8436_v47  ;;  %v8506_v47 = vld [vmem:[%s10092_s29 + $0x12e8] ss:$48 sps:$4 sm:$0xff]   ;;  %v8511_v48 = vld [vmem:[%s10092_s29 + $0xd4c] ss:$48 sps:$4 sm:$0xff]  }
 0x2a8   : > { %v8514_v49 = vld [vmem:[%s10092_s29 + $0x134c] ss:$48 sps:$4 sm:$0xff]   ;;  %v8515_v55 = vld [vmem:[%s10092_s29 + $0xda8] ss:$48 sps:$4 sm:$0xff]  }
 0x2a9   : > { %3573 = vmatpush1.bf16.msra.mxu0 %v8431_v50  ;;  %v8512_v50 = vld [vmem:[%s10092_s29 + $0x1348] ss:$48 sps:$4 sm:$0xff]   ;;  %v8523_v58 = vld [vmem:[%s10092_s29 + $0xe0c] ss:$48 sps:$4 sm:$0xff]  }
 0x2aa   : > { %3614 = vmatpush1.bf16.msra.mxu1 %v8434_v52  ;;  %3574 = vmatprep.subr.bf16.mxu0 %v8439_v62  ;;  %v8520_v52 = vld [vmem:[%s10092_s29 + $0x13ac] ss:$48 sps:$4 sm:$0xff]   ;;  %v8518_v56 = vld [vmem:[%s10092_s29 + $0x13a8] ss:$48 sps:$4 sm:$0xff]  }
 0x2ab   : > { %3615 = vmatprep.subr.bf16.mxu1 %v8442_v63  ;;  %v8526_v59 = vld [vmem:[%s10092_s29 + $0x140c] ss:$48 sps:$4 sm:$0xff]   ;;  %v8521_v60 = vld [vmem:[%s10092_s29 + $0xe08] ss:$48 sps:$4 sm:$0xff]  }
 0x2ac   : > { %v8524_v61 = vld [vmem:[%s10092_s29 + $0x1408] ss:$48 sps:$4 sm:$0xff]   ;;  %v8529_v62 = vld [vmem:[%s10092_s29 + $0xe6c] ss:$48 sps:$4 sm:$0xff]  }
 0x2ad   : > { %3575 = vmatpush1.bf16.msra.mxu0 %v8437_v0  ;;  %v8532_v63 = vld [vmem:[%s10092_s29 + $0x146c] ss:$48 sps:$4 sm:$0xff]  }
 0x2ae   : > { %3616 = vmatpush1.bf16.msra.mxu1 %v8440_v1  ;;  %3576 = vmatprep.subr.bf16.mxu0 %v8445_v2  ;;  %v8527_v2 = vld [vmem:[%s10092_s29 + $0xe68] ss:$48 sps:$4 sm:$0xff]  }
 0x2af   : > { %3617 = vmatprep.subr.bf16.mxu1 %v8448_v3  ;;  %v8530_v3 = vld [vmem:[%s10092_s29 + $0x1468] ss:$48 sps:$4 sm:$0xff]  }
 0x2b1   : > { %3577 = vmatpush1.bf16.msra.mxu0 %v8443_v4 }
 0x2b2   : > { %3618 = vmatpush1.bf16.msra.mxu1 %v8446_v5  ;;  %3578 = vmatprep.subr.bf16.mxu0 %v8451_v6 }
 0x2b3   : > { %3619 = vmatprep.subr.bf16.mxu1 %v8454_v7 }
 0x2b5   : > { %3579 = vmatpush1.bf16.msra.mxu0 %v8449_v8 }
 0x2b6   : > { %3620 = vmatpush1.bf16.msra.mxu1 %v8452_v9  ;;  %3580 = vmatprep.subr.bf16.mxu0 %v8457_v12 }
 0x2b7   : > { %3621 = vmatprep.subr.bf16.mxu1 %v8460_v13 }
 0x2b9   : > { %3581 = vmatpush1.bf16.msra.mxu0 %v8455_v14  ;;  %v8535_v14 = vld [vmem:[%s10092_s29 + $0xecc] ss:$48 sps:$4 sm:$0xff]  }
 0x2ba   : > { %3622 = vmatpush1.bf16.msra.mxu1 %v8458_v15  ;;  %3582 = vmatprep.subr.bf16.mxu0 %v8463_v16  ;;  %v8538_v15 = vld [vmem:[%s10092_s29 + $0x14cc] ss:$48 sps:$4 sm:$0xff]   ;;  %v8533_v16 = vld [vmem:[%s10092_s29 + $0xec8] ss:$48 sps:$4 sm:$0xff]  }
 0x2bb   : > { %3623 = vmatprep.subr.bf16.mxu1 %v8466_v17  ;;  %v8536_v17 = vld [vmem:[%s10092_s29 + $0x14c8] ss:$48 sps:$4 sm:$0xff]  }
 0x2bd   : > { %3583 = vmatpush1.bf16.msra.mxu0 %v8461_v18  ;;  %v8541_v18 = vld [vmem:[%s10092_s29 + $0xf2c] ss:$48 sps:$4 sm:$0xff]  }
 0x2be   : > { %3624 = vmatpush1.bf16.msra.mxu1 %v8464_v19  ;;  %3584 = vmatprep.subr.bf16.mxu0 %v8469_v20  ;;  %v8544_v19 = vld [vmem:[%s10092_s29 + $0x152c] ss:$48 sps:$4 sm:$0xff]   ;;  %v8539_v20 = vld [vmem:[%s10092_s29 + $0xf28] ss:$48 sps:$4 sm:$0xff]  }
 0x2bf   : > { %3625 = vmatprep.subr.bf16.mxu1 %v8472_v21  ;;  %v8542_v21 = vld [vmem:[%s10092_s29 + $0x1528] ss:$48 sps:$4 sm:$0xff]  }
 0x2c1   : > { %3585 = vmatpush1.bf16.msra.mxu0 %v8467_v22  ;;  %v8547_v22 = vld [vmem:[%s10092_s29 + $0xf8c] ss:$48 sps:$4 sm:$0xff]  }
 0x2c2   : > { %3626 = vmatpush1.bf16.msra.mxu1 %v8470_v23  ;;  %3586 = vmatprep.subr.bf16.mxu0 %v8475_v24  ;;  %v8550_v23 = vld [vmem:[%s10092_s29 + $0x158c] ss:$48 sps:$4 sm:$0xff]   ;;  %v8545_v24 = vld [vmem:[%s10092_s29 + $0xf88] ss:$48 sps:$4 sm:$0xff]  }
 0x2c3   : > { %3627 = vmatprep.subr.bf16.mxu1 %v8478_v25  ;;  %v8548_v25 = vld [vmem:[%s10092_s29 + $0x1588] ss:$48 sps:$4 sm:$0xff]  }
 0x2c5   : > { %3587 = vmatpush1.bf16.msra.mxu0 %v8473_v26  ;;  %v8553_v26 = vld [vmem:[%s10092_s29 + $0xfec] ss:$48 sps:$4 sm:$0xff]  }
 0x2c6   : > { %3628 = vmatpush1.bf16.msra.mxu1 %v8476_v27  ;;  %3588 = vmatprep.subr.bf16.mxu0 %v8481_v28  ;;  %v8556_v27 = vld [vmem:[%s10092_s29 + $0x15ec] ss:$48 sps:$4 sm:$0xff]   ;;  %v8551_v28 = vld [vmem:[%s10092_s29 + $0xfe8] ss:$48 sps:$4 sm:$0xff]  }
 0x2c7   : > { %3629 = vmatprep.subr.bf16.mxu1 %v8484_v29  ;;  %v8554_v29 = vld [vmem:[%s10092_s29 + $0x15e8] ss:$48 sps:$4 sm:$0xff]  }
 0x2c9   : > { %3589 = vmatpush1.bf16.msra.mxu0 %v8479_v30  ;;  %v8559_v30 = vld [vmem:[%s10092_s29 + $0x104c] ss:$48 sps:$4 sm:$0xff]  }
 0x2ca   : > { %3630 = vmatpush1.bf16.msra.mxu1 %v8482_v31  ;;  %3590 = vmatprep.subr.bf16.mxu0 %v8487_v32  ;;  %v8562_v31 = vld [vmem:[%s10092_s29 + $0x164c] ss:$48 sps:$4 sm:$0xff]   ;;  %v8557_v32 = vld [vmem:[%s10092_s29 + $0x1048] ss:$48 sps:$4 sm:$0xff]  }
 0x2cb   : > { %3631 = vmatprep.subr.bf16.mxu1 %v8490_v33  ;;  %v8560_v33 = vld [vmem:[%s10092_s29 + $0x1648] ss:$48 sps:$4 sm:$0xff]  }
 0x2cd   : > { %3591 = vmatpush1.bf16.msra.mxu0 %v8485_v34  ;;  %v8565_v34 = vld [vmem:[%s10092_s29 + $0x10ac] ss:$48 sps:$4 sm:$0xff]  }
 0x2ce   : > { %3632 = vmatpush1.bf16.msra.mxu1 %v8488_v35  ;;  %3642 = vmatprep.subr.bf16.mxu0 %v8493_v36  ;;  %v8568_v35 = vld [vmem:[%s10092_s29 + $0x16ac] ss:$48 sps:$4 sm:$0xff]   ;;  %v8563_v36 = vld [vmem:[%s10092_s29 + $0x10a8] ss:$48 sps:$4 sm:$0xff]  }
 0x2cf   : > { %3683 = vmatprep.subr.bf16.mxu1 %v8496_v37  ;;  %v8566_v37 = vld [vmem:[%s10092_s29 + $0x16a8] ss:$48 sps:$4 sm:$0xff]  }
 0x2d0   : > { %3593 = vmatmul.mubr.bf16.vlgmr.msra.gmra.mrb[16].mxu0 %v10313_v10 }
 0x2d1   : > { %3634 = vmatmul.mubr.bf16.vlgmr.msra.gmra.mrb[16].mxu1 %v10315_v11  ;;  %3643 = vmatpush1.bf16.msra.mxu0 %v8491_v38  ;;  %v8571_v38 = vld [vmem:[%s10092_s29 + $0x110c] ss:$48 sps:$4 sm:$0xff]  }
 0x2d2   : > { %3684 = vmatpush1.bf16.msra.mxu1 %v8494_v39  ;;  %3644 = vmatprep.subr.bf16.mxu0 %v8499_v40  ;;  %v8574_v39 = vld [vmem:[%s10092_s29 + $0x170c] ss:$48 sps:$4 sm:$0xff]   ;;  %v8569_v40 = vld [vmem:[%s10092_s29 + $0x1108] ss:$48 sps:$4 sm:$0xff]  }
 0x2d3   : > { %3685 = vmatprep.subr.bf16.mxu1 %v8502_v41  ;;  %3674 = vmatprep.mubr.bf16.mxu0 %v10286_v51  ;;  %v8509_v51 = vld [vmem:[%s10092_s29 + $0xd48] ss:$48 sps:$4 sm:$0xff]  }
 0x2d4   : > { %3715 = vmatprep.mubr.bf16.mxu1 %v10290_v54  ;;  %v8517_v54 = vld [vmem:[%s10092_s29 + $0xdac] ss:$48 sps:$4 sm:$0xff]   ;;  %v8572_v41 = vld [vmem:[%s10092_s29 + $0x1708] ss:$48 sps:$4 sm:$0xff]  }
 0x2d5   : > { %3645 = vmatpush1.bf16.msra.mxu0 %v8497_v42  ;;  %v8577_v42 = vld [vmem:[%s10092_s29 + $0x116c] ss:$48 sps:$4 sm:$0xff]  }
 0x2d6   : > { %3686 = vmatpush1.bf16.msra.mxu1 %v8500_v43  ;;  %3646 = vmatprep.subr.bf16.mxu0 %v8505_v44  ;;  %v8580_v43 = vld [vmem:[%s10092_s29 + $0x176c] ss:$48 sps:$4 sm:$0xff]   ;;  %v8575_v44 = vld [vmem:[%s10092_s29 + $0x1168] ss:$48 sps:$4 sm:$0xff]  }
 0x2d7   : > { %3687 = vmatprep.subr.bf16.mxu1 %v8508_v45  ;;  %v8578_v45 = vld [vmem:[%s10092_s29 + $0x1768] ss:$48 sps:$4 sm:$0xff]  }
 0x2d9   : > { %3647 = vmatpush1.bf16.msra.mxu0 %v8503_v46  ;;  %v8583_v46 = vld [vmem:[%s10092_s29 + $0x11cc] ss:$48 sps:$4 sm:$0xff]  }
 0x2da   : > { %3688 = vmatpush1.bf16.msra.mxu1 %v8506_v47  ;;  %3648 = vmatprep.subr.bf16.mxu0 %v8511_v48  ;;  %v8586_v47 = vld [vmem:[%s10092_s29 + $0x17cc] ss:$48 sps:$4 sm:$0xff]   ;;  %v8581_v48 = vld [vmem:[%s10092_s29 + $0x11c8] ss:$48 sps:$4 sm:$0xff]  }
 0x2db   : > { %3689 = vmatprep.subr.bf16.mxu1 %v8514_v49  ;;  %v8584_v49 = vld [vmem:[%s10092_s29 + $0x17c8] ss:$48 sps:$4 sm:$0xff]  }
 0x2dd   : > { %3649 = vmatpush1.bf16.msra.mxu0 %v8509_v51  ;;  %v8589_v51 = vld [vmem:[%s10092_s29 + $0x4] ss:$48 sps:$4 sm:$0xff]  }
 0x2de   : > { %3690 = vmatpush1.bf16.msra.mxu1 %v8512_v50  ;;  %3650 = vmatprep.subr.bf16.mxu0 %v8517_v54  ;;  %v8592_v50 = vld [vmem:[%s10092_s29 + $0x604] ss:$48 sps:$4 sm:$0xff]  }
 0x2df   : > { %3691 = vmatprep.subr.bf16.mxu1 %v8520_v52  ;;  %v529_v54 = vld [vmem:[#allocation2 + $0x8] sm:$0xff]  ;;  %v531_v52 = vld [vmem:[#allocation2 + $0x18] sm:$0xff] }
 0x2e1   : > { %3651 = vmatpush1.bf16.msra.mxu0 %v8515_v55  ;;  %v8587_v55 = vld [vmem:[%s10092_s29] ss:$48 sps:$4 sm:$0xff]  }
 0x2e2   : > { %3692 = vmatpush1.bf16.msra.mxu1 %v8518_v56  ;;  %3652 = vmatprep.subr.bf16.mxu0 %v8523_v58  ;;  %v8590_v56 = vld [vmem:[%s10092_s29 + $0x600] ss:$48 sps:$4 sm:$0xff]   ;;  %v8595_v58 = vld [vmem:[%s10092_s29 + $0x64] ss:$48 sps:$4 sm:$0xff]  }
 0x2e3   : > { %3693 = vmatprep.subr.bf16.mxu1 %v8526_v59  ;;  %v3348_v0 = vpop.f32.mrb[4].mxu0  ;;  %v8598_v59 = vld [vmem:[%s10092_s29 + $0x664] ss:$48 sps:$4 sm:$0xff]  }
 0x2e4   : > { %v3389_v1 = vpop.f32.mrb[4].mxu1  ;;  %v3350_v5 = vpop.f32.mrb[5].mxu0 }
 0x2e5   : > { %v10623_v4 = vadd.f32 %v3389_v1, %v3348_v0  ;;  %v3391_v6 = vpop.f32.mrb[5].mxu1  ;;  %v3352_v8 = vpop.f32.mrb[6].mxu0  ;;  %3653 = vmatpush1.bf16.msra.mxu0 %v8521_v60  ;;  %v10669_v60 = vpack.c.bf16 %v529_v54, %v529_v54  ;;  %v8601_v0 = vld [vmem:[%s10092_s29 + $0xc4] ss:$48 sps:$4 sm:$0xff]  }
 0x2e6   : > { %v10625_v7 = vadd.f32 %v3391_v6, %v3350_v5  ;;  %v3393_v9 = vpop.f32.mrb[6].mxu1  ;;  %3694 = vmatpush1.bf16.msra.mxu1 %v8524_v61  ;;  %v3353_v12 = vpop.f32.mrb[7].mxu0  ;;  %3654 = vmatprep.subr.bf16.mxu0 %v8529_v62  ;;  %v10671_v61 = vpack.c.bf16 %v531_v52, %v531_v52  ;;  %v8593_v62 = vld [vmem:[%s10092_s29 + $0x60] ss:$48 sps:$4 sm:$0xff]   ;;  %v8604_v1 = vld [vmem:[%s10092_s29 + $0x6c4] ss:$48 sps:$4 sm:$0xff]  }
 0x2e7   : > { %v3394_v13 = vpop.f32.mrb[7].mxu1  ;;  %3695 = vmatprep.subr.bf16.mxu1 %v8532_v63  ;;  %v8596_v63 = vld [vmem:[%s10092_s29 + $0x660] ss:$48 sps:$4 sm:$0xff]   ;;  %v8613_v8 = vld [vmem:[%s10092_s29 + $0x184] ss:$48 sps:$4 sm:$0xff]  }
 0x2e8   : > { %v8605_v5 = vld [vmem:[%s10092_s29 + $0x120] ss:$48 sps:$4 sm:$0xff]   ;;  %v8616_v9 = vld [vmem:[%s10092_s29 + $0x784] ss:$48 sps:$4 sm:$0xff]  }
 0x2e9   : > { %3655 = vmatpush1.bf16.msra.mxu0 %v8527_v2  ;;  %v8607_v2 = vld [vmem:[%s10092_s29 + $0x124] ss:$48 sps:$4 sm:$0xff]   ;;  %v8608_v6 = vld [vmem:[%s10092_s29 + $0x720] ss:$48 sps:$4 sm:$0xff]  }
 0x2ea   : > { %3696 = vmatpush1.bf16.msra.mxu1 %v8530_v3  ;;  %3656 = vmatprep.subr.bf16.mxu0 %v8535_v14  ;;  %v8610_v3 = vld [vmem:[%s10092_s29 + $0x724] ss:$48 sps:$4 sm:$0xff]   ;;  %v8611_v12 = vld [vmem:[%s10092_s29 + $0x180] ss:$48 sps:$4 sm:$0xff]  }
 0x2eb   : > { %3697 = vmatprep.subr.bf16.mxu1 %v8538_v15  ;;  %v8614_v13 = vld [vmem:[%s10092_s29 + $0x780] ss:$48 sps:$4 sm:$0xff]   ;;  %v8619_v14 = vld [vmem:[%s10092_s29 + $0x1e4] ss:$48 sps:$4 sm:$0xff]  }
 0x2ec   : > { %v8622_v15 = vld [vmem:[%s10092_s29 + $0x7e4] ss:$48 sps:$4 sm:$0xff]  }
 0x2ed   : > { %3657 = vmatpush1.bf16.msra.mxu0 %v8533_v16  ;;  %v8617_v16 = vld [vmem:[%s10092_s29 + $0x1e0] ss:$48 sps:$4 sm:$0xff]   ;;  %v8661_v54 = vld [vmem:[%s10092_s29 + $0x484] ss:$48 sps:$4 sm:$0xff]  }
 0x2ee   : > { %3698 = vmatpush1.bf16.msra.mxu1 %v8536_v17  ;;  %3658 = vmatprep.subr.bf16.mxu0 %v8541_v18  ;;  %v8620_v17 = vld [vmem:[%s10092_s29 + $0x7e0] ss:$48 sps:$4 sm:$0xff]   ;;  %v8625_v18 = vld [vmem:[%s10092_s29 + $0x244] ss:$48 sps:$4 sm:$0xff]  }
 0x2ef   : > { %3699 = vmatprep.subr.bf16.mxu1 %v8544_v19  ;;  %v8628_v19 = vld [vmem:[%s10092_s29 + $0x844] ss:$48 sps:$4 sm:$0xff]  }
 0x2f0   : > { %v8664_v52 = vld [vmem:[%s10092_s29 + $0xa84] ss:$48 sps:$4 sm:$0xff]  }
 0x2f1   : > { %3659 = vmatpush1.bf16.msra.mxu0 %v8539_v20 }
 0x2f2   : > { %3700 = vmatpush1.bf16.msra.mxu1 %v8542_v21  ;;  %3660 = vmatprep.subr.bf16.mxu0 %v8547_v22  ;;  %v8623_v22 = vld [vmem:[%s10092_s29 + $0x240] ss:$48 sps:$4 sm:$0xff]  }
 0x2f3   : > { %3701 = vmatprep.subr.bf16.mxu1 %v8550_v23  ;;  %v8626_v23 = vld [vmem:[%s10092_s29 + $0x840] ss:$48 sps:$4 sm:$0xff]  }
 0x2f5   : > { %3661 = vmatpush1.bf16.msra.mxu0 %v8545_v24 }
 0x2f6   : > { %3702 = vmatpush1.bf16.msra.mxu1 %v8548_v25  ;;  %3662 = vmatprep.subr.bf16.mxu0 %v8553_v26 }
 0x2f7   : > { %3703 = vmatprep.subr.bf16.mxu1 %v8556_v27 }
 0x2f9   : > { %3663 = vmatpush1.bf16.msra.mxu0 %v8551_v28 }
 0x2fa   : > { %3704 = vmatpush1.bf16.msra.mxu1 %v8554_v29  ;;  %3664 = vmatprep.subr.bf16.mxu0 %v8559_v30 }
 0x2fb   : > { %3705 = vmatprep.subr.bf16.mxu1 %v8562_v31 }
 0x2fd   : > { %3665 = vmatpush1.bf16.msra.mxu0 %v8557_v32  ;;  %v8631_v32 = vld [vmem:[%s10092_s29 + $0x2a4] ss:$48 sps:$4 sm:$0xff]  }
 0x2fe   : > { %3706 = vmatpush1.bf16.msra.mxu1 %v8560_v33  ;;  %3666 = vmatprep.subr.bf16.mxu0 %v8565_v34  ;;  %v8634_v33 = vld [vmem:[%s10092_s29 + $0x8a4] ss:$48 sps:$4 sm:$0xff]   ;;  %v8629_v34 = vld [vmem:[%s10092_s29 + $0x2a0] ss:$48 sps:$4 sm:$0xff]  }
 0x2ff   : > { %3707 = vmatprep.subr.bf16.mxu1 %v8568_v35  ;;  %v8632_v35 = vld [vmem:[%s10092_s29 + $0x8a0] ss:$48 sps:$4 sm:$0xff]  }
 0x301   : > { %3667 = vmatpush1.bf16.msra.mxu0 %v8563_v36  ;;  %v8637_v36 = vld [vmem:[%s10092_s29 + $0x304] ss:$48 sps:$4 sm:$0xff]  }
 0x302   : > { %3708 = vmatpush1.bf16.msra.mxu1 %v8566_v37  ;;  %3668 = vmatprep.subr.bf16.mxu0 %v8571_v38  ;;  %v8640_v37 = vld [vmem:[%s10092_s29 + $0x904] ss:$48 sps:$4 sm:$0xff]   ;;  %v8635_v38 = vld [vmem:[%s10092_s29 + $0x300] ss:$48 sps:$4 sm:$0xff]  }
 0x303   : > { %3709 = vmatprep.subr.bf16.mxu1 %v8574_v39  ;;  %v8638_v39 = vld [vmem:[%s10092_s29 + $0x900] ss:$48 sps:$4 sm:$0xff]  }
 0x305   : > { %3669 = vmatpush1.bf16.msra.mxu0 %v8569_v40  ;;  %v8643_v40 = vld [vmem:[%s10092_s29 + $0x364] ss:$48 sps:$4 sm:$0xff]  }
 0x306   : > { %3710 = vmatpush1.bf16.msra.mxu1 %v8572_v41  ;;  %3670 = vmatprep.subr.bf16.mxu0 %v8577_v42  ;;  %v8646_v41 = vld [vmem:[%s10092_s29 + $0x964] ss:$48 sps:$4 sm:$0xff]   ;;  %v8641_v42 = vld [vmem:[%s10092_s29 + $0x360] ss:$48 sps:$4 sm:$0xff]  }
 0x307   : > { %3711 = vmatprep.subr.bf16.mxu1 %v8580_v43  ;;  %v8644_v43 = vld [vmem:[%s10092_s29 + $0x960] ss:$48 sps:$4 sm:$0xff]  }
 0x309   : > { %3671 = vmatpush1.bf16.msra.mxu0 %v8575_v44  ;;  %v8649_v44 = vld [vmem:[%s10092_s29 + $0x3c4] ss:$48 sps:$4 sm:$0xff]  }
 0x30a   : > { %3712 = vmatpush1.bf16.msra.mxu1 %v8578_v45  ;;  %3672 = vmatprep.subr.bf16.mxu0 %v8583_v46  ;;  %v8652_v45 = vld [vmem:[%s10092_s29 + $0x9c4] ss:$48 sps:$4 sm:$0xff]   ;;  %v8647_v46 = vld [vmem:[%s10092_s29 + $0x3c0] ss:$48 sps:$4 sm:$0xff]  }
 0x30b   : > { %3713 = vmatprep.subr.bf16.mxu1 %v8586_v47  ;;  %v8650_v47 = vld [vmem:[%s10092_s29 + $0x9c0] ss:$48 sps:$4 sm:$0xff]  }
 0x30d   : > { %3673 = vmatpush1.bf16.msra.mxu0 %v8581_v48  ;;  %v8655_v48 = vld [vmem:[%s10092_s29 + $0x424] ss:$48 sps:$4 sm:$0xff]  }
 0x30e   : > { %3714 = vmatpush1.bf16.msra.mxu1 %v8584_v49  ;;  %5644 = vmatprep.subr.bf16.mxu0 %v8589_v51  ;;  %v8658_v49 = vld [vmem:[%s10092_s29 + $0xa24] ss:$48 sps:$4 sm:$0xff]   ;;  %v8653_v51 = vld [vmem:[%s10092_s29 + $0x420] ss:$48 sps:$4 sm:$0xff]  }
 0x30f   : > { %5685 = vmatprep.subr.bf16.mxu1 %v8592_v50  ;;  %v8656_v50 = vld [vmem:[%s10092_s29 + $0xa20] ss:$48 sps:$4 sm:$0xff]  }
 0x310   : > { %3675 = vmatmul.mubr.bf16.vlgmr.msra.gmra.mrb[20].mxu0 %v10313_v10  ;;  %v8599_v10 = vld [vmem:[%s10092_s29 + $0xc0] ss:$48 sps:$4 sm:$0xff]  }
 0x311   : > { %3716 = vmatmul.mubr.bf16.vlgmr.msra.gmra.mrb[20].mxu1 %v10315_v11  ;;  %5645 = vmatpush1.bf16.msra.mxu0 %v8587_v55  ;;  %v8602_v11 = vld [vmem:[%s10092_s29 + $0x6c0] ss:$48 sps:$4 sm:$0xff]  }
 0x312   : > { %5686 = vmatpush1.bf16.msra.mxu1 %v8590_v56  ;;  %5646 = vmatprep.subr.bf16.mxu0 %v8595_v58  ;;  %v8659_v55 = vld [vmem:[%s10092_s29 + $0x480] ss:$48 sps:$4 sm:$0xff]   ;;  %v8667_v58 = vld [vmem:[%s10092_s29 + $0x4e4] ss:$48 sps:$4 sm:$0xff]  }
 0x313   : > { %5687 = vmatprep.subr.bf16.mxu1 %v8598_v59  ;;  %5676 = vmatprep.mubr.bf16.mxu0 %v10669_v60  ;;  %v8662_v56 = vld [vmem:[%s10092_s29 + $0xa80] ss:$48 sps:$4 sm:$0xff]   ;;  %v8670_v59 = vld [vmem:[%s10092_s29 + $0xae4] ss:$48 sps:$4 sm:$0xff]  }
 0x314   : > { %5717 = vmatprep.mubr.bf16.mxu1 %v10671_v61 }
 0x315   : > { %5647 = vmatpush1.bf16.msra.mxu0 %v8593_v62  ;;  %v8665_v62 = vld [vmem:[%s10092_s29 + $0x4e0] ss:$48 sps:$4 sm:$0xff]  }
 0x316   : > { %5688 = vmatpush1.bf16.msra.mxu1 %v8596_v63  ;;  %5648 = vmatprep.subr.bf16.mxu0 %v8601_v0  ;;  %v8668_v63 = vld [vmem:[%s10092_s29 + $0xae0] ss:$48 sps:$4 sm:$0xff]   ;;  %v8673_v0 = vld [vmem:[%s10092_s29 + $0x544] ss:$48 sps:$4 sm:$0xff]  }
 0x317   : > { %5689 = vmatprep.subr.bf16.mxu1 %v8604_v1  ;;  %v8676_v1 = vld [vmem:[%s10092_s29 + $0xb44] ss:$48 sps:$4 sm:$0xff]  }
 0x319   : > { %5649 = vmatpush1.bf16.msra.mxu0 %v8599_v10  ;;  %v8671_v10 = vld [vmem:[%s10092_s29 + $0x540] ss:$48 sps:$4 sm:$0xff]  }
 0x31a   : > { %5690 = vmatpush1.bf16.msra.mxu1 %v8602_v11  ;;  %5650 = vmatprep.subr.bf16.mxu0 %v8607_v2  ;;  %v8674_v11 = vld [vmem:[%s10092_s29 + $0xb40] ss:$48 sps:$4 sm:$0xff]   ;;  %v8679_v2 = vld [vmem:[%s10092_s29 + $0x5a4] ss:$48 sps:$4 sm:$0xff]  }
 0x31b   : > { %5691 = vmatprep.subr.bf16.mxu1 %v8610_v3  ;;  %v8682_v3 = vld [vmem:[%s10092_s29 + $0xba4] ss:$48 sps:$4 sm:$0xff]  }
 0x31d   : > { %5651 = vmatpush1.bf16.msra.mxu0 %v8605_v5  ;;  %v8677_v5 = vld [vmem:[%s10092_s29 + $0x5a0] ss:$48 sps:$4 sm:$0xff]  }
 0x31e   : > { %5692 = vmatpush1.bf16.msra.mxu1 %v8608_v6  ;;  %5652 = vmatprep.subr.bf16.mxu0 %v8613_v8  ;;  %v8680_v6 = vld [vmem:[%s10092_s29 + $0xba0] ss:$48 sps:$4 sm:$0xff]   ;;  %v528_v8 = vld [vmem:[#allocation2] sm:$0xff] }
 0x31f   : > { %5693 = vmatprep.subr.bf16.mxu1 %v8616_v9  ;;  %v530_v9 = vld [vmem:[#allocation2 + $0x10] sm:$0xff] }
 0x321   : > { %5653 = vmatpush1.bf16.msra.mxu0 %v8611_v12  ;;  %v8685_v12 = vld [vmem:[%s10092_s29 + $0xc] ss:$48 sps:$4 sm:$0xff]  }
 0x322   : > { %5694 = vmatpush1.bf16.msra.mxu1 %v8614_v13  ;;  %5654 = vmatprep.subr.bf16.mxu0 %v8619_v14  ;;  %v8688_v13 = vld [vmem:[%s10092_s29 + $0x60c] ss:$48 sps:$4 sm:$0xff]   ;;  %v8683_v14 = vld [vmem:[%s10092_s29 + $0x8] ss:$48 sps:$4 sm:$0xff]  }
 0x323   : > { %5695 = vmatprep.subr.bf16.mxu1 %v8622_v15  ;;  %v3430_v20 = vpop.f32.mrb[8].mxu0  ;;  %v8686_v15 = vld [vmem:[%s10092_s29 + $0x608] ss:$48 sps:$4 sm:$0xff]  }
 0x324   : > { %v3471_v21 = vpop.f32.mrb[8].mxu1  ;;  %v3432_v25 = vpop.f32.mrb[9].mxu0 }
 0x325   : > { %v10699_v24 = vadd.f32 %v3471_v21, %v3430_v20  ;;  %v3473_v26 = vpop.f32.mrb[9].mxu1  ;;  %v3434_v28 = vpop.f32.mrb[10].mxu0  ;;  %5655 = vmatpush1.bf16.msra.mxu0 %v8617_v16  ;;  %v10743_v16 = vpack.c.bf16 %v528_v8, %v528_v8  ;;  %v8689_v20 = vld [vmem:[%s10092_s29 + $0x68] ss:$48 sps:$4 sm:$0xff]  }
 0x326   : > { %v10701_v27 = vadd.f32 %v3473_v26, %v3432_v25  ;;  %v3475_v29 = vpop.f32.mrb[10].mxu1  ;;  %5696 = vmatpush1.bf16.msra.mxu1 %v8620_v17  ;;  %v3435_v30 = vpop.f32.mrb[11].mxu0  ;;  %5656 = vmatprep.subr.bf16.mxu0 %v8625_v18  ;;  %v10745_v17 = vpack.c.bf16 %v530_v9, %v530_v9  ;;  %v8691_v18 = vld [vmem:[%s10092_s29 + $0x6c] ss:$48 sps:$4 sm:$0xff]   ;;  %v8692_v21 = vld [vmem:[%s10092_s29 + $0x668] ss:$48 sps:$4 sm:$0xff]  }
 0x327   : > { %v3476_v31 = vpop.f32.mrb[11].mxu1  ;;  %5697 = vmatprep.subr.bf16.mxu1 %v8628_v19  ;;  %v8694_v19 = vld [vmem:[%s10092_s29 + $0x66c] ss:$48 sps:$4 sm:$0xff]   ;;  %v8695_v25 = vld [vmem:[%s10092_s29 + $0xc8] ss:$48 sps:$4 sm:$0xff]  }
 0x328   : > { %v8698_v26 = vld [vmem:[%s10092_s29 + $0x6c8] ss:$48 sps:$4 sm:$0xff]   ;;  %v8703_v28 = vld [vmem:[%s10092_s29 + $0x12c] ss:$48 sps:$4 sm:$0xff]  }
 0x329   : > { %5657 = vmatpush1.bf16.msra.mxu0 %v8623_v22  ;;  %v8697_v22 = vld [vmem:[%s10092_s29 + $0xcc] ss:$48 sps:$4 sm:$0xff]   ;;  %v8701_v30 = vld [vmem:[%s10092_s29 + $0x128] ss:$48 sps:$4 sm:$0xff]  }
 0x32a   : > { %5698 = vmatpush1.bf16.msra.mxu1 %v8626_v23  ;;  %5658 = vmatprep.subr.bf16.mxu0 %v8631_v32  ;;  %v8700_v23 = vld [vmem:[%s10092_s29 + $0x6cc] ss:$48 sps:$4 sm:$0xff]   ;;  %v8704_v31 = vld [vmem:[%s10092_s29 + $0x728] ss:$48 sps:$4 sm:$0xff]  }
 0x32b   : > { %5699 = vmatprep.subr.bf16.mxu1 %v8634_v33  ;;  %v8706_v29 = vld [vmem:[%s10092_s29 + $0x72c] ss:$48 sps:$4 sm:$0xff]   ;;  %v8743_v8 = vld [vmem:[%s10092_s29 + $0x3c8] ss:$48 sps:$4 sm:$0xff]  }
 0x32c   : > { %v8709_v32 = vld [vmem:[%s10092_s29 + $0x18c] ss:$48 sps:$4 sm:$0xff]   ;;  %v8746_v9 = vld [vmem:[%s10092_s29 + $0x9c8] ss:$48 sps:$4 sm:$0xff]  }
 0x32d   : > { %5659 = vmatpush1.bf16.msra.mxu0 %v8629_v34  ;;  %v8712_v33 = vld [vmem:[%s10092_s29 + $0x78c] ss:$48 sps:$4 sm:$0xff]   ;;  %v8707_v34 = vld [vmem:[%s10092_s29 + $0x188] ss:$48 sps:$4 sm:$0xff]  }
 0x32e   : > { %5700 = vmatpush1.bf16.msra.mxu1 %v8632_v35  ;;  %5660 = vmatprep.subr.bf16.mxu0 %v8637_v36  ;;  %v8710_v35 = vld [vmem:[%s10092_s29 + $0x788] ss:$48 sps:$4 sm:$0xff]   ;;  %v8715_v36 = vld [vmem:[%s10092_s29 + $0x1ec] ss:$48 sps:$4 sm:$0xff]  }
 0x32f   : > { %5701 = vmatprep.subr.bf16.mxu1 %v8640_v37  ;;  %v8718_v37 = vld [vmem:[%s10092_s29 + $0x7ec] ss:$48 sps:$4 sm:$0xff]  }
 0x331   : > { %5661 = vmatpush1.bf16.msra.mxu0 %v8635_v38  ;;  %v8713_v38 = vld [vmem:[%s10092_s29 + $0x1e8] ss:$48 sps:$4 sm:$0xff]  }
 0x332   : > { %5702 = vmatpush1.bf16.msra.mxu1 %v8638_v39  ;;  %5662 = vmatprep.subr.bf16.mxu0 %v8643_v40  ;;  %v8716_v39 = vld [vmem:[%s10092_s29 + $0x7e8] ss:$48 sps:$4 sm:$0xff]   ;;  %v8721_v40 = vld [vmem:[%s10092_s29 + $0x24c] ss:$48 sps:$4 sm:$0xff]  }
 0x333   : > { %5703 = vmatprep.subr.bf16.mxu1 %v8646_v41  ;;  %v8724_v41 = vld [vmem:[%s10092_s29 + $0x84c] ss:$48 sps:$4 sm:$0xff]  }
 0x335   : > { %5663 = vmatpush1.bf16.msra.mxu0 %v8641_v42 }
 0x336   : > { %5704 = vmatpush1.bf16.msra.mxu1 %v8644_v43  ;;  %5664 = vmatprep.subr.bf16.mxu0 %v8649_v44 }
 0x337   : > { %5705 = vmatprep.subr.bf16.mxu1 %v8652_v45 }
 0x339   : > { %5665 = vmatpush1.bf16.msra.mxu0 %v8647_v46 }
 0x33a   : > { %5706 = vmatpush1.bf16.msra.mxu1 %v8650_v47  ;;  %5666 = vmatprep.subr.bf16.mxu0 %v8655_v48 }
 0x33b   : > { %5707 = vmatprep.subr.bf16.mxu1 %v8658_v49 }
 0x33d   : > { %5667 = vmatpush1.bf16.msra.mxu0 %v8653_v51  ;;  %v8719_v51 = vld [vmem:[%s10092_s29 + $0x248] ss:$48 sps:$4 sm:$0xff]  }
 0x33e   : > { %5708 = vmatpush1.bf16.msra.mxu1 %v8656_v50  ;;  %5668 = vmatprep.subr.bf16.mxu0 %v8661_v54  ;;  %v8722_v50 = vld [vmem:[%s10092_s29 + $0x848] ss:$48 sps:$4 sm:$0xff]  }
 0x33f   : > { %5709 = vmatprep.subr.bf16.mxu1 %v8664_v52 }
 0x341   : > { %5669 = vmatpush1.bf16.msra.mxu0 %v8659_v55  ;;  %v8727_v55 = vld [vmem:[%s10092_s29 + $0x2ac] ss:$48 sps:$4 sm:$0xff]  }
 0x342   : > { %5710 = vmatpush1.bf16.msra.mxu1 %v8662_v56  ;;  %5670 = vmatprep.subr.bf16.mxu0 %v8667_v58  ;;  %v8730_v56 = vld [vmem:[%s10092_s29 + $0x8ac] ss:$48 sps:$4 sm:$0xff]   ;;  %v8725_v58 = vld [vmem:[%s10092_s29 + $0x2a8] ss:$48 sps:$4 sm:$0xff]  }
 0x343   : > { %5711 = vmatprep.subr.bf16.mxu1 %v8670_v59  ;;  %v8728_v59 = vld [vmem:[%s10092_s29 + $0x8a8] ss:$48 sps:$4 sm:$0xff]  }
 0x345   : > { %5671 = vmatpush1.bf16.msra.mxu0 %v8665_v62  ;;  %v8733_v62 = vld [vmem:[%s10092_s29 + $0x30c] ss:$48 sps:$4 sm:$0xff]  }
 0x346   : > { %5712 = vmatpush1.bf16.msra.mxu1 %v8668_v63  ;;  %5672 = vmatprep.subr.bf16.mxu0 %v8673_v0  ;;  %v8736_v63 = vld [vmem:[%s10092_s29 + $0x90c] ss:$48 sps:$4 sm:$0xff]   ;;  %v8731_v0 = vld [vmem:[%s10092_s29 + $0x308] ss:$48 sps:$4 sm:$0xff]  }
 0x347   : > { %5713 = vmatprep.subr.bf16.mxu1 %v8676_v1  ;;  %v8734_v1 = vld [vmem:[%s10092_s29 + $0x908] ss:$48 sps:$4 sm:$0xff]  }
 0x349   : > { %5673 = vmatpush1.bf16.msra.mxu0 %v8671_v10  ;;  %v8739_v10 = vld [vmem:[%s10092_s29 + $0x36c] ss:$48 sps:$4 sm:$0xff]  }
 0x34a   : > { %5714 = vmatpush1.bf16.msra.mxu1 %v8674_v11  ;;  %5674 = vmatprep.subr.bf16.mxu0 %v8679_v2  ;;  %v8742_v11 = vld [vmem:[%s10092_s29 + $0x96c] ss:$48 sps:$4 sm:$0xff]   ;;  %v8737_v2 = vld [vmem:[%s10092_s29 + $0x368] ss:$48 sps:$4 sm:$0xff]  }
 0x34b   : > { %5715 = vmatprep.subr.bf16.mxu1 %v8682_v3  ;;  %v8740_v3 = vld [vmem:[%s10092_s29 + $0x968] ss:$48 sps:$4 sm:$0xff]  }
 0x34d   : > { %5675 = vmatpush1.bf16.msra.mxu0 %v8677_v5  ;;  %v8745_v5 = vld [vmem:[%s10092_s29 + $0x3cc] ss:$48 sps:$4 sm:$0xff]  }
 0x34e   : > { %5716 = vmatpush1.bf16.msra.mxu1 %v8680_v6  ;;  %5726 = vmatprep.subr.bf16.mxu0 %v8685_v12  ;;  %v8748_v6 = vld [vmem:[%s10092_s29 + $0x9cc] ss:$48 sps:$4 sm:$0xff]  }
 0x34f   : > { %5767 = vmatprep.subr.bf16.mxu1 %v8688_v13  ;;  %v8751_v12 = vld [vmem:[%s10092_s29 + $0x42c] ss:$48 sps:$4 sm:$0xff]  }
 0x350   : > { %5677 = vmatmul.mubr.bf16.vlgmr.msra.gmra.mrb[24].mxu0 %v10743_v16  ;;  %v8754_v13 = vld [vmem:[%s10092_s29 + $0xa2c] ss:$48 sps:$4 sm:$0xff]  }
 0x351   : > { %5718 = vmatmul.mubr.bf16.vlgmr.msra.gmra.mrb[24].mxu1 %v10745_v17  ;;  %5727 = vmatpush1.bf16.msra.mxu0 %v8683_v14  ;;  %v8749_v14 = vld [vmem:[%s10092_s29 + $0x428] ss:$48 sps:$4 sm:$0xff]  }
 0x352   : > { %5768 = vmatpush1.bf16.msra.mxu1 %v8686_v15  ;;  %5728 = vmatprep.subr.bf16.mxu0 %v8691_v18  ;;  %v8752_v15 = vld [vmem:[%s10092_s29 + $0xa28] ss:$48 sps:$4 sm:$0xff]   ;;  %v8757_v18 = vld [vmem:[%s10092_s29 + $0x48c] ss:$48 sps:$4 sm:$0xff]  }
 0x353   : > { %5769 = vmatprep.subr.bf16.mxu1 %v8694_v19  ;;  %5758 = vmatprep.mubr.bf16.mxu0 %v10669_v60  ;;  %v8760_v19 = vld [vmem:[%s10092_s29 + $0xa8c] ss:$48 sps:$4 sm:$0xff]  }
 0x354   : > { %5799 = vmatprep.mubr.bf16.mxu1 %v10671_v61 }
 0x355   : > { %5729 = vmatpush1.bf16.msra.mxu0 %v8689_v20  ;;  %v8755_v20 = vld [vmem:[%s10092_s29 + $0x488] ss:$48 sps:$4 sm:$0xff]  }
 0x356   : > { %5770 = vmatpush1.bf16.msra.mxu1 %v8692_v21  ;;  %5730 = vmatprep.subr.bf16.mxu0 %v8697_v22  ;;  %v8758_v21 = vld [vmem:[%s10092_s29 + $0xa88] ss:$48 sps:$4 sm:$0xff]   ;;  %v8763_v22 = vld [vmem:[%s10092_s29 + $0x4ec] ss:$48 sps:$4 sm:$0xff]  }
 0x357   : > { %5771 = vmatprep.subr.bf16.mxu1 %v8700_v23  ;;  %v8766_v23 = vld [vmem:[%s10092_s29 + $0xaec] ss:$48 sps:$4 sm:$0xff]  }
 0x359   : > { %5731 = vmatpush1.bf16.msra.mxu0 %v8695_v25  ;;  %v8761_v25 = vld [vmem:[%s10092_s29 + $0x4e8] ss:$48 sps:$4 sm:$0xff]  }
 0x35a   : > { %5772 = vmatpush1.bf16.msra.mxu1 %v8698_v26  ;;  %5732 = vmatprep.subr.bf16.mxu0 %v8703_v28  ;;  %v8764_v26 = vld [vmem:[%s10092_s29 + $0xae8] ss:$48 sps:$4 sm:$0xff]   ;;  %v8769_v28 = vld [vmem:[%s10092_s29 + $0x54c] ss:$48 sps:$4 sm:$0xff]  }
 0x35b   : > { %5773 = vmatprep.subr.bf16.mxu1 %v8706_v29  ;;  %v8772_v29 = vld [vmem:[%s10092_s29 + $0xb4c] ss:$48 sps:$4 sm:$0xff]  }
 0x35d   : > { %5733 = vmatpush1.bf16.msra.mxu0 %v8701_v30  ;;  %v8767_v30 = vld [vmem:[%s10092_s29 + $0x548] ss:$48 sps:$4 sm:$0xff]  }
 0x35e   : > { %5774 = vmatpush1.bf16.msra.mxu1 %v8704_v31  ;;  %5734 = vmatprep.subr.bf16.mxu0 %v8709_v32  ;;  %v8770_v31 = vld [vmem:[%s10092_s29 + $0xb48] ss:$48 sps:$4 sm:$0xff]   ;;  %v8775_v32 = vld [vmem:[%s10092_s29 + $0x5ac] ss:$48 sps:$4 sm:$0xff]  }
 0x35f   : > { %5775 = vmatprep.subr.bf16.mxu1 %v8712_v33  ;;  %v8778_v33 = vld [vmem:[%s10092_s29 + $0xbac] ss:$48 sps:$4 sm:$0xff]  }
 0x361   : > { %5735 = vmatpush1.bf16.msra.mxu0 %v8707_v34  ;;  %v8773_v34 = vld [vmem:[%s10092_s29 + $0x5a8] ss:$48 sps:$4 sm:$0xff]  }
 0x362   : > { %5776 = vmatpush1.bf16.msra.mxu1 %v8710_v35  ;;  %5736 = vmatprep.subr.bf16.mxu0 %v8715_v36  ;;  %v8776_v35 = vld [vmem:[%s10092_s29 + $0xba8] ss:$48 sps:$4 sm:$0xff]   ;;  %v8781_v36 = vld [vmem:[%s10092_s29 + $0x14] ss:$48 sps:$4 sm:$0xff]  }
 0x363   : > { %5777 = vmatprep.subr.bf16.mxu1 %v8718_v37  ;;  %v3512_v42 = vpop.f32.mrb[12].mxu0  ;;  %v8784_v37 = vld [vmem:[%s10092_s29 + $0x614] ss:$48 sps:$4 sm:$0xff]  }
 0x364   : > { %v3553_v43 = vpop.f32.mrb[12].mxu1  ;;  %v3514_v45 = vpop.f32.mrb[13].mxu0 }
 0x365   : > { %v10773_v44 = vadd.f32 %v3553_v43, %v3512_v42  ;;  %v3555_v46 = vpop.f32.mrb[13].mxu1  ;;  %v3516_v48 = vpop.f32.mrb[14].mxu0  ;;  %5737 = vmatpush1.bf16.msra.mxu0 %v8713_v38  ;;  %v8779_v38 = vld [vmem:[%s10092_s29 + $0x10] ss:$48 sps:$4 sm:$0xff]  }
 0x366   : > { %v10775_v47 = vadd.f32 %v3555_v46, %v3514_v45  ;;  %v3557_v49 = vpop.f32.mrb[14].mxu1  ;;  %5778 = vmatpush1.bf16.msra.mxu1 %v8716_v39  ;;  %v3517_v54 = vpop.f32.mrb[15].mxu0  ;;  %5738 = vmatprep.subr.bf16.mxu0 %v8721_v40  ;;  %v8782_v39 = vld [vmem:[%s10092_s29 + $0x610] ss:$48 sps:$4 sm:$0xff]   ;;  %v8787_v40 = vld [vmem:[%s10092_s29 + $0x74] ss:$48 sps:$4 sm:$0xff]  }
 0x367   : > { %v3558_v52 = vpop.f32.mrb[15].mxu1  ;;  %5779 = vmatprep.subr.bf16.mxu1 %v8724_v41  ;;  %v8790_v41 = vld [vmem:[%s10092_s29 + $0x674] ss:$48 sps:$4 sm:$0xff]   ;;  %v8785_v42 = vld [vmem:[%s10092_s29 + $0x70] ss:$48 sps:$4 sm:$0xff]  }
 0x368   : > { %v8788_v43 = vld [vmem:[%s10092_s29 + $0x670] ss:$48 sps:$4 sm:$0xff]   ;;  %v8793_v45 = vld [vmem:[%s10092_s29 + $0xd4] ss:$48 sps:$4 sm:$0xff]  }
 0x369   : > { %5739 = vmatpush1.bf16.msra.mxu0 %v8719_v51  ;;  %v8796_v46 = vld [vmem:[%s10092_s29 + $0x6d4] ss:$48 sps:$4 sm:$0xff]   ;;  %v8791_v48 = vld [vmem:[%s10092_s29 + $0xd0] ss:$48 sps:$4 sm:$0xff]  }
 0x36a   : > { %5780 = vmatpush1.bf16.msra.mxu1 %v8722_v50  ;;  %5740 = vmatprep.subr.bf16.mxu0 %v8727_v55  ;;  %v8794_v49 = vld [vmem:[%s10092_s29 + $0x6d0] ss:$48 sps:$4 sm:$0xff]   ;;  %v8799_v51 = vld [vmem:[%s10092_s29 + $0x134] ss:$48 sps:$4 sm:$0xff]  }
 0x36b   : > { %5781 = vmatprep.subr.bf16.mxu1 %v8730_v56  ;;  %v8802_v50 = vld [vmem:[%s10092_s29 + $0x734] ss:$48 sps:$4 sm:$0xff]   ;;  %v8797_v54 = vld [vmem:[%s10092_s29 + $0x130] ss:$48 sps:$4 sm:$0xff]  }
 0x36c   : > { %v8800_v52 = vld [vmem:[%s10092_s29 + $0x730] ss:$48 sps:$4 sm:$0xff]   ;;  %v8805_v55 = vld [vmem:[%s10092_s29 + $0x194] ss:$48 sps:$4 sm:$0xff]  }
 0x36d   : > { %5741 = vmatpush1.bf16.msra.mxu0 %v8725_v58  ;;  %v8808_v56 = vld [vmem:[%s10092_s29 + $0x794] ss:$48 sps:$4 sm:$0xff]   ;;  %v8803_v58 = vld [vmem:[%s10092_s29 + $0x190] ss:$48 sps:$4 sm:$0xff]  }
 0x36e   : > { %5782 = vmatpush1.bf16.msra.mxu1 %v8728_v59  ;;  %5742 = vmatprep.subr.bf16.mxu0 %v8733_v62  ;;  %v8806_v59 = vld [vmem:[%s10092_s29 + $0x790] ss:$48 sps:$4 sm:$0xff]   ;;  %v8811_v62 = vld [vmem:[%s10092_s29 + $0x1f4] ss:$48 sps:$4 sm:$0xff]  }
 0x36f   : > { %5783 = vmatprep.subr.bf16.mxu1 %v8736_v63  ;;  %v8814_v63 = vld [vmem:[%s10092_s29 + $0x7f4] ss:$48 sps:$4 sm:$0xff]  }
 0x371   : > { %5743 = vmatpush1.bf16.msra.mxu0 %v8731_v0  ;;  %v8809_v0 = vld [vmem:[%s10092_s29 + $0x1f0] ss:$48 sps:$4 sm:$0xff]  }
 0x372   : > { %5784 = vmatpush1.bf16.msra.mxu1 %v8734_v1  ;;  %5744 = vmatprep.subr.bf16.mxu0 %v8739_v10  ;;  %v8812_v1 = vld [vmem:[%s10092_s29 + $0x7f0] ss:$48 sps:$4 sm:$0xff]   ;;  %v8817_v10 = vld [vmem:[%s10092_s29 + $0x254] ss:$48 sps:$4 sm:$0xff]  }
 0x373   : > { %5785 = vmatprep.subr.bf16.mxu1 %v8742_v11  ;;  %v8820_v11 = vld [vmem:[%s10092_s29 + $0x854] ss:$48 sps:$4 sm:$0xff]  }
 0x375   : > { %5745 = vmatpush1.bf16.msra.mxu0 %v8737_v2 }
 0x376   : > { %5786 = vmatpush1.bf16.msra.mxu1 %v8740_v3  ;;  %5746 = vmatprep.subr.bf16.mxu0 %v8745_v5 }
 0x377   : > { %5787 = vmatprep.subr.bf16.mxu1 %v8748_v6 }
 0x379   : > { %5747 = vmatpush1.bf16.msra.mxu0 %v8743_v8 }
 0x37a   : > { %5788 = vmatpush1.bf16.msra.mxu1 %v8746_v9  ;;  %5748 = vmatprep.subr.bf16.mxu0 %v8751_v12 }
 0x37b   : > { %5789 = vmatprep.subr.bf16.mxu1 %v8754_v13 }
 0x37d   : > { %5749 = vmatpush1.bf16.msra.mxu0 %v8749_v14  ;;  %v8815_v14 = vld [vmem:[%s10092_s29 + $0x250] ss:$48 sps:$4 sm:$0xff]  }
 0x37e   : > { %5790 = vmatpush1.bf16.msra.mxu1 %v8752_v15  ;;  %5750 = vmatprep.subr.bf16.mxu0 %v8757_v18  ;;  %v8818_v15 = vld [vmem:[%s10092_s29 + $0x850] ss:$48 sps:$4 sm:$0xff]  }
 0x37f   : > { %5791 = vmatprep.subr.bf16.mxu1 %v8760_v19 }
 0x381   : > { %5751 = vmatpush1.bf16.msra.mxu0 %v8755_v20  ;;  %v8823_v20 = vld [vmem:[%s10092_s29 + $0x2b4] ss:$48 sps:$4 sm:$0xff]  }
 0x382   : > { %5792 = vmatpush1.bf16.msra.mxu1 %v8758_v21  ;;  %5752 = vmatprep.subr.bf16.mxu0 %v8763_v22  ;;  %v8826_v21 = vld [vmem:[%s10092_s29 + $0x8b4] ss:$48 sps:$4 sm:$0xff]   ;;  %v8821_v22 = vld [vmem:[%s10092_s29 + $0x2b0] ss:$48 sps:$4 sm:$0xff]  }
 0x383   : > { %5793 = vmatprep.subr.bf16.mxu1 %v8766_v23  ;;  %v8824_v23 = vld [vmem:[%s10092_s29 + $0x8b0] ss:$48 sps:$4 sm:$0xff]  }
 0x385   : > { %5753 = vmatpush1.bf16.msra.mxu0 %v8761_v25  ;;  %v8829_v25 = vld [vmem:[%s10092_s29 + $0x314] ss:$48 sps:$4 sm:$0xff]  }
 0x386   : > { %5794 = vmatpush1.bf16.msra.mxu1 %v8764_v26  ;;  %5754 = vmatprep.subr.bf16.mxu0 %v8769_v28  ;;  %v8832_v26 = vld [vmem:[%s10092_s29 + $0x914] ss:$48 sps:$4 sm:$0xff]   ;;  %v8827_v28 = vld [vmem:[%s10092_s29 + $0x310] ss:$48 sps:$4 sm:$0xff]  }
 0x387   : > { %5795 = vmatprep.subr.bf16.mxu1 %v8772_v29  ;;  %v8830_v29 = vld [vmem:[%s10092_s29 + $0x910] ss:$48 sps:$4 sm:$0xff]  }
 0x389   : > { %5755 = vmatpush1.bf16.msra.mxu0 %v8767_v30  ;;  %v8835_v30 = vld [vmem:[%s10092_s29 + $0x374] ss:$48 sps:$4 sm:$0xff]  }
 0x38a   : > { %5796 = vmatpush1.bf16.msra.mxu1 %v8770_v31  ;;  %5756 = vmatprep.subr.bf16.mxu0 %v8775_v32  ;;  %v8838_v31 = vld [vmem:[%s10092_s29 + $0x974] ss:$48 sps:$4 sm:$0xff]   ;;  %v8833_v32 = vld [vmem:[%s10092_s29 + $0x370] ss:$48 sps:$4 sm:$0xff]  }
 0x38b   : > { %5797 = vmatprep.subr.bf16.mxu1 %v8778_v33  ;;  %v8836_v33 = vld [vmem:[%s10092_s29 + $0x970] ss:$48 sps:$4 sm:$0xff]  }
 0x38d   : > { %5757 = vmatpush1.bf16.msra.mxu0 %v8773_v34  ;;  %v8841_v34 = vld [vmem:[%s10092_s29 + $0x3d4] ss:$48 sps:$4 sm:$0xff]  }
 0x38e   : > { %5798 = vmatpush1.bf16.msra.mxu1 %v8776_v35  ;;  %5808 = vmatprep.subr.bf16.mxu0 %v8781_v36  ;;  %v8844_v35 = vld [vmem:[%s10092_s29 + $0x9d4] ss:$48 sps:$4 sm:$0xff]   ;;  %v8839_v36 = vld [vmem:[%s10092_s29 + $0x3d0] ss:$48 sps:$4 sm:$0xff]  }
 0x38f   : > { %5849 = vmatprep.subr.bf16.mxu1 %v8784_v37  ;;  %v8842_v37 = vld [vmem:[%s10092_s29 + $0x9d0] ss:$48 sps:$4 sm:$0xff]  }
 0x390   : > { %5759 = vmatmul.mubr.bf16.vlgmr.msra.gmra.mrb[28].mxu0 %v10743_v16 }
 0x391   : > { %5800 = vmatmul.mubr.bf16.vlgmr.msra.gmra.mrb[28].mxu1 %v10745_v17  ;;  %5809 = vmatpush1.bf16.msra.mxu0 %v8779_v38  ;;  %v8847_v38 = vld [vmem:[%s10092_s29 + $0x434] ss:$48 sps:$4 sm:$0xff]  }
 0x392   : > { %5850 = vmatpush1.bf16.msra.mxu1 %v8782_v39  ;;  %5810 = vmatprep.subr.bf16.mxu0 %v8787_v40  ;;  %v8850_v39 = vld [vmem:[%s10092_s29 + $0xa34] ss:$48 sps:$4 sm:$0xff]   ;;  %v8845_v40 = vld [vmem:[%s10092_s29 + $0x430] ss:$48 sps:$4 sm:$0xff]  }
 0x393   : > { %5851 = vmatprep.subr.bf16.mxu1 %v8790_v41  ;;  %5840 = vmatprep.mubr.bf16.mxu0 %v10669_v60  ;;  %v8848_v41 = vld [vmem:[%s10092_s29 + $0xa30] ss:$48 sps:$4 sm:$0xff]  }
 0x394   : > { %5881 = vmatprep.mubr.bf16.mxu1 %v10671_v61 }
 0x395   : > { %5811 = vmatpush1.bf16.msra.mxu0 %v8785_v42  ;;  %v8853_v42 = vld [vmem:[%s10092_s29 + $0x494] ss:$48 sps:$4 sm:$0xff]  }
 0x396   : > { %5852 = vmatpush1.bf16.msra.mxu1 %v8788_v43  ;;  %5812 = vmatprep.subr.bf16.mxu0 %v8793_v45  ;;  %v8856_v43 = vld [vmem:[%s10092_s29 + $0xa94] ss:$48 sps:$4 sm:$0xff]   ;;  %v8851_v45 = vld [vmem:[%s10092_s29 + $0x490] ss:$48 sps:$4 sm:$0xff]  }
 0x397   : > { %5853 = vmatprep.subr.bf16.mxu1 %v8796_v46  ;;  %v8854_v46 = vld [vmem:[%s10092_s29 + $0xa90] ss:$48 sps:$4 sm:$0xff]  }
 0x399   : > { %5813 = vmatpush1.bf16.msra.mxu0 %v8791_v48  ;;  %v8859_v48 = vld [vmem:[%s10092_s29 + $0x4f4] ss:$48 sps:$4 sm:$0xff]  }
 0x39a   : > { %5854 = vmatpush1.bf16.msra.mxu1 %v8794_v49  ;;  %5814 = vmatprep.subr.bf16.mxu0 %v8799_v51  ;;  %v8862_v49 = vld [vmem:[%s10092_s29 + $0xaf4] ss:$48 sps:$4 sm:$0xff]   ;;  %v8857_v51 = vld [vmem:[%s10092_s29 + $0x4f0] ss:$48 sps:$4 sm:$0xff]  }
 0x39b   : > { %5855 = vmatprep.subr.bf16.mxu1 %v8802_v50  ;;  %v8860_v50 = vld [vmem:[%s10092_s29 + $0xaf0] ss:$48 sps:$4 sm:$0xff]  }
 0x39d   : > { %5815 = vmatpush1.bf16.msra.mxu0 %v8797_v54  ;;  %v8865_v54 = vld [vmem:[%s10092_s29 + $0x554] ss:$48 sps:$4 sm:$0xff]  }
 0x39e   : > { %5856 = vmatpush1.bf16.msra.mxu1 %v8800_v52  ;;  %5816 = vmatprep.subr.bf16.mxu0 %v8805_v55  ;;  %v8868_v52 = vld [vmem:[%s10092_s29 + $0xb54] ss:$48 sps:$4 sm:$0xff]   ;;  %v8863_v55 = vld [vmem:[%s10092_s29 + $0x550] ss:$48 sps:$4 sm:$0xff]  }
 0x39f   : > { %5857 = vmatprep.subr.bf16.mxu1 %v8808_v56  ;;  %v8866_v56 = vld [vmem:[%s10092_s29 + $0xb50] ss:$48 sps:$4 sm:$0xff]  }
 0x3a1   : > { %5817 = vmatpush1.bf16.msra.mxu0 %v8803_v58  ;;  %v8871_v58 = vld [vmem:[%s10092_s29 + $0x5b4] ss:$48 sps:$4 sm:$0xff]  }
 0x3a2   : > { %5858 = vmatpush1.bf16.msra.mxu1 %v8806_v59  ;;  %5818 = vmatprep.subr.bf16.mxu0 %v8811_v62  ;;  %v8874_v59 = vld [vmem:[%s10092_s29 + $0xbb4] ss:$48 sps:$4 sm:$0xff]   ;;  %v8869_v62 = vld [vmem:[%s10092_s29 + $0x5b0] ss:$48 sps:$4 sm:$0xff]  }
 0x3a3   : > { %5859 = vmatprep.subr.bf16.mxu1 %v8814_v63  ;;  %v3594_v2 = vpop.f32.mrb[16].mxu0  ;;  %v8872_v63 = vld [vmem:[%s10092_s29 + $0xbb0] ss:$48 sps:$4 sm:$0xff]  }
 0x3a4   : > { %v3635_v3 = vpop.f32.mrb[16].mxu1  ;;  %v3596_v6 = vpop.f32.mrb[17].mxu0 }
 0x3a5   : > { %v10845_v5 = vadd.f32 %v3635_v3, %v3594_v2  ;;  %v3637_v8 = vpop.f32.mrb[17].mxu1  ;;  %v3598_v12 = vpop.f32.mrb[18].mxu0  ;;  %5819 = vmatpush1.bf16.msra.mxu0 %v8809_v0  ;;  %v8877_v0 = vld [vmem:[%s10092_s29 + $0x1c] ss:$48 sps:$4 sm:$0xff]  }
 0x3a6   : > { %v10847_v9 = vadd.f32 %v3637_v8, %v3596_v6  ;;  %v3639_v13 = vpop.f32.mrb[18].mxu1  ;;  %5860 = vmatpush1.bf16.msra.mxu1 %v8812_v1  ;;  %v3599_v18 = vpop.f32.mrb[19].mxu0  ;;  %5820 = vmatprep.subr.bf16.mxu0 %v8817_v10  ;;  %v8880_v1 = vld [vmem:[%s10092_s29 + $0x61c] ss:$48 sps:$4 sm:$0xff]   ;;  %v8875_v10 = vld [vmem:[%s10092_s29 + $0x18] ss:$48 sps:$4 sm:$0xff]  }
 0x3a7   : > { %v3640_v19 = vpop.f32.mrb[19].mxu1  ;;  %5861 = vmatprep.subr.bf16.mxu1 %v8820_v11  ;;  %v8878_v11 = vld [vmem:[%s10092_s29 + $0x618] ss:$48 sps:$4 sm:$0xff]   ;;  %v8883_v2 = vld [vmem:[%s10092_s29 + $0x7c] ss:$48 sps:$4 sm:$0xff]  }
 0x3a8   : > { %v8886_v3 = vld [vmem:[%s10092_s29 + $0x67c] ss:$48 sps:$4 sm:$0xff]   ;;  %v8881_v6 = vld [vmem:[%s10092_s29 + $0x78] ss:$48 sps:$4 sm:$0xff]  }
 0x3a9   : > { %5821 = vmatpush1.bf16.msra.mxu0 %v8815_v14  ;;  %v8884_v8 = vld [vmem:[%s10092_s29 + $0x678] ss:$48 sps:$4 sm:$0xff]   ;;  %v8889_v12 = vld [vmem:[%s10092_s29 + $0xdc] ss:$48 sps:$4 sm:$0xff]  }
 0x3aa   : > { %5862 = vmatpush1.bf16.msra.mxu1 %v8818_v15  ;;  %5822 = vmatprep.subr.bf16.mxu0 %v8823_v20  ;;  %v8892_v13 = vld [vmem:[%s10092_s29 + $0x6dc] ss:$48 sps:$4 sm:$0xff]   ;;  %v8887_v14 = vld [vmem:[%s10092_s29 + $0xd8] ss:$48 sps:$4 sm:$0xff]  }
 0x3ab   : > { %5863 = vmatprep.subr.bf16.mxu1 %v8826_v21  ;;  %v8890_v15 = vld [vmem:[%s10092_s29 + $0x6d8] ss:$48 sps:$4 sm:$0xff]   ;;  %v8895_v18 = vld [vmem:[%s10092_s29 + $0x13c] ss:$48 sps:$4 sm:$0xff]  }
 0x3ac   : > { %v8898_v19 = vld [vmem:[%s10092_s29 + $0x73c] ss:$48 sps:$4 sm:$0xff]   ;;  %v8893_v20 = vld [vmem:[%s10092_s29 + $0x138] ss:$48 sps:$4 sm:$0xff]  }
 0x3ad   : > { %5823 = vmatpush1.bf16.msra.mxu0 %v8821_v22  ;;  %v8896_v21 = vld [vmem:[%s10092_s29 + $0x738] ss:$48 sps:$4 sm:$0xff]   ;;  %v8901_v22 = vld [vmem:[%s10092_s29 + $0x19c] ss:$48 sps:$4 sm:$0xff]  }
 0x3ae   : > { %5864 = vmatpush1.bf16.msra.mxu1 %v8824_v23  ;;  %5824 = vmatprep.subr.bf16.mxu0 %v8829_v25  ;;  %v8904_v23 = vld [vmem:[%s10092_s29 + $0x79c] ss:$48 sps:$4 sm:$0xff]   ;;  %v8899_v25 = vld [vmem:[%s10092_s29 + $0x198] ss:$48 sps:$4 sm:$0xff]  }
 0x3af   : > { %5865 = vmatprep.subr.bf16.mxu1 %v8832_v26  ;;  %v8902_v26 = vld [vmem:[%s10092_s29 + $0x798] ss:$48 sps:$4 sm:$0xff]  }
 0x3b1   : > { %5825 = vmatpush1.bf16.msra.mxu0 %v8827_v28  ;;  %v8907_v28 = vld [vmem:[%s10092_s29 + $0x1fc] ss:$48 sps:$4 sm:$0xff]  }
 0x3b2   : > { %5866 = vmatpush1.bf16.msra.mxu1 %v8830_v29  ;;  %5826 = vmatprep.subr.bf16.mxu0 %v8835_v30  ;;  %v8910_v29 = vld [vmem:[%s10092_s29 + $0x7fc] ss:$48 sps:$4 sm:$0xff]   ;;  %v8905_v30 = vld [vmem:[%s10092_s29 + $0x1f8] ss:$48 sps:$4 sm:$0xff]  }
 0x3b3   : > { %5867 = vmatprep.subr.bf16.mxu1 %v8838_v31  ;;  %v8908_v31 = vld [vmem:[%s10092_s29 + $0x7f8] ss:$48 sps:$4 sm:$0xff]  }
 0x3b5   : > { %5827 = vmatpush1.bf16.msra.mxu0 %v8833_v32  ;;  %v8913_v32 = vld [vmem:[%s10092_s29 + $0x25c] ss:$48 sps:$4 sm:$0xff]  }
 0x3b6   : > { %5868 = vmatpush1.bf16.msra.mxu1 %v8836_v33  ;;  %5828 = vmatprep.subr.bf16.mxu0 %v8841_v34  ;;  %v8916_v33 = vld [vmem:[%s10092_s29 + $0x85c] ss:$48 sps:$4 sm:$0xff]  }
 0x3b7   : > { %5869 = vmatprep.subr.bf16.mxu1 %v8844_v35 }
 0x3b9   : > { %5829 = vmatpush1.bf16.msra.mxu0 %v8839_v36 }
 0x3ba   : > { %5870 = vmatpush1.bf16.msra.mxu1 %v8842_v37  ;;  %5830 = vmatprep.subr.bf16.mxu0 %v8847_v38 }
 0x3bb   : > { %5871 = vmatprep.subr.bf16.mxu1 %v8850_v39 }
 0x3bd   : > { %5831 = vmatpush1.bf16.msra.mxu0 %v8845_v40 }
 0x3be   : > { %5872 = vmatpush1.bf16.msra.mxu1 %v8848_v41  ;;  %5832 = vmatprep.subr.bf16.mxu0 %v8853_v42  ;;  %v8911_v42 = vld [vmem:[%s10092_s29 + $0x258] ss:$48 sps:$4 sm:$0xff]  }
 0x3bf   : > { %5873 = vmatprep.subr.bf16.mxu1 %v8856_v43  ;;  %v8914_v43 = vld [vmem:[%s10092_s29 + $0x858] ss:$48 sps:$4 sm:$0xff]  }
 0x3c1   : > { %5833 = vmatpush1.bf16.msra.mxu0 %v8851_v45 }
 0x3c2   : > { %5874 = vmatpush1.bf16.msra.mxu1 %v8854_v46  ;;  %5834 = vmatprep.subr.bf16.mxu0 %v8859_v48  ;;  %v8919_v48 = vld [vmem:[%s10092_s29 + $0x2bc] ss:$48 sps:$4 sm:$0xff]  }
 0x3c3   : > { %5875 = vmatprep.subr.bf16.mxu1 %v8862_v49  ;;  %v8922_v49 = vld [vmem:[%s10092_s29 + $0x8bc] ss:$48 sps:$4 sm:$0xff]  }
 0x3c5   : > { %5835 = vmatpush1.bf16.msra.mxu0 %v8857_v51  ;;  %v8917_v51 = vld [vmem:[%s10092_s29 + $0x2b8] ss:$48 sps:$4 sm:$0xff]  }
 0x3c6   : > { %5876 = vmatpush1.bf16.msra.mxu1 %v8860_v50  ;;  %5836 = vmatprep.subr.bf16.mxu0 %v8865_v54  ;;  %v8920_v50 = vld [vmem:[%s10092_s29 + $0x8b8] ss:$48 sps:$4 sm:$0xff]   ;;  %v8925_v54 = vld [vmem:[%s10092_s29 + $0x31c] ss:$48 sps:$4 sm:$0xff]  }
 0x3c7   : > { %5877 = vmatprep.subr.bf16.mxu1 %v8868_v52  ;;  %v8928_v52 = vld [vmem:[%s10092_s29 + $0x91c] ss:$48 sps:$4 sm:$0xff]  }
 0x3c9   : > { %5837 = vmatpush1.bf16.msra.mxu0 %v8863_v55  ;;  %v8923_v55 = vld [vmem:[%s10092_s29 + $0x318] ss:$48 sps:$4 sm:$0xff]  }
 0x3ca   : > { %5878 = vmatpush1.bf16.msra.mxu1 %v8866_v56  ;;  %5838 = vmatprep.subr.bf16.mxu0 %v8871_v58  ;;  %v8926_v56 = vld [vmem:[%s10092_s29 + $0x918] ss:$48 sps:$4 sm:$0xff]   ;;  %v8931_v58 = vld [vmem:[%s10092_s29 + $0x37c] ss:$48 sps:$4 sm:$0xff]  }
 0x3cb   : > { %5879 = vmatprep.subr.bf16.mxu1 %v8874_v59  ;;  %v8934_v59 = vld [vmem:[%s10092_s29 + $0x97c] ss:$48 sps:$4 sm:$0xff]  }
 0x3cd   : > { %5839 = vmatpush1.bf16.msra.mxu0 %v8869_v62  ;;  %v8929_v62 = vld [vmem:[%s10092_s29 + $0x378] ss:$48 sps:$4 sm:$0xff]  }
 0x3ce   : > { %5880 = vmatpush1.bf16.msra.mxu1 %v8872_v63  ;;  %5890 = vmatprep.subr.bf16.mxu0 %v8877_v0  ;;  %v8932_v63 = vld [vmem:[%s10092_s29 + $0x978] ss:$48 sps:$4 sm:$0xff]   ;;  %v8937_v0 = vld [vmem:[%s10092_s29 + $0x3dc] ss:$48 sps:$4 sm:$0xff]  }
 0x3cf   : > { %5931 = vmatprep.subr.bf16.mxu1 %v8880_v1  ;;  %v8940_v1 = vld [vmem:[%s10092_s29 + $0x9dc] ss:$48 sps:$4 sm:$0xff]  }
 0x3d0   : > { %5841 = vmatmul.mubr.bf16.vlgmr.msra.gmra.mrb[32].mxu0 %v10743_v16 }
 0x3d1   : > { %5882 = vmatmul.mubr.bf16.vlgmr.msra.gmra.mrb[32].mxu1 %v10745_v17  ;;  %5891 = vmatpush1.bf16.msra.mxu0 %v8875_v10  ;;  %v8935_v10 = vld [vmem:[%s10092_s29 + $0x3d8] ss:$48 sps:$4 sm:$0xff]  }
 0x3d2   : > { %5932 = vmatpush1.bf16.msra.mxu1 %v8878_v11  ;;  %5892 = vmatprep.subr.bf16.mxu0 %v8883_v2  ;;  %v8938_v11 = vld [vmem:[%s10092_s29 + $0x9d8] ss:$48 sps:$4 sm:$0xff]   ;;  %v8943_v2 = vld [vmem:[%s10092_s29 + $0x43c] ss:$48 sps:$4 sm:$0xff]  }
 0x3d3   : > { %5933 = vmatprep.subr.bf16.mxu1 %v8886_v3  ;;  %5922 = vmatprep.mubr.bf16.mxu0 %v10669_v60  ;;  %v8946_v3 = vld [vmem:[%s10092_s29 + $0xa3c] ss:$48 sps:$4 sm:$0xff]  }
 0x3d4   : > { %5963 = vmatprep.mubr.bf16.mxu1 %v10671_v61 }
 0x3d5   : > { %5893 = vmatpush1.bf16.msra.mxu0 %v8881_v6  ;;  %v8941_v6 = vld [vmem:[%s10092_s29 + $0x438] ss:$48 sps:$4 sm:$0xff]  }
 0x3d6   : > { %5934 = vmatpush1.bf16.msra.mxu1 %v8884_v8  ;;  %5894 = vmatprep.subr.bf16.mxu0 %v8889_v12  ;;  %v8944_v8 = vld [vmem:[%s10092_s29 + $0xa38] ss:$48 sps:$4 sm:$0xff]   ;;  %v8949_v12 = vld [vmem:[%s10092_s29 + $0x49c] ss:$48 sps:$4 sm:$0xff]  }
 0x3d7   : > { %5935 = vmatprep.subr.bf16.mxu1 %v8892_v13  ;;  %v8952_v13 = vld [vmem:[%s10092_s29 + $0xa9c] ss:$48 sps:$4 sm:$0xff]  }
 0x3d9   : > { %5895 = vmatpush1.bf16.msra.mxu0 %v8887_v14  ;;  %v8947_v14 = vld [vmem:[%s10092_s29 + $0x498] ss:$48 sps:$4 sm:$0xff]  }
 0x3da   : > { %5936 = vmatpush1.bf16.msra.mxu1 %v8890_v15  ;;  %5896 = vmatprep.subr.bf16.mxu0 %v8895_v18  ;;  %v8950_v15 = vld [vmem:[%s10092_s29 + $0xa98] ss:$48 sps:$4 sm:$0xff]   ;;  %v8955_v18 = vld [vmem:[%s10092_s29 + $0x4fc] ss:$48 sps:$4 sm:$0xff]  }
 0x3db   : > { %5937 = vmatprep.subr.bf16.mxu1 %v8898_v19  ;;  %v8958_v19 = vld [vmem:[%s10092_s29 + $0xafc] ss:$48 sps:$4 sm:$0xff]  }
 0x3dd   : > { %5897 = vmatpush1.bf16.msra.mxu0 %v8893_v20  ;;  %v8953_v20 = vld [vmem:[%s10092_s29 + $0x4f8] ss:$48 sps:$4 sm:$0xff]  }
 0x3de   : > { %5938 = vmatpush1.bf16.msra.mxu1 %v8896_v21  ;;  %5898 = vmatprep.subr.bf16.mxu0 %v8901_v22  ;;  %v8956_v21 = vld [vmem:[%s10092_s29 + $0xaf8] ss:$48 sps:$4 sm:$0xff]   ;;  %v8961_v22 = vld [vmem:[%s10092_s29 + $0x55c] ss:$48 sps:$4 sm:$0xff]  }
 0x3df   : > { %5939 = vmatprep.subr.bf16.mxu1 %v8904_v23  ;;  %v8964_v23 = vld [vmem:[%s10092_s29 + $0xb5c] ss:$48 sps:$4 sm:$0xff]  }
 0x3e1   : > { %5899 = vmatpush1.bf16.msra.mxu0 %v8899_v25  ;;  %v8959_v25 = vld [vmem:[%s10092_s29 + $0x558] ss:$48 sps:$4 sm:$0xff]  }
 0x3e2   : > { %5940 = vmatpush1.bf16.msra.mxu1 %v8902_v26  ;;  %5900 = vmatprep.subr.bf16.mxu0 %v8907_v28  ;;  %v8962_v26 = vld [vmem:[%s10092_s29 + $0xb58] ss:$48 sps:$4 sm:$0xff]   ;;  %v8967_v28 = vld [vmem:[%s10092_s29 + $0x5bc] ss:$48 sps:$4 sm:$0xff]  }
 0x3e3   : > { %5941 = vmatprep.subr.bf16.mxu1 %v8910_v29  ;;  %v3676_v34 = vpop.f32.mrb[20].mxu0  ;;  %v8970_v29 = vld [vmem:[%s10092_s29 + $0xbbc] ss:$48 sps:$4 sm:$0xff]  }
 0x3e4   : > { %v3717_v35 = vpop.f32.mrb[20].mxu1  ;;  %v3678_v37 = vpop.f32.mrb[21].mxu0 }
 0x3e5   : > { %v10917_v36 = vadd.f32 %v3717_v35, %v3676_v34  ;;  %v3719_v38 = vpop.f32.mrb[21].mxu1  ;;  %v3680_v40 = vpop.f32.mrb[22].mxu0  ;;  %5901 = vmatpush1.bf16.msra.mxu0 %v8905_v30  ;;  %v8965_v30 = vld [vmem:[%s10092_s29 + $0x5b8] ss:$48 sps:$4 sm:$0xff]   ;;  %v8971_v34 = vld [vmem:[%s10092_s29 + $0x20] ss:$48 sps:$4 sm:$0xff]  }
 0x3e6   : > { %v10919_v39 = vadd.f32 %v3719_v38, %v3678_v37  ;;  %v3721_v41 = vpop.f32.mrb[22].mxu1  ;;  %5942 = vmatpush1.bf16.msra.mxu1 %v8908_v31  ;;  %v3681_v45 = vpop.f32.mrb[23].mxu0  ;;  %5902 = vmatprep.subr.bf16.mxu0 %v8913_v32  ;;  %v8968_v31 = vld [vmem:[%s10092_s29 + $0xbb8] ss:$48 sps:$4 sm:$0xff]   ;;  %v8973_v32 = vld [vmem:[%s10092_s29 + $0x24] ss:$48 sps:$4 sm:$0xff]  }
 0x3e7   : > { %v3722_v46 = vpop.f32.mrb[23].mxu1  ;;  %5943 = vmatprep.subr.bf16.mxu1 %v8916_v33  ;;  %v8976_v33 = vld [vmem:[%s10092_s29 + $0x624] ss:$48 sps:$4 sm:$0xff]   ;;  %v8974_v35 = vld [vmem:[%s10092_s29 + $0x620] ss:$48 sps:$4 sm:$0xff]  }
 0x3e8   : > { %v8979_v37 = vld [vmem:[%s10092_s29 + $0x84] ss:$48 sps:$4 sm:$0xff]   ;;  %v8977_v40 = vld [vmem:[%s10092_s29 + $0x80] ss:$48 sps:$4 sm:$0xff]  }
 0x3e9   : > { %5903 = vmatpush1.bf16.msra.mxu0 %v8911_v42  ;;  %v8982_v38 = vld [vmem:[%s10092_s29 + $0x684] ss:$48 sps:$4 sm:$0xff]   ;;  %v8980_v41 = vld [vmem:[%s10092_s29 + $0x680] ss:$48 sps:$4 sm:$0xff]  }
 0x3ea   : > { %5944 = vmatpush1.bf16.msra.mxu1 %v8914_v43  ;;  %5904 = vmatprep.subr.bf16.mxu0 %v8919_v48  ;;  %v8985_v42 = vld [vmem:[%s10092_s29 + $0xe4] ss:$48 sps:$4 sm:$0xff]   ;;  %v8983_v45 = vld [vmem:[%s10092_s29 + $0xe0] ss:$48 sps:$4 sm:$0xff]  }
 0x3eb   : > { %5945 = vmatprep.subr.bf16.mxu1 %v8922_v49  ;;  %v8988_v43 = vld [vmem:[%s10092_s29 + $0x6e4] ss:$48 sps:$4 sm:$0xff]   ;;  %v8986_v46 = vld [vmem:[%s10092_s29 + $0x6e0] ss:$48 sps:$4 sm:$0xff]  }
 0x3ec   : > { %v8991_v48 = vld [vmem:[%s10092_s29 + $0x144] ss:$48 sps:$4 sm:$0xff]  }
 0x3ed   : > { %5905 = vmatpush1.bf16.msra.mxu0 %v8917_v51  ;;  %v8994_v49 = vld [vmem:[%s10092_s29 + $0x744] ss:$48 sps:$4 sm:$0xff]   ;;  %v8989_v51 = vld [vmem:[%s10092_s29 + $0x140] ss:$48 sps:$4 sm:$0xff]  }
 0x3ee   : > { %5946 = vmatpush1.bf16.msra.mxu1 %v8920_v50  ;;  %5906 = vmatprep.subr.bf16.mxu0 %v8925_v54  ;;  %v8992_v50 = vld [vmem:[%s10092_s29 + $0x740] ss:$48 sps:$4 sm:$0xff]   ;;  %v8997_v54 = vld [vmem:[%s10092_s29 + $0x1a4] ss:$48 sps:$4 sm:$0xff]  }
 0x3ef   : > { %5947 = vmatprep.subr.bf16.mxu1 %v8928_v52  ;;  %v9000_v52 = vld [vmem:[%s10092_s29 + $0x7a4] ss:$48 sps:$4 sm:$0xff]  }
 0x3f1   : > { %5907 = vmatpush1.bf16.msra.mxu0 %v8923_v55  ;;  %v8995_v55 = vld [vmem:[%s10092_s29 + $0x1a0] ss:$48 sps:$4 sm:$0xff]  }
 0x3f2   : > { %5948 = vmatpush1.bf16.msra.mxu1 %v8926_v56  ;;  %5908 = vmatprep.subr.bf16.mxu0 %v8931_v58  ;;  %v8998_v56 = vld [vmem:[%s10092_s29 + $0x7a0] ss:$48 sps:$4 sm:$0xff]   ;;  %v9003_v58 = vld [vmem:[%s10092_s29 + $0x204] ss:$48 sps:$4 sm:$0xff]  }
 0x3f3   : > { %5949 = vmatprep.subr.bf16.mxu1 %v8934_v59  ;;  %v9006_v59 = vld [vmem:[%s10092_s29 + $0x804] ss:$48 sps:$4 sm:$0xff]  }
 0x3f5   : > { %5909 = vmatpush1.bf16.msra.mxu0 %v8929_v62  ;;  %v9001_v62 = vld [vmem:[%s10092_s29 + $0x200] ss:$48 sps:$4 sm:$0xff]  }
 0x3f6   : > { %5950 = vmatpush1.bf16.msra.mxu1 %v8932_v63  ;;  %5910 = vmatprep.subr.bf16.mxu0 %v8937_v0  ;;  %v9004_v63 = vld [vmem:[%s10092_s29 + $0x800] ss:$48 sps:$4 sm:$0xff]   ;;  %v9009_v0 = vld [vmem:[%s10092_s29 + $0x264] ss:$48 sps:$4 sm:$0xff]  }
 0x3f7   : > { %5951 = vmatprep.subr.bf16.mxu1 %v8940_v1  ;;  %v9012_v1 = vld [vmem:[%s10092_s29 + $0x864] ss:$48 sps:$4 sm:$0xff]  }
 0x3f9   : > { %5911 = vmatpush1.bf16.msra.mxu0 %v8935_v10 }
 0x3fa   : > { %5952 = vmatpush1.bf16.msra.mxu1 %v8938_v11  ;;  %5912 = vmatprep.subr.bf16.mxu0 %v8943_v2 }
 0x3fb   : > { %5953 = vmatprep.subr.bf16.mxu1 %v8946_v3 }
 0x3fd   : > { %5913 = vmatpush1.bf16.msra.mxu0 %v8941_v6 }
 0x3fe   : > { %5954 = vmatpush1.bf16.msra.mxu1 %v8944_v8  ;;  %5914 = vmatprep.subr.bf16.mxu0 %v8949_v12 }
 0x3ff   : > { %5955 = vmatprep.subr.bf16.mxu1 %v8952_v13 }
 0x401   : > { %5915 = vmatpush1.bf16.msra.mxu0 %v8947_v14  ;;  %v9007_v14 = vld [vmem:[%s10092_s29 + $0x260] ss:$48 sps:$4 sm:$0xff]  }
 0x402   : > { %5956 = vmatpush1.bf16.msra.mxu1 %v8950_v15  ;;  %5916 = vmatprep.subr.bf16.mxu0 %v8955_v18  ;;  %v9010_v15 = vld [vmem:[%s10092_s29 + $0x860] ss:$48 sps:$4 sm:$0xff]  }
 0x403   : > { %5957 = vmatprep.subr.bf16.mxu1 %v8958_v19 }
 0x405   : > { %5917 = vmatpush1.bf16.msra.mxu0 %v8953_v20 }
 0x406   : > { %5958 = vmatpush1.bf16.msra.mxu1 %v8956_v21  ;;  %5918 = vmatprep.subr.bf16.mxu0 %v8961_v22  ;;  %v9013_v22 = vld [vmem:[%s10092_s29 + $0x2c0] ss:$48 sps:$4 sm:$0xff]  }
 0x407   : > { %5959 = vmatprep.subr.bf16.mxu1 %v8964_v23  ;;  %v9016_v23 = vld [vmem:[%s10092_s29 + $0x8c0] ss:$48 sps:$4 sm:$0xff]  }
 0x409   : > { %5919 = vmatpush1.bf16.msra.mxu0 %v8959_v25  ;;  %v9021_v25 = vld [vmem:[%s10092_s29 + $0x324] ss:$48 sps:$4 sm:$0xff]  }
 0x40a   : > { %5960 = vmatpush1.bf16.msra.mxu1 %v8962_v26  ;;  %5920 = vmatprep.subr.bf16.mxu0 %v8967_v28  ;;  %v9024_v26 = vld [vmem:[%s10092_s29 + $0x924] ss:$48 sps:$4 sm:$0xff]   ;;  %v9019_v28 = vld [vmem:[%s10092_s29 + $0x320] ss:$48 sps:$4 sm:$0xff]  }
 0x40b   : > { %5961 = vmatprep.subr.bf16.mxu1 %v8970_v29  ;;  %v9022_v29 = vld [vmem:[%s10092_s29 + $0x920] ss:$48 sps:$4 sm:$0xff]  }
 0x40d   : > { %5921 = vmatpush1.bf16.msra.mxu0 %v8965_v30  ;;  %v9027_v30 = vld [vmem:[%s10092_s29 + $0x384] ss:$48 sps:$4 sm:$0xff]  }
 0x40e   : > { %5962 = vmatpush1.bf16.msra.mxu1 %v8968_v31  ;;  %5972 = vmatprep.subr.bf16.mxu0 %v8973_v32  ;;  %v9030_v31 = vld [vmem:[%s10092_s29 + $0x984] ss:$48 sps:$4 sm:$0xff]   ;;  %v9025_v32 = vld [vmem:[%s10092_s29 + $0x380] ss:$48 sps:$4 sm:$0xff]  }
 0x40f   : > { %6013 = vmatprep.subr.bf16.mxu1 %v8976_v33  ;;  %v9028_v33 = vld [vmem:[%s10092_s29 + $0x980] ss:$48 sps:$4 sm:$0xff]  }
 0x410   : > { %5923 = vmatmul.mubr.bf16.vlgmr.msra.gmra.mrb[36].mxu0 %v10743_v16 }
 0x411   : > { %5964 = vmatmul.mubr.bf16.vlgmr.msra.gmra.mrb[36].mxu1 %v10745_v17  ;;  %5973 = vmatpush1.bf16.msra.mxu0 %v8971_v34  ;;  %v9033_v34 = vld [vmem:[%s10092_s29 + $0x3e4] ss:$48 sps:$4 sm:$0xff]  }
 0x412   : > { %6014 = vmatpush1.bf16.msra.mxu1 %v8974_v35  ;;  %5974 = vmatprep.subr.bf16.mxu0 %v8979_v37  ;;  %v9036_v35 = vld [vmem:[%s10092_s29 + $0x9e4] ss:$48 sps:$4 sm:$0xff]   ;;  %v9031_v37 = vld [vmem:[%s10092_s29 + $0x3e0] ss:$48 sps:$4 sm:$0xff]  }
 0x413   : > { %6015 = vmatprep.subr.bf16.mxu1 %v8982_v38  ;;  %6004 = vmatprep.mubr.bf16.mxu0 %v10669_v60  ;;  %v9034_v38 = vld [vmem:[%s10092_s29 + $0x9e0] ss:$48 sps:$4 sm:$0xff]  }
 0x414   : > { %6045 = vmatprep.mubr.bf16.mxu1 %v10671_v61 }
 0x415   : > { %5975 = vmatpush1.bf16.msra.mxu0 %v8977_v40  ;;  %v9039_v40 = vld [vmem:[%s10092_s29 + $0x444] ss:$48 sps:$4 sm:$0xff]  }
 0x416   : > { %6016 = vmatpush1.bf16.msra.mxu1 %v8980_v41  ;;  %5976 = vmatprep.subr.bf16.mxu0 %v8985_v42  ;;  %v9042_v41 = vld [vmem:[%s10092_s29 + $0xa44] ss:$48 sps:$4 sm:$0xff]   ;;  %v9037_v42 = vld [vmem:[%s10092_s29 + $0x440] ss:$48 sps:$4 sm:$0xff]  }
 0x417   : > { %6017 = vmatprep.subr.bf16.mxu1 %v8988_v43  ;;  %v9040_v43 = vld [vmem:[%s10092_s29 + $0xa40] ss:$48 sps:$4 sm:$0xff]  }
 0x419   : > { %5977 = vmatpush1.bf16.msra.mxu0 %v8983_v45  ;;  %v9045_v45 = vld [vmem:[%s10092_s29 + $0x4a4] ss:$48 sps:$4 sm:$0xff]  }
 0x41a   : > { %6018 = vmatpush1.bf16.msra.mxu1 %v8986_v46  ;;  %5978 = vmatprep.subr.bf16.mxu0 %v8991_v48  ;;  %v9048_v46 = vld [vmem:[%s10092_s29 + $0xaa4] ss:$48 sps:$4 sm:$0xff]   ;;  %v9043_v48 = vld [vmem:[%s10092_s29 + $0x4a0] ss:$48 sps:$4 sm:$0xff]  }
 0x41b   : > { %6019 = vmatprep.subr.bf16.mxu1 %v8994_v49  ;;  %v9046_v49 = vld [vmem:[%s10092_s29 + $0xaa0] ss:$48 sps:$4 sm:$0xff]  }
 0x41d   : > { %5979 = vmatpush1.bf16.msra.mxu0 %v8989_v51  ;;  %v9051_v51 = vld [vmem:[%s10092_s29 + $0x504] ss:$48 sps:$4 sm:$0xff]  }
 0x41e   : > { %6020 = vmatpush1.bf16.msra.mxu1 %v8992_v50  ;;  %5980 = vmatprep.subr.bf16.mxu0 %v8997_v54  ;;  %v9054_v50 = vld [vmem:[%s10092_s29 + $0xb04] ss:$48 sps:$4 sm:$0xff]   ;;  %v9049_v54 = vld [vmem:[%s10092_s29 + $0x500] ss:$48 sps:$4 sm:$0xff]  }
 0x41f   : > { %6021 = vmatprep.subr.bf16.mxu1 %v9000_v52  ;;  %v9052_v52 = vld [vmem:[%s10092_s29 + $0xb00] ss:$48 sps:$4 sm:$0xff]  }
 0x421   : > { %5981 = vmatpush1.bf16.msra.mxu0 %v8995_v55  ;;  %v9057_v55 = vld [vmem:[%s10092_s29 + $0x564] ss:$48 sps:$4 sm:$0xff]  }
 0x422   : > { %6022 = vmatpush1.bf16.msra.mxu1 %v8998_v56  ;;  %5982 = vmatprep.subr.bf16.mxu0 %v9003_v58  ;;  %v9060_v56 = vld [vmem:[%s10092_s29 + $0xb64] ss:$48 sps:$4 sm:$0xff]   ;;  %v9055_v58 = vld [vmem:[%s10092_s29 + $0x560] ss:$48 sps:$4 sm:$0xff]  }
 0x423   : > { %6023 = vmatprep.subr.bf16.mxu1 %v9006_v59  ;;  %v5678_v10 = vpop.f32.mrb[24].mxu0  ;;  %v9058_v59 = vld [vmem:[%s10092_s29 + $0xb60] ss:$48 sps:$4 sm:$0xff]  }
 0x424   : > { %v5719_v11 = vpop.f32.mrb[24].mxu1  ;;  %v5679_v2 = vadd.f32 %v5678_v10, %v10551_v53  ;;  %v5680_v3 = vpop.f32.mrb[25].mxu0  ;;  %v9015_v53 = vld [vmem:[%s10092_s29 + $0x2c4] ss:$48 sps:$4 sm:$0xff]   ;;  %v9069_v10 = vld [vmem:[%s10092_s29 + $0x2c] ss:$48 sps:$4 sm:$0xff]  }
 0x425   : > { %v5721_v6 = vpop.f32.mrb[25].mxu1  ;;  %v5681_v8 = vadd.f32 %v5680_v3, %v10553_v57  ;;  %v5682_v12 = vpop.f32.mrb[26].mxu0  ;;  %5983 = vmatpush1.bf16.msra.mxu0 %v9001_v62  ;;  %v9018_v57 = vld [vmem:[%s10092_s29 + $0x8c4] ss:$48 sps:$4 sm:$0xff]   ;;  %v9070_v3 = vld [vmem:[%s10092_s29 + $0x628] ss:$48 sps:$4 sm:$0xff]  }
 0x426   : > { %v5723_v13 = vpop.f32.mrb[26].mxu1  ;;  %6024 = vmatpush1.bf16.msra.mxu1 %v9004_v63  ;;  %v10993_v18 = vadd.f32 %v5719_v11, %v5679_v2  ;;  %v5683_v19 = vpop.f32.mrb[27].mxu0  ;;  %5984 = vmatprep.subr.bf16.mxu0 %v9009_v0  ;;  %v9063_v62 = vld [vmem:[%s10092_s29 + $0x5c4] ss:$48 sps:$4 sm:$0xff]   ;;  %v9061_v0 = vld [vmem:[%s10092_s29 + $0x5c0] ss:$48 sps:$4 sm:$0xff]  }
 0x427   : > { %v5724_v20 = vpop.f32.mrb[27].mxu1  ;;  %6025 = vmatprep.subr.bf16.mxu1 %v9012_v1  ;;  %v10997_v21 = vadd.f32 %v5721_v6, %v5681_v8  ;;  %v9066_v63 = vld [vmem:[%s10092_s29 + $0xbc4] ss:$48 sps:$4 sm:$0xff]   ;;  %v9064_v1 = vld [vmem:[%s10092_s29 + $0xbc0] ss:$48 sps:$4 sm:$0xff]  }
 0x428   : > { %v9072_v11 = vld [vmem:[%s10092_s29 + $0x62c] ss:$48 sps:$4 sm:$0xff]   ;;  %v9067_v2 = vld [vmem:[%s10092_s29 + $0x28] ss:$48 sps:$4 sm:$0xff]  }
 0x429   : > { %5985 = vmatpush1.bf16.msra.mxu0 %v9007_v14  ;;  %v9075_v6 = vld [vmem:[%s10092_s29 + $0x8c] ss:$48 sps:$4 sm:$0xff]   ;;  %v9073_v12 = vld [vmem:[%s10092_s29 + $0x88] ss:$48 sps:$4 sm:$0xff]  }
 0x42a   : > { %6026 = vmatpush1.bf16.msra.mxu1 %v9010_v15  ;;  %5986 = vmatprep.subr.bf16.mxu0 %v9015_v53  ;;  %v9078_v8 = vld [vmem:[%s10092_s29 + $0x68c] ss:$48 sps:$4 sm:$0xff]   ;;  %v9076_v13 = vld [vmem:[%s10092_s29 + $0x688] ss:$48 sps:$4 sm:$0xff]  }
 0x42b   : > { %6027 = vmatprep.subr.bf16.mxu1 %v9018_v57  ;;  %v9081_v14 = vld [vmem:[%s10092_s29 + $0xec] ss:$48 sps:$4 sm:$0xff]   ;;  %v9079_v19 = vld [vmem:[%s10092_s29 + $0xe8] ss:$48 sps:$4 sm:$0xff]  }
 0x42c   : > { %v9084_v15 = vld [vmem:[%s10092_s29 + $0x6ec] ss:$48 sps:$4 sm:$0xff]   ;;  %v9082_v20 = vld [vmem:[%s10092_s29 + $0x6e8] ss:$48 sps:$4 sm:$0xff]  }
 0x42d   : > { %5987 = vmatpush1.bf16.msra.mxu0 %v9013_v22  ;;  %v9087_v53 = vld [vmem:[%s10092_s29 + $0x14c] ss:$48 sps:$4 sm:$0xff]   ;;  %v9085_v22 = vld [vmem:[%s10092_s29 + $0x148] ss:$48 sps:$4 sm:$0xff]  }
 0x42e   : > { %6028 = vmatpush1.bf16.msra.mxu1 %v9016_v23  ;;  %5988 = vmatprep.subr.bf16.mxu0 %v9021_v25  ;;  %v9090_v57 = vld [vmem:[%s10092_s29 + $0x74c] ss:$48 sps:$4 sm:$0xff]   ;;  %v9091_v25 = vld [vmem:[%s10092_s29 + $0x1a8] ss:$48 sps:$4 sm:$0xff]  }
 0x42f   : > { %6029 = vmatprep.subr.bf16.mxu1 %v9024_v26  ;;  %v9096_v23 = vld [vmem:[%s10092_s29 + $0x7ac] ss:$48 sps:$4 sm:$0xff]   ;;  %v9094_v26 = vld [vmem:[%s10092_s29 + $0x7a8] ss:$48 sps:$4 sm:$0xff]  }
 0x431   : > { %5989 = vmatpush1.bf16.msra.mxu0 %v9019_v28  ;;  %v9099_v28 = vld [vmem:[%s10092_s29 + $0x20c] ss:$48 sps:$4 sm:$0xff]  }
 0x432   : > { %6030 = vmatpush1.bf16.msra.mxu1 %v9022_v29  ;;  %5990 = vmatprep.subr.bf16.mxu0 %v9027_v30  ;;  %v9102_v29 = vld [vmem:[%s10092_s29 + $0x80c] ss:$48 sps:$4 sm:$0xff]   ;;  %v9097_v30 = vld [vmem:[%s10092_s29 + $0x208] ss:$48 sps:$4 sm:$0xff]  }
 0x433   : > { %6031 = vmatprep.subr.bf16.mxu1 %v9030_v31  ;;  %v9100_v31 = vld [vmem:[%s10092_s29 + $0x808] ss:$48 sps:$4 sm:$0xff]  }
 0x435   : > { %5991 = vmatpush1.bf16.msra.mxu0 %v9025_v32  ;;  %v9105_v32 = vld [vmem:[%s10092_s29 + $0x26c] ss:$48 sps:$4 sm:$0xff]  }
 0x436   : > { %6032 = vmatpush1.bf16.msra.mxu1 %v9028_v33  ;;  %5992 = vmatprep.subr.bf16.mxu0 %v9033_v34  ;;  %v9108_v33 = vld [vmem:[%s10092_s29 + $0x86c] ss:$48 sps:$4 sm:$0xff]  }
 0x437   : > { %6033 = vmatprep.subr.bf16.mxu1 %v9036_v35 }
 0x439   : > { %5993 = vmatpush1.bf16.msra.mxu0 %v9031_v37 }
 0x43a   : > { %6034 = vmatpush1.bf16.msra.mxu1 %v9034_v38  ;;  %5994 = vmatprep.subr.bf16.mxu0 %v9039_v40 }
 0x43b   : > { %6035 = vmatprep.subr.bf16.mxu1 %v9042_v41 }
 0x43d   : > { %5995 = vmatpush1.bf16.msra.mxu0 %v9037_v42 }
 0x43e   : > { %6036 = vmatpush1.bf16.msra.mxu1 %v9040_v43  ;;  %5996 = vmatprep.subr.bf16.mxu0 %v9045_v45  ;;  %v9103_v45 = vld [vmem:[%s10092_s29 + $0x268] ss:$48 sps:$4 sm:$0xff]  }
 0x43f   : > { %6037 = vmatprep.subr.bf16.mxu1 %v9048_v46  ;;  %v9106_v46 = vld [vmem:[%s10092_s29 + $0x868] ss:$48 sps:$4 sm:$0xff]  }
 0x441   : > { %5997 = vmatpush1.bf16.msra.mxu0 %v9043_v48 }
 0x442   : > { %6038 = vmatpush1.bf16.msra.mxu1 %v9046_v49  ;;  %5998 = vmatprep.subr.bf16.mxu0 %v9051_v51 }
 0x443   : > { %6039 = vmatprep.subr.bf16.mxu1 %v9054_v50 }
 0x445   : > { %5999 = vmatpush1.bf16.msra.mxu0 %v9049_v54  ;;  %v9109_v54 = vld [vmem:[%s10092_s29 + $0x2c8] ss:$48 sps:$4 sm:$0xff]  }
 0x446   : > { %6040 = vmatpush1.bf16.msra.mxu1 %v9052_v52  ;;  %6000 = vmatprep.subr.bf16.mxu0 %v9057_v55  ;;  %v9112_v52 = vld [vmem:[%s10092_s29 + $0x8c8] ss:$48 sps:$4 sm:$0xff]   ;;  %v9117_v55 = vld [vmem:[%s10092_s29 + $0x32c] ss:$48 sps:$4 sm:$0xff]  }
 0x447   : > { %6041 = vmatprep.subr.bf16.mxu1 %v9060_v56  ;;  %v9120_v56 = vld [vmem:[%s10092_s29 + $0x92c] ss:$48 sps:$4 sm:$0xff]  }
 0x449   : > { %6001 = vmatpush1.bf16.msra.mxu0 %v9055_v58  ;;  %v9115_v58 = vld [vmem:[%s10092_s29 + $0x328] ss:$48 sps:$4 sm:$0xff]  }
 0x44a   : > { %6042 = vmatpush1.bf16.msra.mxu1 %v9058_v59  ;;  %6002 = vmatprep.subr.bf16.mxu0 %v9063_v62  ;;  %v9118_v59 = vld [vmem:[%s10092_s29 + $0x928] ss:$48 sps:$4 sm:$0xff]   ;;  %v9123_v62 = vld [vmem:[%s10092_s29 + $0x38c] ss:$48 sps:$4 sm:$0xff]  }
 0x44b   : > { %6043 = vmatprep.subr.bf16.mxu1 %v9066_v63  ;;  %v9126_v63 = vld [vmem:[%s10092_s29 + $0x98c] ss:$48 sps:$4 sm:$0xff]  }
 0x44d   : > { %6003 = vmatpush1.bf16.msra.mxu0 %v9061_v0  ;;  %v9121_v0 = vld [vmem:[%s10092_s29 + $0x388] ss:$48 sps:$4 sm:$0xff]  }
 0x44e   : > { %6044 = vmatpush1.bf16.msra.mxu1 %v9064_v1  ;;  %6054 = vmatprep.subr.bf16.mxu0 %v9069_v10  ;;  %v9124_v1 = vld [vmem:[%s10092_s29 + $0x988] ss:$48 sps:$4 sm:$0xff]   ;;  %v9129_v10 = vld [vmem:[%s10092_s29 + $0x3ec] ss:$48 sps:$4 sm:$0xff]  }
 0x44f   : > { %6095 = vmatprep.subr.bf16.mxu1 %v9072_v11  ;;  %v9132_v11 = vld [vmem:[%s10092_s29 + $0x9ec] ss:$48 sps:$4 sm:$0xff]  }
 0x450   : > { %6005 = vmatmul.mubr.bf16.vlgmr.msra.gmra.mrb[40].mxu0 %v10743_v16 }
 0x451   : > { %6046 = vmatmul.mubr.bf16.vlgmr.msra.gmra.mrb[40].mxu1 %v10745_v17  ;;  %6055 = vmatpush1.bf16.msra.mxu0 %v9067_v2  ;;  %v9127_v2 = vld [vmem:[%s10092_s29 + $0x3e8] ss:$48 sps:$4 sm:$0xff]  }
 0x452   : > { %6096 = vmatpush1.bf16.msra.mxu1 %v9070_v3  ;;  %6056 = vmatprep.subr.bf16.mxu0 %v9075_v6  ;;  %v9130_v3 = vld [vmem:[%s10092_s29 + $0x9e8] ss:$48 sps:$4 sm:$0xff]   ;;  %v9135_v6 = vld [vmem:[%s10092_s29 + $0x44c] ss:$48 sps:$4 sm:$0xff]  }
 0x453   : > { %6097 = vmatprep.subr.bf16.mxu1 %v9078_v8  ;;  %6086 = vmatprep.mubr.bf16.mxu0 %v10669_v60  ;;  %v9088_v60 = vld [vmem:[%s10092_s29 + $0x748] ss:$48 sps:$4 sm:$0xff]   ;;  %v9138_v8 = vld [vmem:[%s10092_s29 + $0xa4c] ss:$48 sps:$4 sm:$0xff]  }
 0x454   : > { %6127 = vmatprep.mubr.bf16.mxu1 %v10671_v61  ;;  %v9093_v61 = vld [vmem:[%s10092_s29 + $0x1ac] ss:$48 sps:$4 sm:$0xff]  }
 0x455   : > { %6057 = vmatpush1.bf16.msra.mxu0 %v9073_v12  ;;  %v9133_v12 = vld [vmem:[%s10092_s29 + $0x448] ss:$48 sps:$4 sm:$0xff]  }
 0x456   : > { %6098 = vmatpush1.bf16.msra.mxu1 %v9076_v13  ;;  %6058 = vmatprep.subr.bf16.mxu0 %v9081_v14  ;;  %v9136_v13 = vld [vmem:[%s10092_s29 + $0xa48] ss:$48 sps:$4 sm:$0xff]   ;;  %v9141_v14 = vld [vmem:[%s10092_s29 + $0x4ac] ss:$48 sps:$4 sm:$0xff]  }
 0x457   : > { %6099 = vmatprep.subr.bf16.mxu1 %v9084_v15  ;;  %v9144_v15 = vld [vmem:[%s10092_s29 + $0xaac] ss:$48 sps:$4 sm:$0xff]  }
 0x459   : > { %6059 = vmatpush1.bf16.msra.mxu0 %v9079_v19  ;;  %v9139_v19 = vld [vmem:[%s10092_s29 + $0x4a8] ss:$48 sps:$4 sm:$0xff]  }
 0x45a   : > { %6100 = vmatpush1.bf16.msra.mxu1 %v9082_v20  ;;  %6060 = vmatprep.subr.bf16.mxu0 %v9087_v53  ;;  %v9142_v20 = vld [vmem:[%s10092_s29 + $0xaa8] ss:$48 sps:$4 sm:$0xff]   ;;  %v9147_v53 = vld [vmem:[%s10092_s29 + $0x50c] ss:$48 sps:$4 sm:$0xff]  }
 0x45b   : > { %6101 = vmatprep.subr.bf16.mxu1 %v9090_v57  ;;  %v9150_v57 = vld [vmem:[%s10092_s29 + $0xb0c] ss:$48 sps:$4 sm:$0xff]  }
 0x45d   : > { %6061 = vmatpush1.bf16.msra.mxu0 %v9085_v22  ;;  %v6140_v22 = vlaneseq }
 0x45e   : > { %6102 = vmatpush1.bf16.msra.mxu1 %v9088_v60  ;;  %6062 = vmatprep.subr.bf16.mxu0 %v9093_v61  ;;  %v9145_v60 = vld [vmem:[%s10092_s29 + $0x508] ss:$48 sps:$4 sm:$0xff]  }
 0x45f   : > { %6103 = vmatprep.subr.bf16.mxu1 %v9096_v23  ;;  %v9148_v61 = vld [vmem:[%s10092_s29 + $0xb08] ss:$48 sps:$4 sm:$0xff]   ;;  %v9153_v23 = vld [vmem:[%s10092_s29 + $0x56c] ss:$48 sps:$4 sm:$0xff]  }
 0x461   : > { %6063 = vmatpush1.bf16.msra.mxu0 %v9091_v25  ;;  %v9156_v25 = vld [vmem:[%s10092_s29 + $0xb6c] ss:$48 sps:$4 sm:$0xff]  }
 0x462   : > { %6104 = vmatpush1.bf16.msra.mxu1 %v9094_v26  ;;  %6064 = vmatprep.subr.bf16.mxu0 %v9099_v28  ;;  %v11101_v26 = vshrl.u32 %v6140_v22, 7  ;;  %v9151_v28 = vld [vmem:[%s10092_s29 + $0x568] ss:$48 sps:$4 sm:$0xff]  }
 0x463   : > { %6105 = vmatprep.subr.bf16.mxu1 %v9102_v29  ;;  %v5760_v34 = vpop.f32.mrb[28].mxu0  ;;  %v9154_v29 = vld [vmem:[%s10092_s29 + $0xb68] ss:$48 sps:$4 sm:$0xff]  }
 0x464   : > { %v5801_v35 = vpop.f32.mrb[28].mxu1  ;;  %v5761_v37 = vadd.f32 %v5760_v34, %v10623_v4  ;;  %v5762_v38 = vpop.f32.mrb[29].mxu0  ;;  %v9111_v4 = vld [vmem:[%s10092_s29 + $0x2cc] ss:$48 sps:$4 sm:$0xff]   ;;  %v11114_v34 = vsub.s32 1, %v11101_v26 }
 0x465   : > { %v5803_v40 = vpop.f32.mrb[29].mxu1  ;;  %v5763_v41 = vadd.f32 %v5762_v38, %v10625_v7  ;;  %v5764_v42 = vpop.f32.mrb[30].mxu0  ;;  %6065 = vmatpush1.bf16.msra.mxu0 %v9097_v30  ;;  %v9114_v7 = vld [vmem:[%s10092_s29 + $0x8cc] ss:$48 sps:$4 sm:$0xff]  }
 0x466   : > { %v5805_v43 = vpop.f32.mrb[30].mxu1  ;;  %6106 = vmatpush1.bf16.msra.mxu1 %v9100_v31  ;;  %v11067_v48 = vadd.f32 %v5801_v35, %v5761_v37  ;;  %v5765_v49 = vpop.f32.mrb[31].mxu0  ;;  %6066 = vmatprep.subr.bf16.mxu0 %v9105_v32  ;;  %v9159_v30 = vld [vmem:[%s10092_s29 + $0x5cc] ss:$48 sps:$4 sm:$0xff]   ;;  %v11108_v32 = vsub.s32 0, %v11101_v26 }
 0x467   : > { %v5806_v51 = vpop.f32.mrb[31].mxu1  ;;  %6107 = vmatprep.subr.bf16.mxu1 %v9108_v33  ;;  %v11071_v50 = vadd.f32 %v5803_v40, %v5763_v41  ;;  %v9162_v31 = vld [vmem:[%s10092_s29 + $0xbcc] ss:$48 sps:$4 sm:$0xff]   ;;  %v9157_v35 = vld [vmem:[%s10092_s29 + $0x5c8] ss:$48 sps:$4 sm:$0xff]  }
 0x468   : > { %v11111_v33 = vld [vmem:[%s10099_s3] sm:$0xff]  ;;  %v9160_v37 = vld [vmem:[%s10092_s29 + $0xbc8] ss:$48 sps:$4 sm:$0xff]   ;;  %v6162_v51 = vsub.s32 5, %v11101_v26 }
 0x469   : > { %6067 = vmatpush1.bf16.msra.mxu0 %v9103_v45  ;;  %v6143_v38 = vrot.slane %v11111_v33, %v11108_v32  ;;  %v6147_v40 = vrot.slane %v11111_v33, %v11114_v34 }
 0x46a   : > { %6108 = vmatpush1.bf16.msra.mxu1 %v9106_v46  ;;  %6068 = vmatprep.subr.bf16.mxu0 %v9111_v4  ;;  %v6158_v46 = vsub.s32 4, %v11101_v26 }
 0x46b   : > { %6109 = vmatprep.subr.bf16.mxu1 %v9114_v7  ;;  %v6200_v41 = vadd.f32 %v6143_v38, %v10993_v18  ;;  %v6201_v42 = vadd.f32 %v6147_v40, %v10997_v21 }
 0x46c   : > { %v6159_v21 = vrot.slane %v11111_v33, %v6158_v46 }
 0x46d   : > { %6069 = vmatpush1.bf16.msra.mxu0 %v9109_v54  ;;  %v7813_v43 = vmul.f32 -1.442695, %v6200_v41  ;;  %v7814_v45 = vmul.f32 -1.442695, %v6201_v42 }
 0x46e   : > { %6110 = vmatpush1.bf16.msra.mxu1 %v9112_v52  ;;  %6070 = vmatprep.subr.bf16.mxu0 %v9117_v55 }
 0x46f   : > { %6111 = vmatprep.subr.bf16.mxu1 %v9120_v56  ;;  %9163 = vpow2.f32 %v7813_v43 }
 0x470   : > { %9165 = vpow2.f32 %v7814_v45 }
 0x471   : > { %6071 = vmatpush1.bf16.msra.mxu0 %v9115_v58  ;;  %v6163_v58 = vrot.slane %v11111_v33, %v6162_v51 }
 0x472   : > { %6112 = vmatpush1.bf16.msra.mxu1 %v9118_v59  ;;  %6072 = vmatprep.subr.bf16.mxu0 %v9123_v62 }
 0x473   : > { %6113 = vmatprep.subr.bf16.mxu1 %v9126_v63 }
 0x475   : > { %6073 = vmatpush1.bf16.msra.mxu0 %v9121_v0 }
 0x476   : > { %6114 = vmatpush1.bf16.msra.mxu1 %v9124_v1  ;;  %6074 = vmatprep.subr.bf16.mxu0 %v9129_v10 }
 0x477   : > { %6115 = vmatprep.subr.bf16.mxu1 %v9132_v11 }
 0x479   : > { %6075 = vmatpush1.bf16.msra.mxu0 %v9127_v2  ;;  %v9164_v49 = vpop.eup %9163 }
 0x47a   : > { %6116 = vmatpush1.bf16.msra.mxu1 %v9130_v3  ;;  %6076 = vmatprep.subr.bf16.mxu0 %v9135_v6  ;;  %v9166_v4 = vpop.eup %9165  ;;  %v6224_v52 = vadd.f32 1.0, %v9164_v49 }
 0x47b   : > { %6117 = vmatprep.subr.bf16.mxu1 %v9138_v8 }
 0x47c   : > { %9167 = vrcp.f32 %v6224_v52 }
 0x47d   : > { %6077 = vmatpush1.bf16.msra.mxu0 %v9133_v12 }
 0x47e   : > { %6118 = vmatpush1.bf16.msra.mxu1 %v9136_v13  ;;  %6078 = vmatprep.subr.bf16.mxu0 %v9141_v14  ;;  %v6150_v13 = vsub.s32 2, %v11101_v26  ;;  %v6154_v14 = vsub.s32 3, %v11101_v26 }
 0x47f   : > { %6119 = vmatprep.subr.bf16.mxu1 %v9144_v15 }
 0x480   : > { %v6151_v15 = vrot.slane %v11111_v33, %v6150_v13 }
 0x481   : > { %6079 = vmatpush1.bf16.msra.mxu0 %v9139_v19  ;;  %v6155_v19 = vrot.slane %v11111_v33, %v6154_v14 }
 0x482   : > { %6120 = vmatpush1.bf16.msra.mxu1 %v9142_v20  ;;  %6080 = vmatprep.subr.bf16.mxu0 %v9147_v53  ;;  %v6202_v20 = vadd.f32 %v6151_v15, %v11067_v48 }
 0x483   : > { %6121 = vmatprep.subr.bf16.mxu1 %v9150_v57  ;;  %v6203_v53 = vadd.f32 %v6155_v19, %v11071_v50 }
 0x484   : > { %v7815_v57 = vmul.f32 -1.442695, %v6202_v20 }
 0x485   : > { %6081 = vmatpush1.bf16.msra.mxu0 %v9145_v60  ;;  %v7816_v22 = vmul.f32 -1.442695, %v6203_v53  ;;  %v6166_v60 = vsub.s32 6, %v11101_v26 }
 0x486   : > { %6122 = vmatpush1.bf16.msra.mxu1 %v9148_v61  ;;  %6082 = vmatprep.subr.bf16.mxu0 %v9153_v23  ;;  %v6170_v23 = vsub.s32 7, %v11101_v26 }
 0x487   : > { %6123 = vmatprep.subr.bf16.mxu1 %v9156_v25 }
 0x488   : > { %v6171_v40 = vrot.slane %v11111_v33, %v6170_v23 }
 0x489   : > { %6083 = vmatpush1.bf16.msra.mxu0 %v9151_v28 }
 0x48a   : > { %6124 = vmatpush1.bf16.msra.mxu1 %v9154_v29  ;;  %6084 = vmatprep.subr.bf16.mxu0 %v9159_v30 }
 0x48b   : > { %6125 = vmatprep.subr.bf16.mxu1 %v9162_v31 }
 0x48d   : > { %6085 = vmatpush1.bf16.msra.mxu0 %v9157_v35  ;;  %v6167_v35 = vrot.slane %v11111_v33, %v6166_v60  ;;  %v6137_v33 = vld [vmem:[%s10099_s3 + $0x8] sm:$0xf] }
 0x48e   : > { %6126 = vmatpush1.bf16.msra.mxu1 %v9160_v37 }
 0x490   : > { %6087 = vmatmul.mubr.bf16.vlgmr.msra.gmra.mrb[44].mxu0 %v10743_v16 }
 0x491   : > { %6128 = vmatmul.mubr.bf16.vlgmr.msra.gmra.mrb[44].mxu1 %v10745_v17  ;;  %v6225_v17 = vadd.f32 1.0, %v9166_v4 }
 0x493   : > { %9169 = vrcp.f32 %v6225_v17  ;;  %v6175_v17 = vrot.slane %v6137_v33, %v11108_v32 }
 0x4a3   : > { %v5842_v7 = vpop.f32.mrb[32].mxu0 }
 0x4a4   : > { %v5883_v54 = vpop.f32.mrb[32].mxu1  ;;  %v5843_v18 = vadd.f32 %v5842_v7, %v10699_v24  ;;  %v5844_v16 = vpop.f32.mrb[33].mxu0 }
 0x4a5   : > { %v5885_v55 = vpop.f32.mrb[33].mxu1  ;;  %v5845_v56 = vadd.f32 %v5844_v16, %v10701_v27  ;;  %v5846_v59 = vpop.f32.mrb[34].mxu0 }
 0x4a6   : > { %v5887_v62 = vpop.f32.mrb[34].mxu1  ;;  %v5884_v63 = vadd.f32 %v5883_v54, %v5843_v18  ;;  %v5847_v0 = vpop.f32.mrb[35].mxu0 }
 0x4a7   : > { %v5888_v1 = vpop.f32.mrb[35].mxu1  ;;  %v5886_v10 = vadd.f32 %v5885_v55, %v5845_v56  ;;  %v9168_v24 = vpop.eup %9167  ;;  %v6179_v62 = vrot.slane %v6137_v33, %v11114_v34 }
 0x4a8   : > { %v6204_v11 = vadd.f32 %v6159_v21, %v5884_v63  ;;  %v9170_v3 = vpop.eup %9169 }
 0x4a9   : > { %v6205_v2 = vadd.f32 %v6163_v58, %v5886_v10 }
 0x4aa   : > { %9171 = vtanh.f32 %v6204_v11 }
 0x4ab   : > { %9173 = vtanh.f32 %v6205_v2 }
 0x4ac   : > { %9175 = vpow2.f32 %v7815_v57 }
 0x4ad   : > { %9177 = vpow2.f32 %v7816_v22 }
 0x4b4   : > { %v9172_v6 = vpop.eup %9171 }
 0x4b5   : > { %v9174_v8 = vpop.eup %9173  ;;  %v11132_v12 = vmul.f32 %v9172_v6, %v9168_v24 }
 0x4b6   : > { %v11134_v27 = vmul.f32 %v9174_v8, %v9170_v3  ;;  %v9176_v61 = vpop.eup %9175 }
 0x4b7   : > { %v9178_v25 = vpop.eup %9177  ;;  %v6226_v30 = vadd.f32 1.0, %v9176_v61 }
 0x4b8   : > { %v6227_v50 = vadd.f32 1.0, %v9178_v25  ;;  %v6183_v25 = vrot.slane %v6137_v33, %v6150_v13 }
 0x4b9   : > { %9179 = vrcp.f32 %v6226_v30 }
 0x4ba   : > { %9181 = vrcp.f32 %v6227_v50 }
 0x4c3   : > { %v9180_v4 = vpop.eup %9179 }
 0x4c4   : > { %v9182_v7 = vpop.eup %9181 }
 0x4e3   : > { %v5924_v28 = vpop.f32.mrb[36].mxu0 }
 0x4e4   : > { %v5965_v29 = vpop.f32.mrb[36].mxu1  ;;  %v5925_v31 = vadd.f32 %v5924_v28, %v10773_v44  ;;  %v5926_v48 = vpop.f32.mrb[37].mxu0 }
 0x4e5   : > { %v5967_v37 = vpop.f32.mrb[37].mxu1  ;;  %v5927_v38 = vadd.f32 %v5926_v48, %v10775_v47  ;;  %v5928_v41 = vpop.f32.mrb[38].mxu0 }
 0x4e6   : > { %v5969_v42 = vpop.f32.mrb[38].mxu1  ;;  %v5966_v43 = vadd.f32 %v5965_v29, %v5925_v31  ;;  %v5929_v45 = vpop.f32.mrb[39].mxu0  ;;  %v6187_v31 = vrot.slane %v6137_v33, %v6154_v14  ;;  %v9216_v33 = vld [vmem:[#allocation13 + $0x100] ss:$8 sps:$4 sm:$0xff] (!%p7821_p0)  }
 0x4e7   : > { %v5970_v46 = vpop.f32.mrb[39].mxu1  ;;  %v5968_v49 = vadd.f32 %v5967_v37, %v5927_v38 }
 0x4e8   : > { %v6206_v51 = vadd.f32 %v6167_v35, %v5966_v43 }
 0x4e9   : > { %v6207_v44 = vadd.f32 %v6171_v40, %v5968_v49 }
 0x4ea   : > { %9183 = vtanh.f32 %v6206_v51 }
 0x4eb   : > { %9185 = vtanh.f32 %v6207_v44 }
 0x4f4   : > { %v9184_v54 = vpop.eup %9183 }
 0x4f5   : > { %v9186_v52 = vpop.eup %9185  ;;  %v6266_v47 = vmul.f32 %v9184_v54, %v9180_v4 }
 0x4f6   : > { %v11152_v18 = vmul.f32 %v9186_v52, %v9182_v7  ;;  %v9211_v7 = vld [vmem:[#allocation13 + $0x4] ss:$8 sps:$4 sm:$0xff] (!%p7821_p0)  }
 0x4f7   : > { %6688 = vmatprep.subr.bf16.mxu1 (!%p7821_p0), %v9211_v7  ;;  %v9299_v7 = vld [vmem:[#allocation13 + $0xe0] ss:$8 sps:$4 sm:$0xff] (!%p7821_p0)  }
 0x523   : > { %v6006_v21 = vpop.f32.mrb[40].mxu0 }
 0x524   : > { %v6047_v16 = vpop.f32.mrb[40].mxu1  ;;  %v6007_v55 = vadd.f32 %v6006_v21, %v10845_v5  ;;  %v6008_v56 = vpop.f32.mrb[41].mxu0  ;;  %v9217_v21 = vld [vmem:[#allocation13 + $0x14] ss:$8 sps:$4 sm:$0xff] (!%p7821_p0)  }
 0x525   : > { %v6049_v58 = vpop.f32.mrb[41].mxu1  ;;  %v6009_v59 = vadd.f32 %v6008_v56, %v10847_v9  ;;  %v6010_v63 = vpop.f32.mrb[42].mxu0  ;;  %v9223_v56 = vld [vmem:[#allocation13 + $0x24] ss:$8 sps:$4 sm:$0xff] (!%p7821_p0)  }
 0x526   : > { %v6051_v0 = vpop.f32.mrb[42].mxu1  ;;  %v6048_v1 = vadd.f32 %v6047_v16, %v6007_v55  ;;  %v6011_v10 = vpop.f32.mrb[43].mxu0  ;;  %v9219_v16 = vld [vmem:[#allocation13 + $0x114] ss:$8 sps:$4 sm:$0xff] (!%p7821_p0)   ;;  %v9221_v55 = vld [vmem:[#allocation13 + $0x10] ss:$8 sps:$4 sm:$0xff] (!%p7821_p0)  }
 0x527   : > { %v6052_v11 = vpop.f32.mrb[43].mxu1  ;;  %v6050_v2 = vadd.f32 %v6049_v58, %v6009_v59  ;;  %v9225_v58 = vld [vmem:[#allocation13 + $0x124] ss:$8 sps:$4 sm:$0xff] (!%p7821_p0)   ;;  %v9227_v59 = vld [vmem:[#allocation13 + $0x20] ss:$8 sps:$4 sm:$0xff] (!%p7821_p0)  }
 0x528   : > { %v6208_v24 = vadd.f32 %v6175_v17, %v6048_v1  ;;  %v9222_v17 = vld [vmem:[#allocation13 + $0x110] ss:$8 sps:$4 sm:$0xff] (!%p7821_p0)   ;;  %v9229_v63 = vld [vmem:[#allocation13 + $0x34] ss:$8 sps:$4 sm:$0xff] (!%p7821_p0)   ;;  %v9235_v11 = vld [vmem:[#allocation13 + $0x44] ss:$8 sps:$4 sm:$0xff] (!%p7821_p0)  }
 0x529   : > { %v6209_v3 = vadd.f32 %v6179_v62, %v6050_v2  ;;  %v9228_v62 = vld [vmem:[#allocation13 + $0x120] ss:$8 sps:$4 sm:$0xff] (!%p7821_p0)   ;;  %v9231_v0 = vld [vmem:[#allocation13 + $0x134] ss:$8 sps:$4 sm:$0xff] (!%p7821_p0)   ;;  %v9233_v1 = vld [vmem:[#allocation13 + $0x30] ss:$8 sps:$4 sm:$0xff] (!%p7821_p0)  }
 0x52a   : > { %v7817_v6 = vmul.f32 -1.442695, %v6208_v24  ;;  %v9234_v10 = vld [vmem:[#allocation13 + $0x130] ss:$8 sps:$4 sm:$0xff] (!%p7821_p0)   ;;  %v9237_v2 = vld [vmem:[#allocation13 + $0x144] ss:$8 sps:$4 sm:$0xff] (!%p7821_p0)  }
 0x52b   : > { %v7818_v8 = vmul.f32 -1.442695, %v6209_v3  ;;  %v9239_v24 = vld [vmem:[#allocation13 + $0x40] ss:$8 sps:$4 sm:$0xff] (!%p7821_p0)  }
 0x52c   : > { %9187 = vpow2.f32 %v7817_v6  ;;  %v9240_v3 = vld [vmem:[#allocation13 + $0x140] ss:$8 sps:$4 sm:$0xff] (!%p7821_p0)   ;;  %v9241_v6 = vld [vmem:[#allocation13 + $0x54] ss:$8 sps:$4 sm:$0xff] (!%p7821_p0)  }
 0x52d   : > { %9189 = vpow2.f32 %v7818_v8  ;;  %v9243_v8 = vld [vmem:[#allocation13 + $0x154] ss:$8 sps:$4 sm:$0xff] (!%p7821_p0)  }
 0x52e   : > { %9191 = vtanh.f32 %v11132_v12 }
 0x52f   : > { %9193 = vtanh.f32 %v11134_v27 }
 0x536   : > { %v9188_v5 = vpop.eup %9187 }
 0x537   : > { %v9190_v15 = vpop.eup %9189  ;;  %v6252_v9 = vadd.f32 1.0, %v9188_v5  ;;  %v9245_v5 = vld [vmem:[#allocation13 + $0x50] ss:$8 sps:$4 sm:$0xff] (!%p7821_p0)  }
 0x538   : > { %v6253_v19 = vadd.f32 1.0, %v9190_v15  ;;  %v9192_v20 = vpop.eup %9191  ;;  %v9246_v15 = vld [vmem:[#allocation13 + $0x150] ss:$8 sps:$4 sm:$0xff] (!%p7821_p0)  }
 0x539   : > { %9195 = vrcp.f32 %v6252_v9  ;;  %v9194_v53 = vpop.eup %9193  ;;  %v9247_v9 = vld [vmem:[#allocation13 + $0x64] ss:$8 sps:$4 sm:$0xff] (!%p7821_p0)  }
 0x53a   : > { %9197 = vrcp.f32 %v6253_v19  ;;  %v9249_v19 = vld [vmem:[#allocation13 + $0x164] ss:$8 sps:$4 sm:$0xff] (!%p7821_p0)  }
 0x543   : > { %v9196_v57 = vpop.eup %9195 }
 0x544   : > { %v9198_v22 = vpop.eup %9197  ;;  %v11161_v60 = vmul.f32 %v9196_v57, %v9192_v20  ;;  %v9251_v20 = vld [vmem:[#allocation13 + $0x60] ss:$8 sps:$4 sm:$0xff] (!%p7821_p0)   ;;  %v9253_v57 = vld [vmem:[#allocation13 + $0x74] ss:$8 sps:$4 sm:$0xff] (!%p7821_p0)  }
 0x545   : > { %v6273_v61 = vmul.f32 %v9198_v22, %v9194_v53  ;;  %v9252_v53 = vld [vmem:[#allocation13 + $0x160] ss:$8 sps:$4 sm:$0xff] (!%p7821_p0)   ;;  %v9255_v22 = vld [vmem:[#allocation13 + $0x174] ss:$8 sps:$4 sm:$0xff] (!%p7821_p0)  }
 0x546   : > { %6276 = vst [vmem:[%s10105_s5] sm:$0xff] %v11161_v60  ;;  %6280 = vst [vmem:[#allocation2] sm:$0xff] %v11161_v60 }
 0x547   : > { %6277 = vst [vmem:[%s10105_s5 + $0x8] sm:$0xff] %v6273_v61  ;;  %6281 = vst [vmem:[#allocation2 + $0x8] sm:$0xff] %v6273_v61  ;;  %v6289_v54 = vpack.c.bf16 (!%p7821_p0), %v6273_v61, %v6273_v61  ;;  %v9257_v61 = vld [vmem:[#allocation13 + $0x70] ss:$8 sps:$4 sm:$0xff] (!%p7821_p0)  }
 0x549   : > { %6720 = vmatprep.mubr.bf16.mxu1 (!%p7821_p0), %v6289_v54  ;;  %v9300_v54 = vld [vmem:[#allocation13 + $0x1e0] ss:$8 sps:$4 sm:$0xff] (!%p7821_p0)  }
 0x563   : > { %v6088_v12 = vpop.f32.mrb[44].mxu0 }
 0x564   : > { %v6129_v23 = vpop.f32.mrb[44].mxu1  ;;  %v6089_v27 = vadd.f32 %v6088_v12, %v10917_v36  ;;  %v6090_v28 = vpop.f32.mrb[45].mxu0  ;;  %v9258_v12 = vld [vmem:[#allocation13 + $0x170] ss:$8 sps:$4 sm:$0xff] (!%p7821_p0)  }
 0x565   : > { %v6131_v29 = vpop.f32.mrb[45].mxu1  ;;  %v6091_v30 = vadd.f32 %v6090_v28, %v10919_v39  ;;  %v6092_v35 = vpop.f32.mrb[46].mxu0  ;;  %v9264_v28 = vld [vmem:[#allocation13 + $0x180] ss:$8 sps:$4 sm:$0xff] (!%p7821_p0)  }
 0x566   : > { %v6133_v48 = vpop.f32.mrb[46].mxu1  ;;  %v6130_v37 = vadd.f32 %v6129_v23, %v6089_v27  ;;  %v6093_v50 = vpop.f32.mrb[47].mxu0  ;;  %v9259_v23 = vld [vmem:[#allocation13 + $0x84] ss:$8 sps:$4 sm:$0xff] (!%p7821_p0)   ;;  %v9270_v35 = vld [vmem:[#allocation13 + $0x190] ss:$8 sps:$4 sm:$0xff] (!%p7821_p0)  }
 0x567   : > { %v6134_v38 = vpop.f32.mrb[47].mxu1  ;;  %v6132_v40 = vadd.f32 %v6131_v29, %v6091_v30  ;;  %v9261_v27 = vld [vmem:[#allocation13 + $0x184] ss:$8 sps:$4 sm:$0xff] (!%p7821_p0)   ;;  %v9265_v29 = vld [vmem:[#allocation13 + $0x94] ss:$8 sps:$4 sm:$0xff] (!%p7821_p0)  }
 0x568   : > { %v6210_v41 = vadd.f32 %v6183_v25, %v6130_v37  ;;  %v9263_v25 = vld [vmem:[#allocation13 + $0x80] ss:$8 sps:$4 sm:$0xff] (!%p7821_p0)   ;;  %v9267_v30 = vld [vmem:[#allocation13 + $0x194] ss:$8 sps:$4 sm:$0xff] (!%p7821_p0)   ;;  %v9271_v48 = vld [vmem:[#allocation13 + $0xa4] ss:$8 sps:$4 sm:$0xff] (!%p7821_p0)  }
 0x569   : > { %v6211_v42 = vadd.f32 %v6187_v31, %v6132_v40  ;;  %v9269_v31 = vld [vmem:[#allocation13 + $0x90] ss:$8 sps:$4 sm:$0xff] (!%p7821_p0)   ;;  %v9273_v37 = vld [vmem:[#allocation13 + $0x1a4] ss:$8 sps:$4 sm:$0xff] (!%p7821_p0)   ;;  %v9275_v50 = vld [vmem:[#allocation13 + $0xa0] ss:$8 sps:$4 sm:$0xff] (!%p7821_p0)  }
 0x56a   : > { %v7819_v43 = vmul.f32 -1.442695, %v6210_v41  ;;  %v9276_v38 = vld [vmem:[#allocation13 + $0x1a0] ss:$8 sps:$4 sm:$0xff] (!%p7821_p0)   ;;  %v9277_v40 = vld [vmem:[#allocation13 + $0xb4] ss:$8 sps:$4 sm:$0xff] (!%p7821_p0)  }
 0x56b   : > { %v7820_v36 = vmul.f32 -1.442695, %v6211_v42  ;;  %v9279_v41 = vld [vmem:[#allocation13 + $0x1b4] ss:$8 sps:$4 sm:$0xff] (!%p7821_p0)   ;;  %v9281_v42 = vld [vmem:[#allocation13 + $0xb0] ss:$8 sps:$4 sm:$0xff] (!%p7821_p0)  }
 0x56c   : > { %9199 = vpow2.f32 %v7819_v43  ;;  %v9282_v43 = vld [vmem:[#allocation13 + $0x1b0] ss:$8 sps:$4 sm:$0xff] (!%p7821_p0)  }
 0x56d   : > { %9201 = vpow2.f32 %v7820_v36  ;;  %v9283_v36 = vld [vmem:[#allocation13 + $0xc4] ss:$8 sps:$4 sm:$0xff] (!%p7821_p0)  }
 0x56e   : > { %9203 = vtanh.f32 %v6266_v47  ;;  %v9213_v47 = vld [vmem:[#allocation13 + $0x104] ss:$8 sps:$4 sm:$0xff] (!%p7821_p0)  }
 0x56f   : > { %9205 = vtanh.f32 %v11152_v18  ;;  %v9215_v18 = vld [vmem:[#allocation13] ss:$8 sps:$4 sm:$0xff] (!%p7821_p0)   ;;  %6729 = vmatprep.subr.bf16.mxu0 (!%p7821_p0), %v9213_v47  ;;  %v9303_v47 = vld [vmem:[#allocation13 + $0x1f4] ss:$8 sps:$4 sm:$0xff] (!%p7821_p0)  }
 0x570   : > { %6689 = vmatpush1.bf16.msra.mxu1 (!%p7821_p0), %v9215_v18  ;;  %6730 = vmatpush1.bf16.msra.mxu0 (!%p7821_p0), %v9216_v33  ;;  %v9305_v18 = vld [vmem:[#allocation13 + $0xf0] ss:$8 sps:$4 sm:$0xff] (!%p7821_p0)  }
 0x571   : > { %6690 = vmatprep.subr.bf16.mxu1 (!%p7821_p0), %v9217_v21  ;;  %6731 = vmatprep.subr.bf16.mxu0 (!%p7821_p0), %v9219_v16  ;;  %v9306_v33 = vld [vmem:[#allocation13 + $0x1f0] ss:$8 sps:$4 sm:$0xff] (!%p7821_p0)   ;;  %v6288_v21 = vpack.c.bf16 (!%p7821_p0), %v11161_v60, %v11161_v60 }
 0x574   : > { %6691 = vmatpush1.bf16.msra.mxu1 (!%p7821_p0), %v9221_v55  ;;  %6732 = vmatpush1.bf16.msra.mxu0 (!%p7821_p0), %v9222_v17  ;;  %v6356_v55 = vld [vmem:[#allocation15] sm:$0x3] (!%p7821_p0) }
 0x575   : > { %6692 = vmatprep.subr.bf16.mxu1 (!%p7821_p0), %v9223_v56  ;;  %6733 = vmatprep.subr.bf16.mxu0 (!%p7821_p0), %v9225_v58  ;;  %v6361_v17 = vrot.slane (!%p7821_p0), %v6356_v55, %v11108_v32  ;;  %v6365_v56 = vrot.slane (!%p7821_p0), %v6356_v55, %v11114_v34 }
 0x576   : > { %v9200_v13 = vpop.eup %9199 }
 0x577   : > { %v9202_v45 = vpop.eup %9201  ;;  %v6254_v39 = vadd.f32 1.0, %v9200_v13  ;;  %v9285_v13 = vld [vmem:[#allocation13 + $0x1c4] ss:$8 sps:$4 sm:$0xff] (!%p7821_p0)  }
 0x578   : > { %v6255_v26 = vadd.f32 1.0, %v9202_v45  ;;  %v9204_v14 = vpop.eup %9203  ;;  %6693 = vmatpush1.bf16.msra.mxu1 (!%p7821_p0), %v9227_v59  ;;  %6734 = vmatpush1.bf16.msra.mxu0 (!%p7821_p0), %v9228_v62  ;;  %v9287_v45 = vld [vmem:[#allocation13 + $0xc0] ss:$8 sps:$4 sm:$0xff] (!%p7821_p0)  }
 0x579   : > { %9207 = vrcp.f32 %v6254_v39  ;;  %v9206_v46 = vpop.eup %9205  ;;  %6694 = vmatprep.subr.bf16.mxu1 (!%p7821_p0), %v9229_v63  ;;  %6735 = vmatprep.subr.bf16.mxu0 (!%p7821_p0), %v9231_v0  ;;  %v9288_v39 = vld [vmem:[#allocation13 + $0x1c0] ss:$8 sps:$4 sm:$0xff] (!%p7821_p0)  }
 0x57a   : > { %9209 = vrcp.f32 %v6255_v26  ;;  %v9289_v26 = vld [vmem:[#allocation13 + $0xd4] ss:$8 sps:$4 sm:$0xff] (!%p7821_p0)  }
 0x57c   : > { %6695 = vmatpush1.bf16.msra.mxu1 (!%p7821_p0), %v9233_v1  ;;  %6736 = vmatpush1.bf16.msra.mxu0 (!%p7821_p0), %v9234_v10 }
 0x57d   : > { %6696 = vmatprep.subr.bf16.mxu1 (!%p7821_p0), %v9235_v11  ;;  %6737 = vmatprep.subr.bf16.mxu0 (!%p7821_p0), %v9237_v2 }
 0x580   : > { %6697 = vmatpush1.bf16.msra.mxu1 (!%p7821_p0), %v9239_v24  ;;  %6738 = vmatpush1.bf16.msra.mxu0 (!%p7821_p0), %v9240_v3 }
 0x581   : > { %6287 = sbr.rel (%p7821_p0) target bundleno = 1673 (0x689), region = 100  ;;  %6698 = vmatprep.subr.bf16.mxu1 (!%p7821_p0), %v9241_v6  ;;  %6739 = vmatprep.subr.bf16.mxu0 (!%p7821_p0), %v9243_v8 }
 0x583   : > { %v9208_v49 = vpop.eup %9207 }
 0x584   : > { %v9210_v51 = vpop.eup %9209  ;;  %v11174_v44 = vmul.f32 %v9208_v49, %v9204_v14  ;;  %6699 = vmatpush1.bf16.msra.mxu1 (!%p7821_p0), %v9245_v5  ;;  %6740 = vmatpush1.bf16.msra.mxu0 (!%p7821_p0), %v9246_v15  ;;  %v9291_v14 = vld [vmem:[#allocation13 + $0x1d4] ss:$8 sps:$4 sm:$0xff] (!%p7821_p0)   ;;  %v9294_v49 = vld [vmem:[#allocation13 + $0x1d0] ss:$8 sps:$4 sm:$0xff] (!%p7821_p0)  }
 0x585   : > { %v6275_v4 = vmul.f32 %v9210_v51, %v9206_v46  ;;  %6700 = vmatprep.subr.bf16.mxu1 (!%p7821_p0), %v9247_v9  ;;  %6741 = vmatprep.subr.bf16.mxu0 (!%p7821_p0), %v9249_v19  ;;  %v9293_v46 = vld [vmem:[#allocation13 + $0xd0] ss:$8 sps:$4 sm:$0xff] (!%p7821_p0)   ;;  %v9295_v51 = vld [vmem:[#allocation13 + $0xe4] ss:$8 sps:$4 sm:$0xff] (!%p7821_p0)  }
 0x586   : > { %6278 = vst [vmem:[%s10105_s5 + $0x10] sm:$0xff] %v11174_v44  ;;  %6282 = vst [vmem:[#allocation2 + $0x10] sm:$0xff] %v11174_v44  ;;  %v6290_v16 = vpack.c.bf16 (!%p7821_p0), %v11174_v44, %v11174_v44 }
 0x587   : > { %6279 = vst [vmem:[%s10105_s5 + $0x18] sm:$0xff] %v6275_v4  ;;  %6283 = vst [vmem:[#allocation2 + $0x18] sm:$0xff] %v6275_v4  ;;  %v6291_v52 = vpack.c.bf16 (!%p7821_p0), %v6275_v4, %v6275_v4  ;;  %v9297_v4 = vld [vmem:[#allocation13 + $0x1e4] ss:$8 sps:$4 sm:$0xff] (!%p7821_p0)  }
 0x588   : > { %6701 = vmatpush1.bf16.msra.mxu1 %v9251_v20  ;;  %6742 = vmatpush1.bf16.msra.mxu0 %v9252_v53 }
 0x589   : > { %6761 = vmatprep.mubr.bf16.mxu0 %v6291_v52  ;;  %6702 = vmatprep.subr.bf16.mxu1 %v9253_v57  ;;  %v9301_v52 = vld [vmem:[#allocation13 + $0xf4] ss:$8 sps:$4 sm:$0xff]  }
 0x58a   : > { %6743 = vmatprep.subr.bf16.mxu0 %v9255_v22 }
 0x58c   : > { %6703 = vmatpush1.bf16.msra.mxu1 %v9257_v61  ;;  %6744 = vmatpush1.bf16.msra.mxu0 %v9258_v12 }
 0x58d   : > { %6704 = vmatprep.subr.bf16.mxu1 %v9259_v23  ;;  %6745 = vmatprep.subr.bf16.mxu0 %v9261_v27 }
 0x590   : > { %6705 = vmatpush1.bf16.msra.mxu1 %v9263_v25  ;;  %6746 = vmatpush1.bf16.msra.mxu0 %v9264_v28 }
 0x591   : > { %6706 = vmatprep.subr.bf16.mxu1 %v9265_v29  ;;  %6747 = vmatprep.subr.bf16.mxu0 %v9267_v30 }
 0x594   : > { %6707 = vmatpush1.bf16.msra.mxu1 %v9269_v31  ;;  %6748 = vmatpush1.bf16.msra.mxu0 %v9270_v35 }
 0x595   : > { %6708 = vmatprep.subr.bf16.mxu1 %v9271_v48  ;;  %6749 = vmatprep.subr.bf16.mxu0 %v9273_v37 }
 0x598   : > { %6709 = vmatpush1.bf16.msra.mxu1 %v9275_v50  ;;  %6750 = vmatpush1.bf16.msra.mxu0 %v9276_v38 }
 0x599   : > { %6710 = vmatprep.subr.bf16.mxu1 %v9277_v40  ;;  %6751 = vmatprep.subr.bf16.mxu0 %v9279_v41 }
 0x59c   : > { %6711 = vmatpush1.bf16.msra.mxu1 %v9281_v42  ;;  %6752 = vmatpush1.bf16.msra.mxu0 %v9282_v43 }
 0x59d   : > { %6712 = vmatprep.subr.bf16.mxu1 %v9283_v36  ;;  %6753 = vmatprep.subr.bf16.mxu0 %v9285_v13 }
 0x5a0   : > { %6713 = vmatpush1.bf16.msra.mxu1 %v9287_v45  ;;  %6754 = vmatpush1.bf16.msra.mxu0 %v9288_v39 }
 0x5a1   : > { %6714 = vmatprep.subr.bf16.mxu1 %v9289_v26  ;;  %6755 = vmatprep.subr.bf16.mxu0 %v9291_v14 }
 0x5a4   : > { %6715 = vmatpush1.bf16.msra.mxu1 %v9293_v46  ;;  %6756 = vmatpush1.bf16.msra.mxu0 %v9294_v49 }
 0x5a5   : > { %6716 = vmatprep.subr.bf16.mxu1 %v9295_v51  ;;  %6757 = vmatprep.subr.bf16.mxu0 %v9297_v4 }
 0x5a8   : > { %6717 = vmatpush1.bf16.msra.mxu1 %v9299_v7  ;;  %6758 = vmatpush1.bf16.msra.mxu0 %v9300_v54 }
 0x5a9   : > { %6718 = vmatprep.subr.bf16.mxu1 %v9301_v52  ;;  %6759 = vmatprep.subr.bf16.mxu0 %v9303_v47 }
 0x5ac   : > { %6719 = vmatpush1.bf16.msra.mxu1 %v9305_v18  ;;  %6760 = vmatpush1.bf16.msra.mxu0 %v9306_v33 }
 0x5af   : > { %6721 = vmatmul.mubr.bf16.vlgmr.msra.gmra.mrb[0].mxu1 %v6288_v21  ;;  %6762 = vmatmul.mubr.bf16.vlgmr.msra.gmra.mrb[0].mxu0 %v6290_v16 }
 0x682   : > { %v6722_v58 = vpop.f32.mrb[0].mxu1  ;;  %v6763_v59 = vpop.f32.mrb[0].mxu0 }
 0x683   : > { %v6723_v62 = vadd.f32 %v6722_v58, %v6361_v17  ;;  %v6724_v63 = vpop.f32.mrb[1].mxu1  ;;  %v6765_v0 = vpop.f32.mrb[1].mxu0 }
 0x684   : > { %v6725_v1 = vadd.f32 %v6724_v63, %v6365_v56  ;;  %v6726_v10 = vpop.f32.mrb[2].mxu1  ;;  %v6767_v60 = vpop.f32.mrb[2].mxu0 }
 0x685   : > { %v6764_v11 = vadd.f32 %v6763_v59, %v6723_v62  ;;  %v6727_v2 = vpop.f32.mrb[3].mxu1  ;;  %v6768_v44 = vpop.f32.mrb[3].mxu0 }
 0x686   : > { %v6766_v24 = vadd.f32 %v6765_v0, %v6725_v1 }
 0x687   : > { %6770 = vst [vmem:[#allocation16] sm:$0xff] %v6764_v11 }
 0x688   : > { %6771 = vst [vmem:[#allocation16 + $0x8] sm:$0xff] %v6766_v24 }
 0x689 PF: > { %s9798_s2 = smov [#allocation16]   ;;  %s7902_s29 = sshll.u32 %s9878_s0, 9 }
 0x68a   : > { %s6784_s19 = sshll.u32 %s9798_s2, 4  ;;  %s11191_s25 = scalar_lea.hbm %s11259_s8, %s7902_s29  ;;  %s6785_s19 = int_to_ptr.vmem [resolvable:$true] %s6784_s19 }
 0x68b   : > { %s9655_s21 = scalar_lea.vmem %s6785_s19, 256  ;;  %p11313_p6 = scmp.eq.s32.totalorder %s9878_s0, 2 }
 0x68c   : > { %p9656_p2 = scmp.ne.s32.totalorder %s6785_s19, %s9655_s21  ;;  %p9662_p3 = scmp.lt.s32.totalorder %s6785_s19, %s6785_s19 }
 0x68d   : > { %p9663_p11 = scmp.lt.s32.totalorder %s9655_s21, %s9655_s21 }
 0x68e   : > { %p9657_p1 = pnand %p9656_p2, %p11313_p6 }
 0x68f   : > { %p9664_p13 = por %p9663_p11, %p9662_p3 }
 0x690   : > { %p9658_p4 = pneg %p9657_p1 }
 0x692   : > { %p9665_p5 = pnand %p9664_p13, %p9658_p4 }
 0x694   : > { %9668 = shalt.err (!%p9665_p5)
}
 0x695   : > { %s9669_s4 = scalar_lea.hbm %s11258_s7, 256  ;;  %p11314_p8 = pmov %p11313_p6 }
 0x696   : > { %p9670_p7 = scmp.ne.s32.totalorder %s11258_s7, %s9669_s4  ;;  %p9675_p12 = scmp.lt.u32.totalorder %s9669_s4, %s11258_s7 }
 0x698   : > { %p9671_p10 = pnand %p9670_p7, %p11314_p8 }
 0x69a   : > { %p9672_p9 = pneg %p9671_p10 }
 0x69c   : > { %p9677_p0 = pnand %p9675_p12, %p9672_p9 }
 0x69e   : > { %9680 = shalt.err (!%p9677_p0)
}
 0x69f   : > { %p11315_p2 = pmov %p11313_p6  ;;  %s6798_s23 = sshll.u32 %s10105_s5, 4  ;;  %s6799_s23 = int_to_ptr.vmem [resolvable:$true] %s6798_s23 }
 0x6a0   : > { %s6773_s30 = scalar_lea.sflag [#allocation18], %s10080_s13  ;;  %s9681_s14 = scalar_lea.vmem %s6799_s23, 512 }
 0x6a1   : > { %7928 = dma.vmem_to_hbm [thread:$0]  (%p11315_p2), %s6785_s19, 256, %s11258_s7, [#allocation9]  }
 0x6a2   : > { %p9682_p6 = scmp.ne.s32.totalorder %s6799_s23, %s9681_s14  ;;  %p11316_p1 = scmp.ne.s32.totalorder %s11288_s26, 0 }
 0x6a3   : > { %s9799_s28 = smov [#allocation17]  }
 0x6a4   : > { %p9683_p4 = pnand %p9682_p6, %p11316_p1  ;;  %s9685_s24 = sshll.u32 %s9799_s28, 4  ;;  %s9686_s24 = int_to_ptr.vmem [resolvable:$false] %s9685_s24 }
 0x6a5   : > { %s9687_s15 = scalar_lea.vmem %s9686_s24, 1024  ;;  %p9688_p11 = scmp.lt.s32.totalorder %s6799_s23, %s9686_s24 }
 0x6a6   : > { %p9684_p3 = pneg %p9683_p4  ;;  %p9689_p13 = scmp.lt.s32.totalorder %s9687_s15, %s9681_s14 }
 0x6a8   : > { %p9690_p5 = por %p9689_p13, %p9688_p11 }
 0x6aa   : > { %p9691_p7 = pnand %p9690_p5, %p9684_p3 }
 0x6ac   : > { %9694 = shalt.err (!%p9691_p7)
}
 0x6ad   : > { %s9695_s13 = scalar_lea.hbm %s11191_s25, 512  ;;  %s9699_s19 = scalar_lea.hbm %s11259_s8, 1536 }
 0x6ae   : > { %p9696_p8 = scmp.ne.s32.totalorder %s11191_s25, %s9695_s13  ;;  %p9700_p12 = scmp.lt.u32.totalorder %s11191_s25, %s11259_s8 }
 0x6af   : > { %p9701_p0 = scmp.lt.u32.totalorder %s9699_s19, %s9695_s13  ;;  %p9703_p6 = scmp.lt.u32.totalorder %s9695_s13, %s11191_s25 }
 0x6b0   : > { %p9697_p10 = pnand %p9696_p8, %p11316_p1 }
 0x6b1   : > { %p9702_p2 = por %p9701_p0, %p9700_p12 }
 0x6b2   : > { %p9698_p9 = pneg %p9697_p10 }
 0x6b3   : > { %p9704_p4 = por %p9703_p6, %p9702_p2 }
 0x6b5   : > { %p9705_p3 = pnand %p9704_p4, %p9698_p9 }
 0x6b7   : > { %9708 = shalt.err (!%p9705_p3)
}
 0x6b8   : > { %7929 = dma.vmem_to_hbm [thread:$0]  (%p11316_p1), %s6799_s23, 512, %s11191_s25, %s6773_s30  }
 0x6b9   : > { %p11317_p11 = scmp.eq.s32.totalorder %s9878_s0, 2 }
 0x6bb   : > { %9756 = dma.done.wait (%p11317_p11), [#allocation9], 256   ;;  %p11318_p13 = pmov %p11317_p11 }
 0x6bd   : > { %9758 = vsyncadd (%p11318_p13), [#allocation9], 4294967040 }
 0x6be PF: > { %s11319_s27 = sld [smem:[#allocation51_spill]]  ;;  %s11320_s21 = sld [smem:[#allocation55_spill]] }
 0x6bf   : > { %p7961_p5 = scmp.ge.s32.totalorder %s9777_s18, 2 }
 0x6c4   : > { %s6814_s20 = sand.u32 1, %s11319_s27   ;;  %p11321_p7 = scmp.ne.s32.totalorder %s11320_s21, 0 }
 0x6c5   : > { %s6815_s22 = scalar_lea.sflag [#allocation18], %s6814_s20 }
 0x6c6   : > { %p7951_p8 = pnand %p7961_p5, %p11321_p7 }
 0x6c8   : > { %9760 = dma.done.wait (!%p7951_p8), %s6815_s22, 512  }
 0x6c9   : > { %9762 = vsyncadd (!%p7951_p8), %s6815_s22, 4294966784  ;;  %s11322_s18 = sld [smem:[#allocation53_spill]]  ;;  %s11323_s26 = sld [smem:[#allocation52_spill]] }
 0x6ca   : > { %s11324_s17 = sld [smem:[#allocation54_spill]]  ;;  %s11325_s15 = smov %s9769_s16 }
 0x6cf   : > { %p31_p1 = scmp.ge.s32.totalorder %s11322_s18, 5   ;;  %s11326_s16 = smov %s11323_s26 }
 0x6d1   :  { %33 = sbr.rel (!%p31_p1) target bundleno = 22 (0x16), region = 195 }
 0x6d8   :  { %6820 = vsyncpa [#allocation8], 1 }
 0x6d9   :  { %6822 = vsyncpa [#allocation8 + $0x1], 1 }
 0x6da   :  { %6823 = vsyncpa [#allocation11], 1 }
 0x6db   :  { %6825 = vsyncpa [#allocation11 + $0x1], 1 }
 0x6dc   :  { %6826 = vsyncpa [#allocation14], 1 }
 0x6dd   :  { %6827 = vsyncpa [#allocation9], 1 }
 0x6de   :  { %6829 = vsyncpa [#allocation9 + $0x1], 1 }
 0x6df   :  { %6830 = vsyncpa [#allocation18], 1 }
 0x6e0   :  { %6832 = vsyncpa [#allocation18 + $0x1], 1 }
 0x6e1   :  { %6833 = vsyncmov [#allocation4] }
 0x6e4   :  { %s6834_s0 = vpop.sfrf %6833 }
 0x6e5   :  { %p7893_p10 = scmp.ne.s32.totalorder %s6834_s0, 0 }
 0x6e7   :  { %6838 = shalt.err (%p7893_p10)  }
 0x6e8   :  { %6840 = vsyncmov [#allocation4 + $0x1] }
 0x6eb   :  { %s6841_s25 = vpop.sfrf %6840 }
 0x6ec   :  { %p7894_p9 = scmp.ne.s32.totalorder %s6841_s25, 0 }
 0x6ee   :  { %6845 = shalt.err (%p7894_p9)  }
 0x6ef   :  { %6847 = vsyncmov [#allocation4 + $0x2] }
 0x6f2   :  { %s6848_s18 = vpop.sfrf %6847 }
 0x6f3   :  { %p7895_p12 = scmp.ne.s32.totalorder %s6848_s18, 0 }
 0x6f5   :  { %6852 = shalt.err (%p7895_p12)  }
 0x6f6   :  { %6854 = vsyncmov [#allocation4 + $0x3] }
 0x6f9   :  { %s6855_s1 = vpop.sfrf %6854 }
 0x6fa   :  { %p7896_p0 = scmp.ne.s32.totalorder %s6855_s1, 0 }
 0x6fc   :  { %6859 = shalt.err (%p7896_p0)  }
 0x6fd   :  { %6861 = vsyncmov [#allocation4 + $0x4] }
 0x700   :  { %s6862_s7 = vpop.sfrf %6861 }
 0x701   :  { %p7897_p2 = scmp.ne.s32.totalorder %s6862_s7, 0 }
 0x703   :  { %6866 = shalt.err (%p7897_p2)  }
 0x704   :  { %6868 = vsyncmov [#allocation4 + $0x5] }
 0x707   :  { %s6869_s8 = vpop.sfrf %6868 }
 0x708   :  { %p7898_p6 = scmp.ne.s32.totalorder %s6869_s8, 0 }
 0x70a   :  { %6873 = shalt.err (%p7898_p6)  }
 0x70b   :  { %6875 = vsyncmov [#allocation4 + $0x6] }
 0x70e   :  { %s6876_s16 = vpop.sfrf %6875 }
 0x70f   :  { %p7899_p4 = scmp.ne.s32.totalorder %s6876_s16, 0 }
 0x711   :  { %6880 = shalt.err (%p7899_p4)  }
 0x712   :  { %6882 = vsyncmov [#allocation4 + $0x7] }
 0x715   :  { %s6883_s4 = vpop.sfrf %6882 }
 0x716   :  { %p7900_p3 = scmp.ne.s32.totalorder %s6883_s4, 0 }
 0x718   :  { %6887 = shalt.err (%p7900_p3)  }

</bundles_post_ra>
